<compile_context>
chip_gen: v7x
topology: tpu7x:2x2x1
jax: 0.10.0
libtpu: 0.0.40
codegen_flags: <defaults>
</compile_context>

<pallas_src>
import functools

import jax
import jax.numpy as jnp
from jax.experimental import pallas as pl
from jax.experimental.pallas import tpu as pltpu

# ---------------- configuration (small synthetic sizes) ----------------
D_MODEL = 32
D_FFN = 64
N_HEADS = 4
N_LEVELS = 2
N_POINTS = 2
NUM_LAYERS = 2
HEAD_DIM = D_MODEL // N_HEADS
LP = N_LEVELS * N_POINTS            # softmax group size per head
SO_DIM = N_HEADS * LP * 2           # sampling-offset channels
AW_DIM = N_HEADS * LP               # attention-logit channels
LN_EPS = 1e-5
TOKEN_TILE = 128                    # token-axis tile (multiple of 8)


# ---------------- Kernel A: fused projections + grouped softmax ----------------
def _proj_kernel(src_ref, pos_ref, vp_w_ref, vp_b_ref, qa_w_ref, qa_b_ref, o_ref):
    src = src_ref[...]
    q = src + pos_ref[...]                                  # q = src + pos in-kernel
    value = jnp.dot(src, vp_w_ref[...],
                    preferred_element_type=jnp.float32) + vp_b_ref[...]
    qa = jnp.dot(q, qa_w_ref[...],
                 preferred_element_type=jnp.float32) + qa_b_ref[...]
    offs = qa[:, :SO_DIM]
    logits = qa[:, SO_DIM:]
    # softmax over the L*P group of each head, via static lane slices
    parts = []
    for h in range(N_HEADS):
        g = logits[:, h * LP:(h + 1) * LP]
        m = jnp.max(g, axis=-1, keepdims=True)
        e = jnp.exp(g - m)
        parts.append(e / jnp.sum(e, axis=-1, keepdims=True))
    attn = jnp.concatenate(parts, axis=-1)
    # one lane-dense output slab: [value | offsets | attn]
    o_ref[...] = jnp.concatenate([value, offs, attn], axis=-1).astype(o_ref.dtype)


def fused_projections(src_flat, pos_flat, vp_w, vp_b, qa_w, qa_b):
    T, C = src_flat.shape
    out_dim = C + SO_DIM + AW_DIM
    tm = min(TOKEN_TILE, T)
    grid = (pl.cdiv(T, tm),)
    return pl.pallas_call(
        _proj_kernel,
        out_shape=jax.ShapeDtypeStruct((T, out_dim), jnp.float32),
        grid=grid,
        in_specs=[
            pl.BlockSpec((tm, C), lambda i: (i, 0)),
            pl.BlockSpec((tm, C), lambda i: (i, 0)),
            pl.BlockSpec((C, C), lambda i: (0, 0)),
            pl.BlockSpec((1, C), lambda i: (0, 0)),
            pl.BlockSpec((C, SO_DIM + AW_DIM), lambda i: (0, 0)),
            pl.BlockSpec((1, SO_DIM + AW_DIM), lambda i: (0, 0)),
        ],
        out_specs=pl.BlockSpec((tm, out_dim), lambda i: (i, 0)),
        compiler_params=pltpu.CompilerParams(dimension_semantics=("parallel",)),
    )(src_flat, pos_flat, vp_w, vp_b.reshape(1, C), qa_w, qa_b.reshape(1, -1))


# ------- Kernel B: aggregation matmul + output_proj + LN1 + FFN + LN2 -------
def _attn_ffn_kernel(a_ref, v_ref, src_ref, op_w_ref, op_b_ref,
                     ln1_g_ref, ln1_b_ref, w1_ref, b1_ref, w2_ref, b2_ref,
                     ln2_g_ref, ln2_b_ref, o_ref):
    src = src_ref[0]                                        # (Lq, C)
    V = v_ref[0]                                            # (Len_in, C) head-major
    Lq, C = src.shape
    # ---- deformable attention aggregation, folded into output_proj ----
    acc = jnp.zeros((Lq, C), jnp.float32)
    for h in range(N_HEADS):
        a_h = a_ref[0, h]                                   # (Lq, Len_in)
        v_h = V[:, h * HEAD_DIM:(h + 1) * HEAD_DIM]         # (Len_in, HD)
        head = jnp.dot(a_h, v_h, preferred_element_type=jnp.float32)
        acc = acc + jnp.dot(head,
                            op_w_ref[h * HEAD_DIM:(h + 1) * HEAD_DIM, :],
                            preferred_element_type=jnp.float32)
    y = acc + op_b_ref[...]
    # ---- residual + LayerNorm1 ----
    v1 = src + y
    mu1 = jnp.mean(v1, axis=-1, keepdims=True)
    var1 = jnp.mean((v1 - mu1) ** 2, axis=-1, keepdims=True)
    x1 = ((v1 - mu1) * jax.lax.rsqrt(var1 + LN_EPS)) * ln1_g_ref[...] + ln1_b_ref[...]
    # ---- FFN + residual + LayerNorm2 ----
    h1 = jnp.maximum(jnp.dot(x1, w1_ref[...],
                             preferred_element_type=jnp.float32) + b1_ref[...], 0.0)
    y2 = jnp.dot(h1, w2_ref[...], preferred_element_type=jnp.float32) + b2_ref[...]
    v2 = x1 + y2
    mu2 = jnp.mean(v2, axis=-1, keepdims=True)
    var2 = jnp.mean((v2 - mu2) ** 2, axis=-1, keepdims=True)
    o_ref[0] = (((v2 - mu2) * jax.lax.rsqrt(var2 + LN_EPS)) * ln2_g_ref[...]
                + ln2_b_ref[...]).astype(o_ref.dtype)


def attn_out_ffn_block(agg, value, src, p):
    N, Lq, C = src.shape
    Len_in = value.shape[1]

    def wspec(shape):
        return pl.BlockSpec(shape, lambda n: (0,) * len(shape))

    return pl.pallas_call(
        _attn_ffn_kernel,
        out_shape=jax.ShapeDtypeStruct((N, Lq, C), jnp.float32),
        grid=(N,),
        in_specs=[
            pl.BlockSpec((1, N_HEADS, Lq, Len_in), lambda n: (n, 0, 0, 0)),
            pl.BlockSpec((1, Len_in, C), lambda n: (n, 0, 0)),
            pl.BlockSpec((1, Lq, C), lambda n: (n, 0, 0)),
            wspec((C, C)), wspec((1, C)),
            wspec((1, C)), wspec((1, C)),
            wspec((C, D_FFN)), wspec((1, D_FFN)),
            wspec((D_FFN, C)), wspec((1, C)),
            wspec((1, C)), wspec((1, C)),
        ],
        out_specs=pl.BlockSpec((1, Lq, C), lambda n: (n, 0, 0)),
        compiler_params=pltpu.CompilerParams(dimension_semantics=("parallel",)),
    )(agg, value, src,
      p["op_w"], p["op_b"].reshape(1, C),
      p["ln1_g"].reshape(1, C), p["ln1_b"].reshape(1, C),
      p["w1"], p["b1"].reshape(1, D_FFN),
      p["w2"], p["b2"].reshape(1, C),
      p["ln2_g"].reshape(1, C), p["ln2_b"].reshape(1, C))


# ---------------- XLA glue (no gathers) ----------------
def get_reference_points(spatial_shapes, valid_ratios):
    # mirrors DeformableTransformerEncoder.get_reference_points
    ref_list = []
    for lvl, (H, W) in enumerate(spatial_shapes):
        ref_y, ref_x = jnp.meshgrid(
            jnp.linspace(0.5, H - 0.5, H, dtype=jnp.float32),
            jnp.linspace(0.5, W - 0.5, W, dtype=jnp.float32),
            indexing="ij")
        ref_y = ref_y.reshape(-1)[None] / (valid_ratios[:, None, lvl, 1] * H)
        ref_x = ref_x.reshape(-1)[None] / (valid_ratios[:, None, lvl, 0] * W)
        ref_list.append(jnp.stack((ref_x, ref_y), -1))
    reference_points = jnp.concatenate(ref_list, 1)
    reference_points = reference_points[:, :, None] * valid_ratios[:, None]
    return reference_points                                  # (N, Len, L, 2)


def build_agg_weights(attn, sampling_locations, spatial_shapes):
    """Fold bilinear corner weights, zeros-padding validity and attention
    weights into one dense (N, M, Lq, Len_in) aggregation matrix so the
    deformable sampling becomes plain MXU matmuls (no gather).
    grid_sample semantics: align_corners=False, padding_mode='zeros'."""
    # TODO(synk): this one-hot build stays in XLA (broadcast/compare math); at
    #             real H*W sizes it should become a scalar-prefetch/DMA gather kernel.
    N, Lq, M = attn.shape[:3]
    per_level = []
    for lvl, (H, W) in enumerate(spatial_shapes):
        HW = H * W
        loc = sampling_locations[:, :, :, lvl]               # (N, Lq, M, P, 2)
        a = attn[:, :, :, lvl]                               # (N, Lq, M, P)
        x = loc[..., 0] * W - 0.5
        y = loc[..., 1] * H - 0.5
        x0 = jnp.floor(x); y0 = jnp.floor(y)
        x1 = x0 + 1.0;     y1 = y0 + 1.0
        wx1 = x - x0; wx0 = 1.0 - wx1
        wy1 = y - y0; wy0 = 1.0 - wy1
        cols = jnp.arange(HW, dtype=jnp.int32)
        acc = jnp.zeros((N, Lq, M, HW), jnp.float32)
        for yy, xx, wc in ((y0, x0, wy0 * wx0), (y0, x1, wy0 * wx1),
                           (y1, x0, wy1 * wx0), (y1, x1, wy1 * wx1)):
            valid = (xx >= 0) & (xx <= W - 1) & (yy >= 0) & (yy <= H - 1)
            xi = jnp.clip(xx, 0, W - 1).astype(jnp.int32)
            yi = jnp.clip(yy, 0, H - 1).astype(jnp.int32)
            flat = yi * W + xi                               # (N, Lq, M, P)
            w_eff = wc * valid.astype(jnp.float32) * a       # attention folded in
            onehot = (flat[..., None] == cols).astype(jnp.float32)
            acc = acc + jnp.sum(w_eff[..., None] * onehot, axis=3)
        per_level.append(acc)
    agg = jnp.concatenate(per_level, axis=-1)                # (N, Lq, M, Len_in)
    return jnp.transpose(agg, (0, 2, 1, 3))                  # (N, M, Lq, Len_in)


def encoder_layer_fwd(p, src, pos, reference_points, spatial_shapes,
                      padding_mask=None):
    N, Len, C = src.shape
    T = N * Len
    pos_flat = (jnp.zeros_like(src) if pos is None else pos).reshape(T, C)
    qa_w = jnp.concatenate([p["so_w"], p["aw_w"]], axis=1)   # (C, 48) merged proj
    qa_b = jnp.concatenate([p["so_b"], p["aw_b"]], axis=0)

    slab = fused_projections(src.reshape(T, C), pos_flat,
                             p["vp_w"], p["vp_b"], qa_w, qa_b)
    value = slab[:, :C].reshape(N, Len, C)
    if padding_mask is not None:
        value = jnp.where(padding_mask[..., None], 0.0, value)
    offsets = slab[:, C:C + SO_DIM].reshape(N, Len, N_HEADS, N_LEVELS, N_POINTS, 2)
    attn = slab[:, C + SO_DIM:].reshape(N, Len, N_HEADS, N_LEVELS, N_POINTS)

    offset_normalizer = jnp.array([[W, H] for (H, W) in spatial_shapes],
                                  dtype=jnp.float32)
    sampling_locations = (reference_points[:, :, None, :, None, :]
                          + offsets
                          / offset_normalizer[None, None, None, :, None, :])
    agg = build_agg_weights(attn, sampling_locations, spatial_shapes)
    # aggregation + output_proj + LN1 + FFN + LN2 in one fused pallas_call
    return attn_out_ffn_block(agg, value, src, p)


@functools.partial(jax.jit, static_argnames=("spatial_shapes",))
def deformable_transformer_encoder(params_list, src, spatial_shapes,
                                   level_start_index, valid_ratios,
                                   pos=None, padding_mask=None):
    del level_start_index  # levels are static; starts derived from spatial_shapes
    reference_points = get_reference_points(spatial_shapes, valid_ratios)
    output = src
    for p in params_list:
        output = encoder_layer_fwd(p, output, pos, reference_points,
                                   spatial_shapes, padding_mask)
    return output


# ---------------- deterministic parameter init ----------------
def init_layer_params(key):
    ks = jax.random.split(key, 12)
    w = lambda k, s: jax.random.normal(k, s, jnp.float32) * 0.02
    return dict(
        so_w=w(ks[0], (D_MODEL, SO_DIM)), so_b=w(ks[1], (SO_DIM,)),
        aw_w=w(ks[2], (D_MODEL, AW_DIM)), aw_b=w(ks[3], (AW_DIM,)),
        vp_w=w(ks[4], (D_MODEL, D_MODEL)), vp_b=w(ks[5], (D_MODEL,)),
        op_w=w(ks[6], (D_MODEL, D_MODEL)), op_b=w(ks[7], (D_MODEL,)),
        ln1_g=jnp.ones((D_MODEL,), jnp.float32),
        ln1_b=jnp.zeros((D_MODEL,), jnp.float32),
        w1=w(ks[8], (D_MODEL, D_FFN)), b1=w(ks[9], (D_FFN,)),
        w2=w(ks[10], (D_FFN, D_MODEL)), b2=w(ks[11], (D_MODEL,)),
        ln2_g=jnp.ones((D_MODEL,), jnp.float32),
        ln2_b=jnp.zeros((D_MODEL,), jnp.float32),
    )


if __name__ == "__main__":
    key = jax.random.PRNGKey(0)
    spatial_shapes = ((8, 8), (4, 4))                  # static tuple (hashable)
    Len = sum(h * w for h, w in spatial_shapes)
    starts = [0]
    for (h, w) in spatial_shapes[:-1]:
        starts.append(starts[-1] + h * w)
    level_start_index = jnp.array(starts, dtype=jnp.int32)
    N = 2

    keys = jax.random.split(key, 3 + NUM_LAYERS)
    src = jax.random.normal(keys[0], (N, Len, D_MODEL), jnp.float32)
    pos = jax.random.normal(keys[1], (N, Len, D_MODEL), jnp.float32)
    valid_ratios = jax.random.uniform(keys[2], (N, N_LEVELS, 2),
                                      minval=0.75, maxval=1.0,
                                      dtype=jnp.float32)
    params_list = [init_layer_params(k) for k in keys[3:]]

    out = deformable_transformer_encoder(
        params_list, src, spatial_shapes, level_start_index,
        valid_ratios, pos=pos, padding_mask=None)
    out = jax.block_until_ready(out)
    assert out.shape == (N, Len, D_MODEL) and out.dtype == jnp.float32
    assert bool(jnp.all(jnp.isfinite(out)))
    print("KERNEL_OK")
</pallas_src>

<mosaic_0001>
module attributes {stable_mosaic.version = 11 : i64} {
  func.func @_proj_kernel(%arg0: i32, %arg1: memref<128x32xf32, #tpu.memory_space<vmem>>, %arg2: memref<128x32xf32, #tpu.memory_space<vmem>>, %arg3: memref<32x32xf32, #tpu.memory_space<vmem>>, %arg4: memref<1x32xf32, #tpu.memory_space<vmem>>, %arg5: memref<32x48xf32, #tpu.memory_space<vmem>>, %arg6: memref<1x48xf32, #tpu.memory_space<vmem>>, %arg7: memref<128x80xf32, #tpu.memory_space<vmem>>) attributes {dimension_semantics = [#tpu.dimension_semantics<parallel>], iteration_bounds = array<i64: 2>, scalar_prefetch = 0 : i64, scratch_operands = 0 : i64, tpu.core_type = #tpu.core_type<tc>, window_params = [{transform_indices = @transform_0, window_bounds = array<i64: 128, 32>}, {transform_indices = @transform_1, window_bounds = array<i64: 128, 32>}, {pipeline_mode = #tpu.pipeline_mode<synchronous>, transform_indices = @transform_2, window_bounds = array<i64: 32, 32>}, {pipeline_mode = #tpu.pipeline_mode<synchronous>, transform_indices = @transform_3, window_bounds = array<i64: 1, 32>}, {pipeline_mode = #tpu.pipeline_mode<synchronous>, transform_indices = @transform_4, window_bounds = array<i64: 32, 48>}, {pipeline_mode = #tpu.pipeline_mode<synchronous>, transform_indices = @transform_5, window_bounds = array<i64: 1, 48>}, {transform_indices = @transform_6, window_bounds = array<i64: 128, 80>}]} {
    %c0 = arith.constant 0 : index
    %c0_0 = arith.constant 0 : index
    %0 = vector.load %arg1[%c0, %c0_0] : memref<128x32xf32, #tpu.memory_space<vmem>>, vector<128x32xf32>
    %c0_1 = arith.constant 0 : index
    %c0_2 = arith.constant 0 : index
    %1 = vector.load %arg2[%c0_1, %c0_2] : memref<128x32xf32, #tpu.memory_space<vmem>>, vector<128x32xf32>
    %2 = arith.addf %0, %1 : vector<128x32xf32>
    %c0_3 = arith.constant 0 : index
    %c0_4 = arith.constant 0 : index
    %3 = vector.load %arg3[%c0_3, %c0_4] : memref<32x32xf32, #tpu.memory_space<vmem>>, vector<32x32xf32>
    %cst = arith.constant dense<0.000000e+00> : vector<128x32xf32>
    %4 = tpu.matmul %0, %3, %cst {dimension_numbers = #tpu.dot_dimension_numbers<[1], [0], [0], [1], [0, 0, 1, 1], [], []>} : vector<128x32xf32>, vector<32x32xf32>, vector<128x32xf32> -> vector<128x32xf32>
    %c0_5 = arith.constant 0 : index
    %c0_6 = arith.constant 0 : index
    %5 = vector.load %arg4[%c0_5, %c0_6] : memref<1x32xf32, #tpu.memory_space<vmem>>, vector<1x32xf32>
    %6 = vector.broadcast %5 : vector<1x32xf32> to vector<128x32xf32>
    %7 = arith.addf %4, %6 : vector<128x32xf32>
    %c0_7 = arith.constant 0 : index
    %c0_8 = arith.constant 0 : index
    %8 = vector.load %arg5[%c0_7, %c0_8] : memref<32x48xf32, #tpu.memory_space<vmem>>, vector<32x48xf32>
    %cst_9 = arith.constant dense<0.000000e+00> : vector<128x48xf32>
    %9 = tpu.matmul %2, %8, %cst_9 {dimension_numbers = #tpu.dot_dimension_numbers<[1], [0], [0], [1], [0, 0, 1, 1], [], []>} : vector<128x32xf32>, vector<32x48xf32>, vector<128x48xf32> -> vector<128x48xf32>
    %c0_10 = arith.constant 0 : index
    %c0_11 = arith.constant 0 : index
    %10 = vector.load %arg6[%c0_10, %c0_11] : memref<1x48xf32, #tpu.memory_space<vmem>>, vector<1x48xf32>
    %11 = vector.broadcast %10 : vector<1x48xf32> to vector<128x48xf32>
    %12 = arith.addf %9, %11 : vector<128x48xf32>
    %13 = vector.extract_strided_slice %12 {offsets = [0, 0], sizes = [128, 32], strides = [1, 1]} : vector<128x48xf32> to vector<128x32xf32>
    %14 = vector.extract_strided_slice %12 {offsets = [0, 32], sizes = [128, 16], strides = [1, 1]} : vector<128x48xf32> to vector<128x16xf32>
    %15 = vector.extract_strided_slice %14 {offsets = [0, 0], sizes = [128, 4], strides = [1, 1]} : vector<128x16xf32> to vector<128x4xf32>
    %cst_12 = arith.constant dense<0xFF800000> : vector<128xf32>
    %16 = vector.multi_reduction <maximumf>, %15, %cst_12 [1] : vector<128x4xf32> to vector<128xf32>
    %17 = vector.shape_cast %16 : vector<128xf32> to vector<128x1xf32>
    %18 = vector.broadcast %17 : vector<128x1xf32> to vector<128x4xf32>
    %19 = arith.subf %15, %18 : vector<128x4xf32>
    %20 = math.exp %19 : vector<128x4xf32>
    %cst_13 = arith.constant dense<0.000000e+00> : vector<128xf32>
    %21 = vector.multi_reduction <add>, %20, %cst_13 [1] : vector<128x4xf32> to vector<128xf32>
    %22 = vector.shape_cast %21 : vector<128xf32> to vector<128x1xf32>
    %23 = vector.broadcast %22 : vector<128x1xf32> to vector<128x4xf32>
    %24 = arith.divf %20, %23 : vector<128x4xf32>
    %25 = vector.extract_strided_slice %14 {offsets = [0, 4], sizes = [128, 4], strides = [1, 1]} : vector<128x16xf32> to vector<128x4xf32>
    %cst_14 = arith.constant dense<0xFF800000> : vector<128xf32>
    %26 = vector.multi_reduction <maximumf>, %25, %cst_14 [1] : vector<128x4xf32> to vector<128xf32>
    %27 = vector.shape_cast %26 : vector<128xf32> to vector<128x1xf32>
    %28 = vector.broadcast %27 : vector<128x1xf32> to vector<128x4xf32>
    %29 = arith.subf %25, %28 : vector<128x4xf32>
    %30 = math.exp %29 : vector<128x4xf32>
    %cst_15 = arith.constant dense<0.000000e+00> : vector<128xf32>
    %31 = vector.multi_reduction <add>, %30, %cst_15 [1] : vector<128x4xf32> to vector<128xf32>
    %32 = vector.shape_cast %31 : vector<128xf32> to vector<128x1xf32>
    %33 = vector.broadcast %32 : vector<128x1xf32> to vector<128x4xf32>
    %34 = arith.divf %30, %33 : vector<128x4xf32>
    %35 = vector.extract_strided_slice %14 {offsets = [0, 8], sizes = [128, 4], strides = [1, 1]} : vector<128x16xf32> to vector<128x4xf32>
    %cst_16 = arith.constant dense<0xFF800000> : vector<128xf32>
    %36 = vector.multi_reduction <maximumf>, %35, %cst_16 [1] : vector<128x4xf32> to vector<128xf32>
    %37 = vector.shape_cast %36 : vector<128xf32> to vector<128x1xf32>
    %38 = vector.broadcast %37 : vector<128x1xf32> to vector<128x4xf32>
    %39 = arith.subf %35, %38 : vector<128x4xf32>
    %40 = math.exp %39 : vector<128x4xf32>
    %cst_17 = arith.constant dense<0.000000e+00> : vector<128xf32>
    %41 = vector.multi_reduction <add>, %40, %cst_17 [1] : vector<128x4xf32> to vector<128xf32>
    %42 = vector.shape_cast %41 : vector<128xf32> to vector<128x1xf32>
    %43 = vector.broadcast %42 : vector<128x1xf32> to vector<128x4xf32>
    %44 = arith.divf %40, %43 : vector<128x4xf32>
    %45 = vector.extract_strided_slice %14 {offsets = [0, 12], sizes = [128, 4], strides = [1, 1]} : vector<128x16xf32> to vector<128x4xf32>
    %cst_18 = arith.constant dense<0xFF800000> : vector<128xf32>
    %46 = vector.multi_reduction <maximumf>, %45, %cst_18 [1] : vector<128x4xf32> to vector<128xf32>
    %47 = vector.shape_cast %46 : vector<128xf32> to vector<128x1xf32>
    %48 = vector.broadcast %47 : vector<128x1xf32> to vector<128x4xf32>
    %49 = arith.subf %45, %48 : vector<128x4xf32>
    %50 = math.exp %49 : vector<128x4xf32>
    %cst_19 = arith.constant dense<0.000000e+00> : vector<128xf32>
    %51 = vector.multi_reduction <add>, %50, %cst_19 [1] : vector<128x4xf32> to vector<128xf32>
    %52 = vector.shape_cast %51 : vector<128xf32> to vector<128x1xf32>
    %53 = vector.broadcast %52 : vector<128x1xf32> to vector<128x4xf32>
    %54 = arith.divf %50, %53 : vector<128x4xf32>
    %55 = tpu.concatenate %24, %34, %44, %54 in 1 : vector<128x4xf32>, vector<128x4xf32>, vector<128x4xf32>, vector<128x4xf32> -> vector<128x16xf32>
    %56 = tpu.concatenate %7, %13, %55 in 1 : vector<128x32xf32>, vector<128x32xf32>, vector<128x16xf32> -> vector<128x80xf32>
    %c0_20 = arith.constant 0 : index
    %c0_21 = arith.constant 0 : index
    %57 = vector.load %arg7[%c0_20, %c0_21] : memref<128x80xf32, #tpu.memory_space<vmem>>, vector<128x80xf32>
    tpu.vector_store %arg7[%c0_20, %c0_21], %56 {strides = array<i32>} : memref<128x80xf32, #tpu.memory_space<vmem>>, vector<128x80xf32>,
    return
  }
  func.func @transform_0(%arg0: i32) -> (i32, i32) {
    %c0_i32 = arith.constant 0 : i32
    %c0_i32_0 = arith.constant 0 : i32
    return %arg0, %c0_i32 : i32, i32
  }
  func.func @transform_1(%arg0: i32) -> (i32, i32) {
    %c0_i32 = arith.constant 0 : i32
    %c0_i32_0 = arith.constant 0 : i32
    return %arg0, %c0_i32 : i32, i32
  }
  func.func @transform_2(%arg0: i32) -> (i32, i32) {
    %c0_i32 = arith.constant 0 : i32
    %c0_i32_0 = arith.constant 0 : i32
    %c0_i32_1 = arith.constant 0 : i32
    return %c0_i32, %c0_i32_0 : i32, i32
  }
  func.func @transform_3(%arg0: i32) -> (i32, i32) {
    %c0_i32 = arith.constant 0 : i32
    %c0_i32_0 = arith.constant 0 : i32
    %c0_i32_1 = arith.constant 0 : i32
    return %c0_i32, %c0_i32_0 : i32, i32
  }
  func.func @transform_4(%arg0: i32) -> (i32, i32) {
    %c0_i32 = arith.constant 0 : i32
    %c0_i32_0 = arith.constant 0 : i32
    %c0_i32_1 = arith.constant 0 : i32
    return %c0_i32, %c0_i32_0 : i32, i32
  }
  func.func @transform_5(%arg0: i32) -> (i32, i32) {
    %c0_i32 = arith.constant 0 : i32
    %c0_i32_0 = arith.constant 0 : i32
    %c0_i32_1 = arith.constant 0 : i32
    return %c0_i32, %c0_i32_0 : i32, i32
  }
  func.func @transform_6(%arg0: i32) -> (i32, i32) {
    %c0_i32 = arith.constant 0 : i32
    %c0_i32_0 = arith.constant 0 : i32
    return %arg0, %c0_i32 : i32, i32
  }
}

module attributes {stable_mosaic.version = 11 : i64} {
  func.func @_attn_ffn_kernel(%arg0: i32, %arg1: memref<1x4x80x80xf32, #tpu.memory_space<vmem>>, %arg2: memref<1x80x32xf32, #tpu.memory_space<vmem>>, %arg3: memref<1x80x32xf32, #tpu.memory_space<vmem>>, %arg4: memref<32x32xf32, #tpu.memory_space<vmem>>, %arg5: memref<1x32xf32, #tpu.memory_space<vmem>>, %arg6: memref<1x32xf32, #tpu.memory_space<vmem>>, %arg7: memref<1x32xf32, #tpu.memory_space<vmem>>, %arg8: memref<32x64xf32, #tpu.memory_space<vmem>>, %arg9: memref<1x64xf32, #tpu.memory_space<vmem>>, %arg10: memref<64x32xf32, #tpu.memory_space<vmem>>, %arg11: memref<1x32xf32, #tpu.memory_space<vmem>>, %arg12: memref<1x32xf32, #tpu.memory_space<vmem>>, %arg13: memref<1x32xf32, #tpu.memory_space<vmem>>, %arg14: memref<1x80x32xf32, #tpu.memory_space<vmem>>) attributes {dimension_semantics = [#tpu.dimension_semantics<parallel>], iteration_bounds = array<i64: 2>, scalar_prefetch = 0 : i64, scratch_operands = 0 : i64, tpu.core_type = #tpu.core_type<tc>, window_params = [{transform_indices = @transform_0, window_bounds = array<i64: 1, 4, 80, 80>}, {transform_indices = @transform_1, window_bounds = array<i64: 1, 80, 32>}, {transform_indices = @transform_2, window_bounds = array<i64: 1, 80, 32>}, {pipeline_mode = #tpu.pipeline_mode<synchronous>, transform_indices = @transform_3, window_bounds = array<i64: 32, 32>}, {pipeline_mode = #tpu.pipeline_mode<synchronous>, transform_indices = @transform_4, window_bounds = array<i64: 1, 32>}, {pipeline_mode = #tpu.pipeline_mode<synchronous>, transform_indices = @transform_5, window_bounds = array<i64: 1, 32>}, {pipeline_mode = #tpu.pipeline_mode<synchronous>, transform_indices = @transform_6, window_bounds = array<i64: 1, 32>}, {pipeline_mode = #tpu.pipeline_mode<synchronous>, transform_indices = @transform_7, window_bounds = array<i64: 32, 64>}, {pipeline_mode = #tpu.pipeline_mode<synchronous>, transform_indices = @transform_8, window_bounds = array<i64: 1, 64>}, {pipeline_mode = #tpu.pipeline_mode<synchronous>, transform_indices = @transform_9, window_bounds = array<i64: 64, 32>}, {pipeline_mode = #tpu.pipeline_mode<synchronous>, transform_indices = @transform_10, window_bounds = array<i64: 1, 32>}, {pipeline_mode = #tpu.pipeline_mode<synchronous>, transform_indices = @transform_11, window_bounds = array<i64: 1, 32>}, {pipeline_mode = #tpu.pipeline_mode<synchronous>, transform_indices = @transform_12, window_bounds = array<i64: 1, 32>}, {transform_indices = @transform_13, window_bounds = array<i64: 1, 80, 32>}]} {
    %c0 = arith.constant 0 : index
    %c0_0 = arith.constant 0 : index
    %c0_1 = arith.constant 0 : index
    %0 = vector.load %arg3[%c0, %c0_0, %c0_1] : memref<1x80x32xf32, #tpu.memory_space<vmem>>, vector<1x80x32xf32>
    %1 = vector.shape_cast %0 : vector<1x80x32xf32> to vector<80x32xf32>
    %c0_2 = arith.constant 0 : index
    %c0_3 = arith.constant 0 : index
    %c0_4 = arith.constant 0 : index
    %2 = vector.load %arg2[%c0_2, %c0_3, %c0_4] : memref<1x80x32xf32, #tpu.memory_space<vmem>>, vector<1x80x32xf32>
    %3 = vector.shape_cast %2 : vector<1x80x32xf32> to vector<80x32xf32>
    %cst = arith.constant 0.000000e+00 : f32
    %4 = vector.broadcast %cst : f32 to vector<80x32xf32>
    %c0_5 = arith.constant 0 : index
    %c0_6 = arith.constant 0 : index
    %c0_7 = arith.constant 0 : index
    %c0_8 = arith.constant 0 : index
    %5 = vector.load %arg1[%c0_5, %c0_6, %c0_7, %c0_8] : memref<1x4x80x80xf32, #tpu.memory_space<vmem>>, vector<1x1x80x80xf32>
    %6 = vector.shape_cast %5 : vector<1x1x80x80xf32> to vector<80x80xf32>
    %7 = vector.extract_strided_slice %3 {offsets = [0, 0], sizes = [80, 8], strides = [1, 1]} : vector<80x32xf32> to vector<80x8xf32>
    %cst_9 = arith.constant dense<0.000000e+00> : vector<80x8xf32>
    %8 = tpu.matmul %6, %7, %cst_9 {dimension_numbers = #tpu.dot_dimension_numbers<[1], [0], [0], [1], [0, 0, 1, 1], [], []>} : vector<80x80xf32>, vector<80x8xf32>, vector<80x8xf32> -> vector<80x8xf32>
    %c0_10 = arith.constant 0 : index
    %c0_11 = arith.constant 0 : index
    %9 = vector.load %arg4[%c0_10, %c0_11] : memref<32x32xf32, #tpu.memory_space<vmem>>, vector<8x32xf32>
    %cst_12 = arith.constant dense<0.000000e+00> : vector<80x32xf32>
    %10 = tpu.matmul %8, %9, %cst_12 {dimension_numbers = #tpu.dot_dimension_numbers<[1], [0], [0], [1], [0, 0, 1, 1], [], []>} : vector<80x8xf32>, vector<8x32xf32>, vector<80x32xf32> -> vector<80x32xf32>
    %11 = arith.addf %4, %10 : vector<80x32xf32>
    %c0_13 = arith.constant 0 : index
    %c1 = arith.constant 1 : index
    %c0_14 = arith.constant 0 : index
    %c0_15 = arith.constant 0 : index
    %12 = vector.load %arg1[%c0_13, %c1, %c0_14, %c0_15] : memref<1x4x80x80xf32, #tpu.memory_space<vmem>>, vector<1x1x80x80xf32>
    %13 = vector.shape_cast %12 : vector<1x1x80x80xf32> to vector<80x80xf32>
    %14 = vector.extract_strided_slice %3 {offsets = [0, 8], sizes = [80, 8], strides = [1, 1]} : vector<80x32xf32> to vector<80x8xf32>
    %cst_16 = arith.constant dense<0.000000e+00> : vector<80x8xf32>
    %15 = tpu.matmul %13, %14, %cst_16 {dimension_numbers = #tpu.dot_dimension_numbers<[1], [0], [0], [1], [0, 0, 1, 1], [], []>} : vector<80x80xf32>, vector<80x8xf32>, vector<80x8xf32> -> vector<80x8xf32>
    %c8 = arith.constant 8 : index
    %c0_17 = arith.constant 0 : index
    %16 = vector.load %arg4[%c8, %c0_17] : memref<32x32xf32, #tpu.memory_space<vmem>>, vector<8x32xf32>
    %cst_18 = arith.constant dense<0.000000e+00> : vector<80x32xf32>
    %17 = tpu.matmul %15, %16, %cst_18 {dimension_numbers = #tpu.dot_dimension_numbers<[1], [0], [0], [1], [0, 0, 1, 1], [], []>} : vector<80x8xf32>, vector<8x32xf32>, vector<80x32xf32> -> vector<80x32xf32>
    %18 = arith.addf %11, %17 : vector<80x32xf32>
    %c0_19 = arith.constant 0 : index
    %c2 = arith.constant 2 : index
    %c0_20 = arith.constant 0 : index
    %c0_21 = arith.constant 0 : index
    %19 = vector.load %arg1[%c0_19, %c2, %c0_20, %c0_21] : memref<1x4x80x80xf32, #tpu.memory_space<vmem>>, vector<1x1x80x80xf32>
    %20 = vector.shape_cast %19 : vector<1x1x80x80xf32> to vector<80x80xf32>
    %21 = vector.extract_strided_slice %3 {offsets = [0, 16], sizes = [80, 8], strides = [1, 1]} : vector<80x32xf32> to vector<80x8xf32>
    %cst_22 = arith.constant dense<0.000000e+00> : vector<80x8xf32>
    %22 = tpu.matmul %20, %21, %cst_22 {dimension_numbers = #tpu.dot_dimension_numbers<[1], [0], [0], [1], [0, 0, 1, 1], [], []>} : vector<80x80xf32>, vector<80x8xf32>, vector<80x8xf32> -> vector<80x8xf32>
    %c16 = arith.constant 16 : index
    %c0_23 = arith.constant 0 : index
    %23 = vector.load %arg4[%c16, %c0_23] : memref<32x32xf32, #tpu.memory_space<vmem>>, vector<8x32xf32>
    %cst_24 = arith.constant dense<0.000000e+00> : vector<80x32xf32>
    %24 = tpu.matmul %22, %23, %cst_24 {dimension_numbers = #tpu.dot_dimension_numbers<[1], [0], [0], [1], [0, 0, 1, 1], [], []>} : vector<80x8xf32>, vector<8x32xf32>, vector<80x32xf32> -> vector<80x32xf32>
    %25 = arith.addf %18, %24 : vector<80x32xf32>
    %c0_25 = arith.constant 0 : index
    %c3 = arith.constant 3 : index
    %c0_26 = arith.constant 0 : index
    %c0_27 = arith.constant 0 : index
    %26 = vector.load %arg1[%c0_25, %c3, %c0_26, %c0_27] : memref<1x4x80x80xf32, #tpu.memory_space<vmem>>, vector<1x1x80x80xf32>
    %27 = vector.shape_cast %26 : vector<1x1x80x80xf32> to vector<80x80xf32>
    %28 = vector.extract_strided_slice %3 {offsets = [0, 24], sizes = [80, 8], strides = [1, 1]} : vector<80x32xf32> to vector<80x8xf32>
    %cst_28 = arith.constant dense<0.000000e+00> : vector<80x8xf32>
    %29 = tpu.matmul %27, %28, %cst_28 {dimension_numbers = #tpu.dot_dimension_numbers<[1], [0], [0], [1], [0, 0, 1, 1], [], []>} : vector<80x80xf32>, vector<80x8xf32>, vector<80x8xf32> -> vector<80x8xf32>
    %c24 = arith.constant 24 : index
    %c0_29 = arith.constant 0 : index
    %30 = vector.load %arg4[%c24, %c0_29] : memref<32x32xf32, #tpu.memory_space<vmem>>, vector<8x32xf32>
    %cst_30 = arith.constant dense<0.000000e+00> : vector<80x32xf32>
    %31 = tpu.matmul %29, %30, %cst_30 {dimension_numbers = #tpu.dot_dimension_numbers<[1], [0], [0], [1], [0, 0, 1, 1], [], []>} : vector<80x8xf32>, vector<8x32xf32>, vector<80x32xf32> -> vector<80x32xf32>
    %32 = arith.addf %25, %31 : vector<80x32xf32>
    %c0_31 = arith.constant 0 : index
    %c0_32 = arith.constant 0 : index
    %33 = vector.load %arg5[%c0_31, %c0_32] : memref<1x32xf32, #tpu.memory_space<vmem>>, vector<1x32xf32>
    %34 = vector.broadcast %33 : vector<1x32xf32> to vector<80x32xf32>
    %35 = arith.addf %32, %34 : vector<80x32xf32>
    %36 = arith.addf %1, %35 : vector<80x32xf32>
    %cst_33 = arith.constant dense<0.000000e+00> : vector<80xf32>
    %37 = vector.multi_reduction <add>, %36, %cst_33 [1] : vector<80x32xf32> to vector<80xf32>
    %38 = vector.shape_cast %37 : vector<80xf32> to vector<80x1xf32>
    %cst_34 = arith.constant 3.200000e+01 : f32
    %39 = vector.broadcast %cst_34 : f32 to vector<80x1xf32>
    %40 = arith.divf %38, %39 : vector<80x1xf32>
    %41 = vector.broadcast %40 : vector<80x1xf32> to vector<80x32xf32>
    %42 = arith.subf %36, %41 : vector<80x32xf32>
    %43 = arith.mulf %42, %42 : vector<80x32xf32>
    %cst_35 = arith.constant dense<0.000000e+00> : vector<80xf32>
    %44 = vector.multi_reduction <add>, %43, %cst_35 [1] : vector<80x32xf32> to vector<80xf32>
    %45 = vector.shape_cast %44 : vector<80xf32> to vector<80x1xf32>
    %cst_36 = arith.constant 3.200000e+01 : f32
    %46 = vector.broadcast %cst_36 : f32 to vector<80x1xf32>
    %47 = arith.divf %45, %46 : vector<80x1xf32>
    %48 = vector.broadcast %40 : vector<80x1xf32> to vector<80x32xf32>
    %49 = arith.subf %36, %48 : vector<80x32xf32>
    %cst_37 = arith.constant 9.99999974E-6 : f32
    %50 = vector.broadcast %cst_37 : f32 to vector<80x1xf32>
    %51 = arith.addf %47, %50 : vector<80x1xf32>
    %52 = math.rsqrt %51 : vector<80x1xf32>
    %53 = vector.broadcast %52 : vector<80x1xf32> to vector<80x32xf32>
    %54 = arith.mulf %49, %53 : vector<80x32xf32>
    %c0_38 = arith.constant 0 : index
    %c0_39 = arith.constant 0 : index
    %55 = vector.load %arg6[%c0_38, %c0_39] : memref<1x32xf32, #tpu.memory_space<vmem>>, vector<1x32xf32>
    %56 = vector.broadcast %55 : vector<1x32xf32> to vector<80x32xf32>
    %57 = arith.mulf %54, %56 : vector<80x32xf32>
    %c0_40 = arith.constant 0 : index
    %c0_41 = arith.constant 0 : index
    %58 = vector.load %arg7[%c0_40, %c0_41] : memref<1x32xf32, #tpu.memory_space<vmem>>, vector<1x32xf32>
    %59 = vector.broadcast %58 : vector<1x32xf32> to vector<80x32xf32>
    %60 = arith.addf %57, %59 : vector<80x32xf32>
    %c0_42 = arith.constant 0 : index
    %c0_43 = arith.constant 0 : index
    %61 = vector.load %arg8[%c0_42, %c0_43] : memref<32x64xf32, #tpu.memory_space<vmem>>, vector<32x64xf32>
    %cst_44 = arith.constant dense<0.000000e+00> : vector<80x64xf32>
    %62 = tpu.matmul %60, %61, %cst_44 {dimension_numbers = #tpu.dot_dimension_numbers<[1], [0], [0], [1], [0, 0, 1, 1], [], []>} : vector<80x32xf32>, vector<32x64xf32>, vector<80x64xf32> -> vector<80x64xf32>
    %c0_45 = arith.constant 0 : index
    %c0_46 = arith.constant 0 : index
    %63 = vector.load %arg9[%c0_45, %c0_46] : memref<1x64xf32, #tpu.memory_space<vmem>>, vector<1x64xf32>
    %64 = vector.broadcast %63 : vector<1x64xf32> to vector<80x64xf32>
    %65 = arith.addf %62, %64 : vector<80x64xf32>
    %cst_47 = arith.constant 0.000000e+00 : f32
    %66 = vector.broadcast %cst_47 : f32 to vector<80x64xf32>
    %67 = arith.maximumf %65, %66 : vector<80x64xf32>
    %c0_48 = arith.constant 0 : index
    %c0_49 = arith.constant 0 : index
    %68 = vector.load %arg10[%c0_48, %c0_49] : memref<64x32xf32, #tpu.memory_space<vmem>>, vector<64x32xf32>
    %cst_50 = arith.constant dense<0.000000e+00> : vector<80x32xf32>
    %69 = tpu.matmul %67, %68, %cst_50 {dimension_numbers = #tpu.dot_dimension_numbers<[1], [0], [0], [1], [0, 0, 1, 1], [], []>} : vector<80x64xf32>, vector<64x32xf32>, vector<80x32xf32> -> vector<80x32xf32>
    %c0_51 = arith.constant 0 : index
    %c0_52 = arith.constant 0 : index
    %70 = vector.load %arg11[%c0_51, %c0_52] : memref<1x32xf32, #tpu.memory_space<vmem>>, vector<1x32xf32>
    %71 = vector.broadcast %70 : vector<1x32xf32> to vector<80x32xf32>
    %72 = arith.addf %69, %71 : vector<80x32xf32>
    %73 = arith.addf %60, %72 : vector<80x32xf32>
    %cst_53 = arith.constant dense<0.000000e+00> : vector<80xf32>
    %74 = vector.multi_reduction <add>, %73, %cst_53 [1] : vector<80x32xf32> to vector<80xf32>
    %75 = vector.shape_cast %74 : vector<80xf32> to vector<80x1xf32>
    %cst_54 = arith.constant 3.200000e+01 : f32
    %76 = vector.broadcast %cst_54 : f32 to vector<80x1xf32>
    %77 = arith.divf %75, %76 : vector<80x1xf32>
    %78 = vector.broadcast %77 : vector<80x1xf32> to vector<80x32xf32>
    %79 = arith.subf %73, %78 : vector<80x32xf32>
    %80 = arith.mulf %79, %79 : vector<80x32xf32>
    %cst_55 = arith.constant dense<0.000000e+00> : vector<80xf32>
    %81 = vector.multi_reduction <add>, %80, %cst_55 [1] : vector<80x32xf32> to vector<80xf32>
    %82 = vector.shape_cast %81 : vector<80xf32> to vector<80x1xf32>
    %cst_56 = arith.constant 3.200000e+01 : f32
    %83 = vector.broadcast %cst_56 : f32 to vector<80x1xf32>
    %84 = arith.divf %82, %83 : vector<80x1xf32>
    %85 = vector.broadcast %77 : vector<80x1xf32> to vector<80x32xf32>
    %86 = arith.subf %73, %85 : vector<80x32xf32>
    %cst_57 = arith.constant 9.99999974E-6 : f32
    %87 = vector.broadcast %cst_57 : f32 to vector<80x1xf32>
    %88 = arith.addf %84, %87 : vector<80x1xf32>
    %89 = math.rsqrt %88 : vector<80x1xf32>
    %90 = vector.broadcast %89 : vector<80x1xf32> to vector<80x32xf32>
    %91 = arith.mulf %86, %90 : vector<80x32xf32>
    %c0_58 = arith.constant 0 : index
    %c0_59 = arith.constant 0 : index
    %92 = vector.load %arg12[%c0_58, %c0_59] : memref<1x32xf32, #tpu.memory_space<vmem>>, vector<1x32xf32>
    %93 = vector.broadcast %92 : vector<1x32xf32> to vector<80x32xf32>
    %94 = arith.mulf %91, %93 : vector<80x32xf32>
    %c0_60 = arith.constant 0 : index
    %c0_61 = arith.constant 0 : index
    %95 = vector.load %arg13[%c0_60, %c0_61] : memref<1x32xf32, #tpu.memory_space<vmem>>, vector<1x32xf32>
    %96 = vector.broadcast %95 : vector<1x32xf32> to vector<80x32xf32>
    %97 = arith.addf %94, %96 : vector<80x32xf32>
    %c0_62 = arith.constant 0 : index
    %c0_63 = arith.constant 0 : index
    %c0_64 = arith.constant 0 : index
    %98 = vector.load %arg14[%c0_62, %c0_63, %c0_64] : memref<1x80x32xf32, #tpu.memory_space<vmem>>, vector<1x80x32xf32>
    %99 = vector.shape_cast %98 : vector<1x80x32xf32> to vector<80x32xf32>
    %100 = vector.shape_cast %97 : vector<80x32xf32> to vector<1x80x32xf32>
    tpu.vector_store %arg14[%c0_62, %c0_63, %c0_64], %100 {strides = array<i32>} : memref<1x80x32xf32, #tpu.memory_space<vmem>>, vector<1x80x32xf32>,
    return
  }
  func.func @transform_0(%arg0: i32) -> (i32, i32, i32, i32) {
    %c0_i32 = arith.constant 0 : i32
    %c0_i32_0 = arith.constant 0 : i32
    %c0_i32_1 = arith.constant 0 : i32
    %c0_i32_2 = arith.constant 0 : i32
    return %arg0, %c0_i32, %c0_i32_0, %c0_i32_1 : i32, i32, i32, i32
  }
  func.func @transform_1(%arg0: i32) -> (i32, i32, i32) {
    %c0_i32 = arith.constant 0 : i32
    %c0_i32_0 = arith.constant 0 : i32
    %c0_i32_1 = arith.constant 0 : i32
    return %arg0, %c0_i32, %c0_i32_0 : i32, i32, i32
  }
  func.func @transform_2(%arg0: i32) -> (i32, i32, i32) {
    %c0_i32 = arith.constant 0 : i32
    %c0_i32_0 = arith.constant 0 : i32
    %c0_i32_1 = arith.constant 0 : i32
    return %arg0, %c0_i32, %c0_i32_0 : i32, i32, i32
  }
  func.func @transform_3(%arg0: i32) -> (i32, i32) {
    %c0_i32 = arith.constant 0 : i32
    %c0_i32_0 = arith.constant 0 : i32
    %c0_i32_1 = arith.constant 0 : i32
    return %c0_i32, %c0_i32_0 : i32, i32
  }
  func.func @transform_4(%arg0: i32) -> (i32, i32) {
    %c0_i32 = arith.constant 0 : i32
    %c0_i32_0 = arith.constant 0 : i32
    %c0_i32_1 = arith.constant 0 : i32
    return %c0_i32, %c0_i32_0 : i32, i32
  }
  func.func @transform_5(%arg0: i32) -> (i32, i32) {
    %c0_i32 = arith.constant 0 : i32
    %c0_i32_0 = arith.constant 0 : i32
    %c0_i32_1 = arith.constant 0 : i32
    return %c0_i32, %c0_i32_0 : i32, i32
  }
  func.func @transform_6(%arg0: i32) -> (i32, i32) {
    %c0_i32 = arith.constant 0 : i32
    %c0_i32_0 = arith.constant 0 : i32
    %c0_i32_1 = arith.constant 0 : i32
    return %c0_i32, %c0_i32_0 : i32, i32
  }
  func.func @transform_7(%arg0: i32) -> (i32, i32) {
    %c0_i32 = arith.constant 0 : i32
    %c0_i32_0 = arith.constant 0 : i32
    %c0_i32_1 = arith.constant 0 : i32
    return %c0_i32, %c0_i32_0 : i32, i32
  }
  func.func @transform_8(%arg0: i32) -> (i32, i32) {
    %c0_i32 = arith.constant 0 : i32
    %c0_i32_0 = arith.constant 0 : i32
    %c0_i32_1 = arith.constant 0 : i32
    return %c0_i32, %c0_i32_0 : i32, i32
  }
  func.func @transform_9(%arg0: i32) -> (i32, i32) {
    %c0_i32 = arith.constant 0 : i32
    %c0_i32_0 = arith.constant 0 : i32
    %c0_i32_1 = arith.constant 0 : i32
    return %c0_i32, %c0_i32_0 : i32, i32
  }
  func.func @transform_10(%arg0: i32) -> (i32, i32) {
    %c0_i32 = arith.constant 0 : i32
    %c0_i32_0 = arith.constant 0 : i32
    %c0_i32_1 = arith.constant 0 : i32
    return %c0_i32, %c0_i32_0 : i32, i32
  }
  func.func @transform_11(%arg0: i32) -> (i32, i32) {
    %c0_i32 = arith.constant 0 : i32
    %c0_i32_0 = arith.constant 0 : i32
    %c0_i32_1 = arith.constant 0 : i32
    return %c0_i32, %c0_i32_0 : i32, i32
  }
  func.func @transform_12(%arg0: i32) -> (i32, i32) {
    %c0_i32 = arith.constant 0 : i32
    %c0_i32_0 = arith.constant 0 : i32
    %c0_i32_1 = arith.constant 0 : i32
    return %c0_i32, %c0_i32_0 : i32, i32
  }
  func.func @transform_13(%arg0: i32) -> (i32, i32, i32) {
    %c0_i32 = arith.constant 0 : i32
    %c0_i32_0 = arith.constant 0 : i32
    %c0_i32_1 = arith.constant 0 : i32
    return %arg0, %c0_i32, %c0_i32_0 : i32, i32, i32
  }
}

</mosaic_0001>

<bundles_post_ra>
// kernel: deformable_transformer_encoder.4
= control target key start
LH: loop header
LB: loop body
LE: loop exit
PB: predicated region body
PF: predicated region fallthrough
CT: control target
= control target key end

     0   :  { %s3185_s21 = smov 0   ;;  %s3187_s22 = smov 0   ;;  %s4558_s0 = inlined_call_operand.vmem [shape: f32[160,32], index: 0, kind: input, shape index: {}]   ;;  %s4559_s1 = inlined_call_operand.vmem [shape: f32[160,32], index: 1, kind: input, shape index: {}]   ;;  %s4560_s2 = inlined_call_operand.vmem [shape: f32[32,32], index: 2, kind: input, shape index: {}]   ;;  %s4561_s3 = inlined_call_operand.vmem [shape: f32[1,32], index: 3, kind: input, shape index: {}]   ;;  %s4562_s4 = inlined_call_operand.vmem [shape: f32[32,48], index: 4, kind: input, shape index: {}]   ;;  %s4563_s5 = inlined_call_operand.vmem [shape: f32[1,48], index: 5, kind: input, shape index: {}]   ;;  %s4564_s6 = inlined_call_operand.vmem [shape: f32[160,80], index: 6, kind: output, shape index: {}]  }
   0x1   :  { %s3189_s23 = smov 0  }
   0x2 LB: > { %s3198_s24 = sadd.s32 4294967295, %s3110_s23   ;;  %s3200_s25 = sadd.s32 1, %s3110_s23   ;;  %s3110_s23 = sphi %s3189_s23, %s4727_s23   ;;  %s3106_s22 = sphi %s3187_s22, %s4726_s22   ;;  %s3102_s21 = sphi %s3185_s21, %s4725_s21  }
   0x3   : > { %s156_s26 = ssub.s32 %s3110_s23, %s3200_s25  ;;  %s159_s27 = sadd.s32 1, %s3106_s22 }
   0x4   : > { %p157_p0 = scmp.eq.s32.totalorder %s156_s26, 0  ;;  %p169_p1 = scmp.ne.s32.totalorder %s3106_s22, %s3102_s21 }
   0x5   : > { %p170_p2 = scmp.eq.s32.totalorder %s3198_s24, 1  ;;  %p2511_p3 = scmp.ge.s32.totalorder %s3110_s23, 1 }
   0x6   : > { %s3208_s28 = scalar_select %p157_p0, %s3106_s22, %s159_s27  }
   0x7   : > { %p3210_p4 = por %p170_p2, %p169_p1  ;;  %p240_p5 = scmp.lt.s32.totalorder %s3110_s23, 3 }
   0x9   : > { %p241_p6 = pnand %p2511_p3, %p240_p5 }
   0xb   : > { %244 = sbr.rel (%p241_p6) target bundleno = 1220 (0x4c4), region = 44 }
  0x12   : > { %v568_v0 = vld [vmem:[%s4562_s4] sm:$0xff]  ;;  %v569_v1 = vld [vmem:[%s4562_s4 + $0x8] sm:$0xff]  ;;  %v570_v2 = vld [vmem:[%s4562_s4 + $0x10] sm:$0xff]  ;;  %s3224_s12 = sshll.u32 %s3198_s24, 4  ;;  %vm374_vm0 = vcmask 261120   ;;  %vm1014_vm1 = vcmask 326944  }
  0x13   : > { %v2683_v3 = vpack.c.bf16 %v569_v1, %v568_v0  ;;  %v571_v4 = vld [vmem:[%s4562_s4 + $0x18] sm:$0xff]  ;;  %p287_p7 = scmp.lt.s32.totalorder %s3224_s12, 19  ;;  %v3293_v54 = vld [vmem:[%s4563_s5] ss:$0 sm:$0xff]  ;;  %vm772_vm2 = vcmask 294144   ;;  %vm1255_vm3 = vcmask 359744  }
  0x14   : > { %v2687_v5 = vpack.c.bf16 %v571_v4, %v570_v2  ;;  %vm1496_vm4 = vcmask 392544   ;;  %s3144_s7 = smov 96   ;;  %s3145_s8 = smov 92   ;;  %vm933_vm5 = vcmask 31744   ;;  %vm2009_vm6 = vcmask 64512  }
  0x15   : > { %2684 = vmatprep.subr.bf16.mxu1 %v2683_v3  ;;  %s288_s15 = scalar_select %p287_p7, %s3224_s12, 19  ;;  %vm2026_vm7 = vcmask 97280   ;;  %vm2187_vm8 = vcmask 523264   ;;  %vm2204_vm9 = vcmask 654336  }
  0x16   : > { %2686 = vmatpush3.bf16.msra.mxu1 %v2683_v3  ;;  %s3146_s9 = smov 88   ;;  %s3147_s10 = smov 84  }
  0x17   : > { %2688 = vmatprep.subr.bf16.mxu1 %v2687_v5  ;;  %s2514_s16 = sshll.u32 %s288_s15, 3  ;;  %s3149_s27 = smov 64  }
  0x18   : > { %s3234_s19 = scalar_lea.vmem %s4558_s0, %s2514_s16  ;;  %s3239_s26 = scalar_lea.vmem %s4559_s1, %s2514_s16 }
  0x19   : > { %v315_v6 = vld [vmem:[%s3234_s19] sm:$0xff]  ;;  %v316_v8 = vld [vmem:[%s3234_s19 + $0x8] sm:$0xff]  ;;  %v317_v11 = vld [vmem:[%s3234_s19 + $0x10] sm:$0xff]  ;;  %s279_s30 = sand.u32 1, %s3102_s21  }
  0x1a   : > { %v331_v7 = vld [vmem:[%s3239_s26] sm:$0xff]  ;;  %2690 = vmatpush3.bf16.msra.mxu1 %v2687_v5  ;;  %v332_v10 = vld [vmem:[%s3239_s26 + $0x8] sm:$0xff]  ;;  %v333_v12 = vld [vmem:[%s3239_s26 + $0x10] sm:$0xff]  ;;  %2619 = vmatprep.mubr.msk.f32.mxu0 %vm374_vm0, %v315_v6 }
  0x1b   : > { %v347_v9 = vadd.f32 %v331_v7, %v315_v6  ;;  %v348_v13 = vadd.f32 %v332_v10, %v316_v8  ;;  %v349_v14 = vadd.f32 %v333_v12, %v317_v11  ;;  %v318_v15 = vld [vmem:[%s3234_s19 + $0x18] sm:$0xff]  ;;  %v319_v17 = vld [vmem:[%s3234_s19 + $0x20] sm:$0xff]  ;;  %v320_v21 = vld [vmem:[%s3234_s19 + $0x28] sm:$0xff] }
  0x1c   : > { %v334_v16 = vld [vmem:[%s3239_s26 + $0x18] sm:$0xff]  ;;  %v335_v18 = vld [vmem:[%s3239_s26 + $0x20] sm:$0xff]  ;;  %v336_v22 = vld [vmem:[%s3239_s26 + $0x28] sm:$0xff] }
  0x1d   : > { %2651 = vmatprep.mubr.msk.f32.mxu1 %vm374_vm0, %v347_v9  ;;  %v350_v19 = vadd.f32 %v334_v16, %v318_v15  ;;  %v351_v20 = vadd.f32 %v335_v18, %v319_v17  ;;  %v321_v23 = vld [vmem:[%s3234_s19 + $0x30] sm:$0xff]  ;;  %v352_v25 = vadd.f32 %v336_v22, %v320_v21  ;;  %v322_v27 = vld [vmem:[%s3234_s19 + $0x38] sm:$0xff]  ;;  %v323_v29 = vld [vmem:[%s3234_s19 + $0x40] sm:$0xff] }
  0x1e   : > { %2652 = vmatmul.mubr.msk.f32.vlgmr.msra.gmra.mrb[0].mxu1 %vm374_vm0, %v348_v13  ;;  %v337_v24 = vld [vmem:[%s3239_s26 + $0x30] sm:$0xff]  ;;  %v338_v28 = vld [vmem:[%s3239_s26 + $0x38] sm:$0xff]  ;;  %v339_v30 = vld [vmem:[%s3239_s26 + $0x40] sm:$0xff] }
  0x1f   : > { %2654 = vmatprep.mubr.msk.f32.mxu1 %vm374_vm0, %v349_v14  ;;  %v353_v26 = vadd.f32 %v337_v24, %v321_v23  ;;  %v354_v31 = vadd.f32 %v338_v28, %v322_v27  ;;  %v355_v32 = vadd.f32 %v339_v30, %v323_v29  ;;  %v324_v33 = vld [vmem:[%s3234_s19 + $0x48] sm:$0xff]  ;;  %v325_v35 = vld [vmem:[%s3234_s19 + $0x50] sm:$0xff]  ;;  %v326_v39 = vld [vmem:[%s3234_s19 + $0x58] sm:$0xff] }
  0x20   : > { %v340_v34 = vld [vmem:[%s3239_s26 + $0x48] sm:$0xff]  ;;  %v341_v36 = vld [vmem:[%s3239_s26 + $0x50] sm:$0xff]  ;;  %v342_v40 = vld [vmem:[%s3239_s26 + $0x58] sm:$0xff] }
  0x21   : > { %v356_v37 = vadd.f32 %v340_v34, %v324_v33  ;;  %v357_v38 = vadd.f32 %v341_v36, %v325_v35  ;;  %v327_v41 = vld [vmem:[%s3234_s19 + $0x60] sm:$0xff]  ;;  %v358_v43 = vadd.f32 %v342_v40, %v326_v39  ;;  %v328_v45 = vld [vmem:[%s3234_s19 + $0x68] sm:$0xff]  ;;  %v329_v47 = vld [vmem:[%s3234_s19 + $0x70] sm:$0xff] }
  0x22   : > { %2655 = vmatmul.mubr.msk.f32.gmra.mrb[2].mxu1 %vm374_vm0, %v350_v19  ;;  %v343_v42 = vld [vmem:[%s3239_s26 + $0x60] sm:$0xff]  ;;  %v344_v46 = vld [vmem:[%s3239_s26 + $0x68] sm:$0xff]  ;;  %v345_v48 = vld [vmem:[%s3239_s26 + $0x70] sm:$0xff] }
  0x23   : > { %2657 = vmatprep.mubr.msk.f32.mxu1 %vm374_vm0, %v351_v20  ;;  %v359_v44 = vadd.f32 %v343_v42, %v327_v41  ;;  %v360_v49 = vadd.f32 %v344_v46, %v328_v45  ;;  %v361_v50 = vadd.f32 %v345_v48, %v329_v47  ;;  %v330_v51 = vld [vmem:[%s3234_s19 + $0x78] sm:$0xff] }
  0x24   : > { %v346_v52 = vld [vmem:[%s3239_s26 + $0x78] sm:$0xff]  ;;  %s3148_s26 = smov 32  }
  0x25   : > { %v362_v53 = vadd.f32 %v346_v52, %v330_v51 }
  0x26   : > { %2658 = vmatmul.mubr.msk.f32.gmra.mrb[4].mxu1 %vm374_vm0, %v352_v25 }
  0x27   : > { %2660 = vmatprep.mubr.msk.f32.mxu1 %vm374_vm0, %v353_v26 }
  0x2a   : > { %2661 = vmatmul.mubr.msk.f32.gmra.mrb[6].mxu1 %vm374_vm0, %v354_v31 }
  0x2b   : > { %2663 = vmatprep.mubr.msk.f32.mxu1 %vm374_vm0, %v355_v32 }
  0x2e   : > { %2664 = vmatmul.mubr.msk.f32.gmra.mrb[8].mxu1 %vm374_vm0, %v356_v37 }
  0x2f   : > { %2666 = vmatprep.mubr.msk.f32.mxu1 %vm374_vm0, %v357_v38 }
  0x32   : > { %2667 = vmatmul.mubr.msk.f32.gmra.mrb[10].mxu1 %vm374_vm0, %v358_v43 }
  0x33   : > { %2669 = vmatprep.mubr.msk.f32.mxu1 %vm374_vm0, %v359_v44 }
  0x36   : > { %2670 = vmatmul.mubr.msk.f32.gmra.mrb[12].mxu1 %vm374_vm0, %v360_v49 }
  0x37   : > { %2672 = vmatprep.mubr.msk.f32.mxu1 %vm374_vm0, %v361_v50 }
  0x3a   : > { %2673 = vmatmul.mubr.msk.f32.gmra.mrb[14].mxu1 %vm374_vm0, %v362_v53 }
  0xf1   : > { %v2653_v55 = vpop.f32.mrb[0].mxu1 }
  0xf2   : > { %v3296_v56 = vadd.f32 %v2653_v55, %v3293_v54  ;;  %v693_v57 = vpop.f32.mrb[1].mxu1 }
  0xf3   : > { %v3306_v63 = vadd.f32 %v3293_v54, %v693_v57 }
  0xf4   : > { %4614 = vst [vmem:[#allocation3_spill] sm:$0xff] %v3296_v56  ;;  %v1018_v58 = vsel %vm1014_vm1, %v3296_v56, -inf  ;;  %v776_v59 = vsel %vm772_vm2, %v3296_v56, -inf  ;;  %v1259_v0 = vsel %vm1255_vm3, %v3296_v56, -inf  ;;  %v1500_v1 = vsel %vm1496_vm4, %v3296_v56, -inf }
  0xf5   : > { %1019 = vmax.xlane.f32.xlu1 %v1018_v58  ;;  %777 = vmax.xlane.f32.xlu0 %v776_v59  ;;  %v2656_v60 = vpop.f32.mrb[2].mxu1  ;;  %4616 = vst [vmem:[#allocation5_spill] sm:$0xff] %v3306_v63  ;;  %v773_v5 = vsel %vm772_vm2, %v3306_v63, -inf  ;;  %v1015_v9 = vsel %vm1014_vm1, %v3306_v63, -inf  ;;  %v1256_v14 = vsel %vm1255_vm3, %v3306_v63, -inf  ;;  %v1497_v21 = vsel %vm1496_vm4, %v3306_v63, -inf }
  0xf6   : > { %v3303_v61 = vadd.f32 %v2656_v60, %v3293_v54  ;;  %v703_v62 = vpop.f32.mrb[3].mxu1 }
  0xf7   : > { %v3334_v19 = vadd.f32 %v3293_v54, %v703_v62 }
  0xf8   : > { %4615 = vst [vmem:[#allocation4_spill] sm:$0xff] %v3303_v61  ;;  %v782_v3 = vsel %vm772_vm2, %v3303_v61, -inf  ;;  %v1024_v7 = vsel %vm1014_vm1, %v3303_v61, -inf  ;;  %v1265_v11 = vsel %vm1255_vm3, %v3303_v61, -inf  ;;  %v1506_v20 = vsel %vm1496_vm4, %v3303_v61, -inf }
  0xf9   : > { %1260 = vmax.xlane.f32.xlu1 %v1259_v0  ;;  %1501 = vmax.xlane.f32.xlu0 %v1500_v1  ;;  %v2659_v2 = vpop.f32.mrb[4].mxu1  ;;  %4620 = vst [vmem:[#allocation9_spill] sm:$0xff] %v3334_v19  ;;  %v779_v27 = vsel %vm772_vm2, %v3334_v19, -inf  ;;  %v1021_v28 = vsel %vm1014_vm1, %v3334_v19, -inf  ;;  %v1262_v34 = vsel %vm1255_vm3, %v3334_v19, -inf  ;;  %v1503_v37 = vsel %vm1496_vm4, %v3334_v19, -inf }
  0xfa   : > { %v713_v4 = vpop.f32.mrb[5].mxu1  ;;  %v3341_v23 = vadd.f32 %v2659_v2, %v3293_v54 }
  0xfb   : > { %v3364_v35 = vadd.f32 %v3293_v54, %v713_v4 }
  0xfc   : > { %4621 = vst [vmem:[#allocation10_spill] sm:$0xff] %v3341_v23  ;;  %v788_v30 = vsel %vm772_vm2, %v3341_v23, -inf  ;;  %v1030_v36 = vsel %vm1014_vm1, %v3341_v23, -inf  ;;  %v1271_v38 = vsel %vm1255_vm3, %v3341_v23, -inf  ;;  %v1512_v41 = vsel %vm1496_vm4, %v3341_v23, -inf }
  0xfd   : > { %783 = vmax.xlane.f32.xlu1 %v782_v3  ;;  %774 = vmax.xlane.f32.xlu0 %v773_v5  ;;  %v2662_v6 = vpop.f32.mrb[6].mxu1  ;;  %4626 = vst [vmem:[#allocation15_spill] sm:$0xff] %v3364_v35  ;;  %v785_v39 = vsel %vm772_vm2, %v3364_v35, -inf  ;;  %v1027_v42 = vsel %vm1014_vm1, %v3364_v35, -inf  ;;  %v1268_v44 = vsel %vm1255_vm3, %v3364_v35, -inf  ;;  %v1509_v47 = vsel %vm1496_vm4, %v3364_v35, -inf }
  0xfe   : > { %v723_v8 = vpop.f32.mrb[7].mxu1  ;;  %v3375_v40 = vadd.f32 %v2662_v6, %v3293_v54 }
  0xff   : > { %v3386_v45 = vadd.f32 %v3293_v54, %v723_v8 }
 0x100   : > { %4627 = vst [vmem:[#allocation16_spill] sm:$0xff] %v3375_v40  ;;  %v794_v43 = vsel %vm772_vm2, %v3375_v40, -inf  ;;  %v1036_v46 = vsel %vm1014_vm1, %v3375_v40, -inf  ;;  %v1277_v48 = vsel %vm1255_vm3, %v3375_v40, -inf  ;;  %v1518_v51 = vsel %vm1496_vm4, %v3375_v40, -inf }
 0x101   : > { %1025 = vmax.xlane.f32.xlu1 %v1024_v7  ;;  %1016 = vmax.xlane.f32.xlu0 %v1015_v9  ;;  %v2665_v10 = vpop.f32.mrb[8].mxu1  ;;  %4628 = vst [vmem:[#allocation17_spill] sm:$0xff] %v3386_v45  ;;  %v791_v49 = vsel %vm772_vm2, %v3386_v45, -inf  ;;  %v1033_v52 = vsel %vm1014_vm1, %v3386_v45, -inf  ;;  %v1274_v55 = vsel %vm1255_vm3, %v3386_v45, -inf  ;;  %v1515_v57 = vsel %vm1496_vm4, %v3386_v45, -inf }
 0x102   : > { %v733_v12 = vpop.f32.mrb[9].mxu1  ;;  %v3397_v50 = vadd.f32 %v2665_v10, %v3293_v54 }
 0x103   : > { %v3323_v13 = vadd.f32 %v3293_v54, %v733_v12 }
 0x104   : > { %4629 = vst [vmem:[#allocation18_spill] sm:$0xff] %v3397_v50  ;;  %v800_v53 = vsel %vm772_vm2, %v3397_v50, -inf  ;;  %v1283_v58 = vsel %vm1255_vm3, %v3397_v50, -inf  ;;  %v1524_v60 = vsel %vm1496_vm4, %v3397_v50, -inf }
 0x105   : > { %4617 = vst [vmem:[#allocation6_spill] sm:$0xff] %v3323_v13  ;;  %1266 = vmax.xlane.f32.xlu1 %v1265_v11  ;;  %1257 = vmax.xlane.f32.xlu0 %v1256_v14  ;;  %v2668_v15 = vpop.f32.mrb[10].mxu1  ;;  %v797_v59 = vsel %vm772_vm2, %v3323_v13, -inf  ;;  %v1039_v62 = vsel %vm1014_vm1, %v3323_v13, -inf  ;;  %v1280_v1 = vsel %vm1255_vm3, %v3323_v13, -inf  ;;  %v1521_v3 = vsel %vm1496_vm4, %v3323_v13, -inf }
 0x106   : > { %v3328_v16 = vadd.f32 %v2668_v15, %v3293_v54  ;;  %v743_v17 = vpop.f32.mrb[11].mxu1 }
 0x107   : > { %v3331_v18 = vadd.f32 %v3293_v54, %v743_v17 }
 0x108   : > { %4618 = vst [vmem:[#allocation7_spill] sm:$0xff] %v3328_v16  ;;  %v806_v0 = vsel %vm772_vm2, %v3328_v16, -inf  ;;  %v1048_v2 = vsel %vm1014_vm1, %v3328_v16, -inf  ;;  %v1289_v4 = vsel %vm1255_vm3, %v3328_v16, -inf  ;;  %v1530_v6 = vsel %vm1496_vm4, %v3328_v16, -inf }
 0x109   : > { %4619 = vst [vmem:[#allocation8_spill] sm:$0xff] %v3331_v18  ;;  %1507 = vmax.xlane.f32.xlu1 %v1506_v20  ;;  %1498 = vmax.xlane.f32.xlu0 %v1497_v21  ;;  %v2671_v22 = vpop.f32.mrb[12].mxu1  ;;  %v803_v5 = vsel %vm772_vm2, %v3331_v18, -inf  ;;  %v1045_v7 = vsel %vm1014_vm1, %v3331_v18, -inf  ;;  %v1286_v9 = vsel %vm1255_vm3, %v3331_v18, -inf  ;;  %v1527_v11 = vsel %vm1496_vm4, %v3331_v18, -inf }
 0x10a   : > { %v3344_v24 = vadd.f32 %v2671_v22, %v3293_v54  ;;  %v753_v25 = vpop.f32.mrb[13].mxu1 }
 0x10b   : > { %v3347_v26 = vadd.f32 %v3293_v54, %v753_v25 }
 0x10c   : > { %4622 = vst [vmem:[#allocation11_spill] sm:$0xff] %v3344_v24  ;;  %v812_v8 = vsel %vm772_vm2, %v3344_v24, -inf  ;;  %v1054_v10 = vsel %vm1014_vm1, %v3344_v24, -inf  ;;  %v1295_v12 = vsel %vm1255_vm3, %v3344_v24, -inf  ;;  %v1536_v15 = vsel %vm1496_vm4, %v3344_v24, -inf }
 0x10d   : > { %4623 = vst [vmem:[#allocation12_spill] sm:$0xff] %v3347_v26  ;;  %780 = vmax.xlane.f32.xlu1 %v779_v27  ;;  %1022 = vmax.xlane.f32.xlu0 %v1021_v28  ;;  %v2674_v29 = vpop.f32.mrb[14].mxu1  ;;  %v809_v14 = vsel %vm772_vm2, %v3347_v26, -inf  ;;  %v1051_v17 = vsel %vm1014_vm1, %v3347_v26, -inf  ;;  %v1292_v21 = vsel %vm1255_vm3, %v3347_v26, -inf  ;;  %v1533_v25 = vsel %vm1496_vm4, %v3347_v26, -inf }
 0x10e   : > { %v3356_v31 = vadd.f32 %v2674_v29, %v3293_v54  ;;  %v763_v32 = vpop.f32.mrb[15].mxu1 }
 0x10f   : > { %v3359_v33 = vadd.f32 %v3293_v54, %v763_v32  ;;  %v1042_v54 = vsel %vm1014_vm1, %v3397_v50, -inf }
 0x110   : > { %4624 = vst [vmem:[#allocation13_spill] sm:$0xff] %v3356_v31  ;;  %v818_v20 = vsel %vm772_vm2, %v3356_v31, -inf  ;;  %v1060_v22 = vsel %vm1014_vm1, %v3356_v31, -inf  ;;  %v1301_v27 = vsel %vm1255_vm3, %v3356_v31, -inf  ;;  %v1542_v29 = vsel %vm1496_vm4, %v3356_v31, -inf }
 0x111   : > { %4625 = vst [vmem:[#allocation14_spill] sm:$0xff] %v3359_v33  ;;  %789 = vmax.xlane.f32.xlu1 %v788_v30  ;;  %1263 = vmax.xlane.f32.xlu0 %v1262_v34  ;;  %v815_v28 = vsel %vm772_vm2, %v3359_v33, -inf  ;;  %v1057_v30 = vsel %vm1014_vm1, %v3359_v33, -inf  ;;  %v1298_v32 = vsel %vm1255_vm3, %v3359_v33, -inf  ;;  %v1539_v34 = vsel %vm1496_vm4, %v3359_v33, -inf }
 0x115   : > { %1031 = vmax.xlane.f32.xlu1 %v1030_v36  ;;  %1504 = vmax.xlane.f32.xlu0 %v1503_v37 }
 0x119   : > { %1272 = vmax.xlane.f32.xlu1 %v1271_v38  ;;  %786 = vmax.xlane.f32.xlu0 %v785_v39 }
 0x11d   : > { %1513 = vmax.xlane.f32.xlu1 %v1512_v41  ;;  %1028 = vmax.xlane.f32.xlu0 %v1027_v42 }
 0x121   : > { %795 = vmax.xlane.f32.xlu1 %v794_v43  ;;  %1269 = vmax.xlane.f32.xlu0 %v1268_v44 }
 0x125   : > { %1037 = vmax.xlane.f32.xlu1 %v1036_v46  ;;  %1510 = vmax.xlane.f32.xlu0 %v1509_v47 }
 0x129   : > { %1278 = vmax.xlane.f32.xlu1 %v1277_v48  ;;  %792 = vmax.xlane.f32.xlu0 %v791_v49 }
 0x12d   : > { %1519 = vmax.xlane.f32.xlu1 %v1518_v51  ;;  %1034 = vmax.xlane.f32.xlu0 %v1033_v52 }
 0x131   : > { %801 = vmax.xlane.f32.xlu1 %v800_v53  ;;  %1275 = vmax.xlane.f32.xlu0 %v1274_v55 }
 0x135   : > { %1043 = vmax.xlane.f32.xlu1 %v1042_v54  ;;  %1516 = vmax.xlane.f32.xlu0 %v1515_v57 }
 0x139   : > { %1284 = vmax.xlane.f32.xlu1 %v1283_v58  ;;  %798 = vmax.xlane.f32.xlu0 %v797_v59 }
 0x13d   : > { %1525 = vmax.xlane.f32.xlu1 %v1524_v60  ;;  %1040 = vmax.xlane.f32.xlu0 %v1039_v62 }
 0x141   : > { %807 = vmax.xlane.f32.xlu1 %v806_v0  ;;  %1281 = vmax.xlane.f32.xlu0 %v1280_v1 }
 0x145   : > { %1049 = vmax.xlane.f32.xlu1 %v1048_v2  ;;  %1522 = vmax.xlane.f32.xlu0 %v1521_v3 }
 0x149   : > { %1290 = vmax.xlane.f32.xlu1 %v1289_v4  ;;  %804 = vmax.xlane.f32.xlu0 %v803_v5 }
 0x14d   : > { %1531 = vmax.xlane.f32.xlu1 %v1530_v6  ;;  %1046 = vmax.xlane.f32.xlu0 %v1045_v7 }
 0x151   : > { %813 = vmax.xlane.f32.xlu1 %v812_v8  ;;  %1287 = vmax.xlane.f32.xlu0 %v1286_v9 }
 0x155   : > { %1055 = vmax.xlane.f32.xlu1 %v1054_v10  ;;  %1528 = vmax.xlane.f32.xlu0 %v1527_v11 }
 0x159   : > { %1296 = vmax.xlane.f32.xlu1 %v1295_v12  ;;  %810 = vmax.xlane.f32.xlu0 %v809_v14 }
 0x15d   : > { %1537 = vmax.xlane.f32.xlu1 %v1536_v15  ;;  %1052 = vmax.xlane.f32.xlu0 %v1051_v17 }
 0x161   : > { %819 = vmax.xlane.f32.xlu1 %v818_v20  ;;  %1293 = vmax.xlane.f32.xlu0 %v1292_v21 }
 0x165   : > { %1061 = vmax.xlane.f32.xlu1 %v1060_v22  ;;  %1534 = vmax.xlane.f32.xlu0 %v1533_v25 }
 0x169   : > { %1302 = vmax.xlane.f32.xlu1 %v1301_v27  ;;  %816 = vmax.xlane.f32.xlu0 %v815_v28 }
 0x16d   : > { %1543 = vmax.xlane.f32.xlu1 %v1542_v29  ;;  %1058 = vmax.xlane.f32.xlu0 %v1057_v30 }
 0x171   : > { %1299 = vmax.xlane.f32.xlu0 %v1298_v32 }
 0x175   : > { %1540 = vmax.xlane.f32.xlu0 %v1539_v34 }
 0x182   : > { %v1020_v36 = vpop.xlane.xlu1 %1019  ;;  %v778_v37 = vpop.xlane.xlu0 %777 }
 0x183   : > { %v822_v38 = vsub.f32 %v3296_v56, %v778_v37  ;;  %v1064_v39 = vsub.f32 %v3296_v56, %v1020_v36 }
 0x185   : > { %v839_v41 = vmul.f32 1.442695, %v822_v38  ;;  %v1081_v46 = vmul.f32 1.442695, %v1064_v39 }
 0x186   : > { %v1261_v42 = vpop.xlane.xlu1 %1260  ;;  %v1502_v43 = vpop.xlane.xlu0 %1501 }
 0x187   : > { %v1305_v44 = vsub.f32 %v3296_v56, %v1261_v42  ;;  %2785 = vpow2.f32 %v839_v41  ;;  %v1546_v51 = vsub.f32 %v3296_v56, %v1502_v43 }
 0x188   : > { %2787 = vpow2.f32 %v1081_v46 }
 0x189   : > { %v1322_v49 = vmul.f32 1.442695, %v1305_v44  ;;  %v1563_v57 = vmul.f32 1.442695, %v1546_v51 }
 0x18a   : > { %v784_v47 = vpop.xlane.xlu1 %783  ;;  %v775_v48 = vpop.xlane.xlu0 %774 }
 0x18b   : > { %v821_v52 = vsub.f32 %v3306_v63, %v775_v48  ;;  %2789 = vpow2.f32 %v1322_v49  ;;  %v824_v58 = vsub.f32 %v3303_v61, %v784_v47 }
 0x18d   : > { %v837_v53 = vmul.f32 1.442695, %v821_v52  ;;  %v843_v2 = vmul.f32 1.442695, %v824_v58 }
 0x18e   : > { %v1026_v55 = vpop.xlane.xlu1 %1025  ;;  %v1017_v54 = vpop.xlane.xlu0 %1016 }
 0x18f   : > { %v1063_v59 = vsub.f32 %v3306_v63, %v1017_v54  ;;  %2791 = vpow2.f32 %v837_v53  ;;  %v1066_v3 = vsub.f32 %v3303_v61, %v1026_v55 }
 0x190   : > { %2793 = vpow2.f32 %v1563_v57 }
 0x191   : > { %v1079_v60 = vmul.f32 1.442695, %v1063_v59  ;;  %v3478_v62 = vpop.eup %2785  ;;  %v1085_v9 = vmul.f32 1.442695, %v1066_v3 }
 0x192   : > { %v1267_v0 = vpop.xlane.xlu1 %1266  ;;  %v1258_v1 = vpop.xlane.xlu0 %1257  ;;  %887 = vrot.lane.b32.xlu1 %v3478_v62, %s3144_s7 }
 0x193   : > { %v1304_v4 = vsub.f32 %v3306_v63, %v1258_v1  ;;  %2795 = vpow2.f32 %v1079_v60  ;;  %v3484_v6 = vpop.eup %2787  ;;  %v1307_v11 = vsub.f32 %v3303_v61, %v1267_v0 }
 0x194   : > { %2797 = vpow2.f32 %v843_v2 }
 0x195   : > { %v1320_v5 = vmul.f32 1.442695, %v1304_v4  ;;  %v3490_v12 = vpop.eup %2789  ;;  %v1326_v21 = vmul.f32 1.442695, %v1307_v11 }
 0x196   : > { %v1508_v7 = vpop.xlane.xlu1 %1507  ;;  %v1499_v8 = vpop.xlane.xlu0 %1498  ;;  %1129 = vrot.lane.b32.xlu1 %v3484_v6, %s3145_s8 }
 0x197   : > { %v1545_v10 = vsub.f32 %v3306_v63, %v1499_v8  ;;  %2799 = vpow2.f32 %v1320_v5  ;;  %v1548_v22 = vsub.f32 %v3303_v61, %v1508_v7 }
 0x198   : > { %2801 = vpow2.f32 %v1085_v9 }
 0x199   : > { %v1561_v14 = vmul.f32 1.442695, %v1545_v10  ;;  %v3492_v15 = vpop.eup %2791  ;;  %v1567_v30 = vmul.f32 1.442695, %v1548_v22 }
 0x19a   : > { %v781_v17 = vpop.xlane.xlu1 %780  ;;  %v1023_v20 = vpop.xlane.xlu0 %1022  ;;  %1370 = vrot.lane.b32.xlu1 %v3490_v12, %s3146_s9  ;;  %885 = vrot.lane.b32.xlu0 %v3492_v15, %s3144_s7 }
 0x19b   : > { %2803 = vpow2.f32 %v1561_v14  ;;  %v3499_v25 = vpop.eup %2793  ;;  %v823_v32 = vsub.f32 %v3334_v19, %v781_v17  ;;  %v1065_v39 = vsub.f32 %v3334_v19, %v1023_v20 }
 0x19c   : > { %2805 = vpow2.f32 %v1326_v21 }
 0x19d   : > { %v3501_v27 = vpop.eup %2795  ;;  %2807 = vpow2.f32 %v1567_v30  ;;  %v841_v41 = vmul.f32 1.442695, %v823_v32  ;;  %v1083_v47 = vmul.f32 1.442695, %v1065_v39 }
 0x19e   : > { %v790_v28 = vpop.xlane.xlu1 %789  ;;  %v1264_v29 = vpop.xlane.xlu0 %1263  ;;  %1611 = vrot.lane.b32.xlu1 %v3499_v25, %s3147_s10  ;;  %1127 = vrot.lane.b32.xlu0 %v3501_v27, %s3145_s8 }
 0x19f   : > { %v3508_v34 = vpop.eup %2797  ;;  %v1306_v48 = vsub.f32 %v3334_v19, %v1264_v29  ;;  %2809 = vpow2.f32 %v841_v41  ;;  %v826_v2 = vsub.f32 %v3341_v23, %v790_v28 }
 0x1a0   : > { %2811 = vpow2.f32 %v1083_v47 }
 0x1a1   : > { %v3510_v36 = vpop.eup %2799  ;;  %v1324_v54 = vmul.f32 1.442695, %v1306_v48  ;;  %v847_v10 = vmul.f32 1.442695, %v826_v2 }
 0x1a2   : > { %v1032_v37 = vpop.xlane.xlu1 %1031  ;;  %v1505_v38 = vpop.xlane.xlu0 %1504  ;;  %891 = vrot.lane.b32.xlu1 %v3508_v34, %s3144_s7  ;;  %1368 = vrot.lane.b32.xlu0 %v3510_v36, %s3146_s9 }
 0x1a3   : > { %v3517_v42 = vpop.eup %2801  ;;  %v1547_v57 = vsub.f32 %v3334_v19, %v1505_v38  ;;  %v1068_v11 = vsub.f32 %v3341_v23, %v1032_v37 }
 0x1a5   : > { %v3519_v43 = vpop.eup %2803  ;;  %v1565_v3 = vmul.f32 1.442695, %v1547_v57  ;;  %v1089_v29 = vmul.f32 1.442695, %v1068_v11 }
 0x1a6   : > { %v1273_v44 = vpop.xlane.xlu1 %1272  ;;  %v787_v46 = vpop.xlane.xlu0 %786  ;;  %1133 = vrot.lane.b32.xlu1 %v3517_v42, %s3145_s8  ;;  %1609 = vrot.lane.b32.xlu0 %v3519_v43, %s3147_s10 }
 0x1a7   : > { %v825_v49 = vsub.f32 %v3364_v35, %v787_v46  ;;  %v3527_v52 = vpop.eup %2805  ;;  %v1309_v30 = vsub.f32 %v3341_v23, %v1273_v44 }
 0x1a8   : > { %v3533_v60 = vpop.eup %2807 }
 0x1a9   : > { %v845_v51 = vmul.f32 1.442695, %v825_v49  ;;  %v3539_v7 = vpop.eup %2809  ;;  %v1330_v47 = vmul.f32 1.442695, %v1309_v30 }
 0x1aa   : > { %v1514_v53 = vpop.xlane.xlu1 %1513  ;;  %v1029_v55 = vpop.xlane.xlu0 %1028  ;;  %1374 = vrot.lane.b32.xlu1 %v3527_v52, %s3146_s9 }
 0x1ab   : > { %v1067_v58 = vsub.f32 %v3364_v35, %v1029_v55  ;;  %2813 = vpow2.f32 %v845_v51  ;;  %v3545_v17 = vpop.eup %2811  ;;  %v1550_v44 = vsub.f32 %v3341_v23, %v1514_v53 }
 0x1ac   : > { %2815 = vpow2.f32 %v1324_v54 }
 0x1ad   : > { %v1087_v59 = vmul.f32 1.442695, %v1067_v58  ;;  %v1571_v58 = vmul.f32 1.442695, %v1550_v44 }
 0x1ae   : > { %v796_v0 = vpop.xlane.xlu1 %795  ;;  %v1270_v1 = vpop.xlane.xlu0 %1269  ;;  %1615 = vrot.lane.b32.xlu1 %v3533_v60, %s3147_s10 }
 0x1af   : > { %v1308_v4 = vsub.f32 %v3364_v35, %v1270_v1  ;;  %2817 = vpow2.f32 %v1087_v59  ;;  %v828_v53 = vsub.f32 %v3375_v40, %v796_v0 }
 0x1b0   : > { %2819 = vpow2.f32 %v1565_v3 }
 0x1b1   : > { %v1328_v5 = vmul.f32 1.442695, %v1308_v4 }
 0x1b2   : > { %v1038_v8 = vpop.xlane.xlu1 %1037  ;;  %v1511_v9 = vpop.xlane.xlu0 %1510  ;;  %889 = vrot.lane.b32.xlu1 %v3539_v7, %s3144_s7 }
 0x1b3   : > { %v1549_v14 = vsub.f32 %v3364_v35, %v1511_v9  ;;  %2821 = vpow2.f32 %v1328_v5  ;;  %v851_v9 = vmul.f32 1.442695, %v828_v53  ;;  %v1070_v0 = vsub.f32 %v3375_v40, %v1038_v8 }
 0x1b4   : > { %2823 = vpow2.f32 %v847_v10 }
 0x1b5   : > { %v1569_v20 = vmul.f32 1.442695, %v1549_v14  ;;  %v3547_v21 = vpop.eup %2813  ;;  %v1093_v30 = vmul.f32 1.442695, %v1070_v0 }
 0x1b6   : > { %v3549_v22 = vpop.xlane.xlu1 %1278  ;;  %v793_v28 = vpop.xlane.xlu0 %792  ;;  %1131 = vrot.lane.b32.xlu1 %v3545_v17, %s3145_s8  ;;  %893 = vrot.lane.b32.xlu0 %v3547_v21, %s3144_s7 }
 0x1b7   : > { %v827_v32 = vsub.f32 %v3386_v45, %v793_v28  ;;  %2825 = vpow2.f32 %v1569_v20  ;;  %v3557_v37 = vpop.eup %2815  ;;  %v1311_v8 = vsub.f32 %v3375_v40, %v3549_v22 }
 0x1b8   : > { %2827 = vpow2.f32 %v1089_v29 }
 0x1b9   : > { %v849_v38 = vmul.f32 1.442695, %v827_v32  ;;  %v3559_v39 = vpop.eup %2817 }
 0x1ba   : > { %v3561_v41 = vpop.xlane.xlu1 %1519  ;;  %v1035_v46 = vpop.xlane.xlu0 %1034  ;;  %1372 = vrot.lane.b32.xlu1 %v3557_v37, %s3146_s9  ;;  %1135 = vrot.lane.b32.xlu0 %v3559_v39, %s3145_s8 }
 0x1bb   : > { %v1069_v48 = vsub.f32 %v3386_v45, %v1035_v46  ;;  %2829 = vpow2.f32 %v849_v38  ;;  %v3569_v49 = vpop.eup %2819  ;;  %v1552_v22 = vsub.f32 %v3375_v40, %v3561_v41 }
 0x1bc   : > { %2831 = vpow2.f32 %v1330_v47 }
 0x1bd   : > { %v1091_v51 = vmul.f32 1.442695, %v1069_v48  ;;  %v3571_v55 = vpop.eup %2821 }
 0x1be   : > { %v3573_v54 = vpop.xlane.xlu1 %801  ;;  %v1276_v57 = vpop.xlane.xlu0 %1275  ;;  %1613 = vrot.lane.b32.xlu1 %v3569_v49, %s3147_s10  ;;  %1376 = vrot.lane.b32.xlu0 %v3571_v55, %s3146_s9 }
 0x1bf   : > { %v1310_v59 = vsub.f32 %v3386_v45, %v1276_v57  ;;  %2833 = vpow2.f32 %v1091_v51  ;;  %v3581_v1 = vpop.eup %2823  ;;  %v1334_v51 = vmul.f32 1.442695, %v1311_v8  ;;  %v830_v41 = vsub.f32 %v3397_v50, %v3573_v54 }
 0x1c0   : > { %2835 = vpow2.f32 %v1571_v58 }
 0x1c1   : > { %v1332_v2 = vmul.f32 1.442695, %v1310_v59  ;;  %v3583_v3 = vpop.eup %2825 }
 0x1c2   : > { %v3585_v4 = vpop.xlane.xlu1 %1043  ;;  %v1517_v5 = vpop.xlane.xlu0 %1516  ;;  %895 = vrot.lane.b32.xlu1 %v3581_v1, %s3144_s7  ;;  %1617 = vrot.lane.b32.xlu0 %v3583_v3, %s3147_s10 }
 0x1c3   : > { %v1551_v10 = vsub.f32 %v3386_v45, %v1517_v5  ;;  %2837 = vpow2.f32 %v1332_v2  ;;  %v3593_v11 = vpop.eup %2827  ;;  %v1072_v54 = vsub.f32 %v3397_v50, %v3585_v4 }
 0x1c4   : > { %2839 = vpow2.f32 %v851_v9  ;;  %v1575_v9 = vmul.f32 1.442695, %v1552_v22 }
 0x1c5   : > { %v1573_v14 = vmul.f32 1.442695, %v1551_v10  ;;  %v3595_v20 = vpop.eup %2829 }
 0x1c6   : > { %v3597_v28 = vpop.xlane.xlu1 %1284  ;;  %v799_v29 = vpop.xlane.xlu0 %798  ;;  %1137 = vrot.lane.b32.xlu1 %v3593_v11, %s3145_s8  ;;  %897 = vrot.lane.b32.xlu0 %v3595_v20, %s3144_s7 }
 0x1c7   : > { %v829_v32 = vsub.f32 %v3323_v13, %v799_v29  ;;  %2841 = vpow2.f32 %v1573_v14  ;;  %v3606_v38 = vpop.eup %2831  ;;  %v1313_v4 = vsub.f32 %v3397_v50, %v3597_v28 }
 0x1c8   : > { %2843 = vpow2.f32 %v1093_v30 }
 0x1c9   : > { %v853_v46 = vmul.f32 1.442695, %v829_v32  ;;  %v3608_v47 = vpop.eup %2833  ;;  %v855_v32 = vmul.f32 1.442695, %v830_v41 }
 0x1ca   : > { %v3610_v44 = vpop.xlane.xlu1 %1525  ;;  %v1041_v48 = vpop.xlane.xlu0 %1040  ;;  %1378 = vrot.lane.b32.xlu1 %v3606_v38, %s3146_s9  ;;  %1139 = vrot.lane.b32.xlu0 %v3608_v47, %s3145_s8 }
 0x1cb   : > { %v1071_v57 = vsub.f32 %v3323_v13, %v1041_v48  ;;  %2845 = vpow2.f32 %v853_v46  ;;  %v3619_v58 = vpop.eup %2835  ;;  %v1554_v28 = vsub.f32 %v3397_v50, %v3610_v44 }
 0x1cc   : > { %4630 = vst [vmem:[#allocation19_spill] sm:$0xff] %v3619_v58  ;;  %2847 = vpow2.f32 %v1334_v51 }
 0x1cd   : > { %v1095_v53 = vmul.f32 1.442695, %v1071_v57  ;;  %v3621_v59 = vpop.eup %2837 }
 0x1ce   : > { %v3623_v2 = vpop.xlane.xlu1 %807  ;;  %v1282_v5 = vpop.xlane.xlu0 %1281  ;;  %1619 = vrot.lane.b32.xlu1 %v3619_v58, %s3147_s10  ;;  %1380 = vrot.lane.b32.xlu0 %v3621_v59, %s3146_s9 }
 0x1cf   : > { %v1312_v0 = vsub.f32 %v3323_v13, %v1282_v5  ;;  %2849 = vpow2.f32 %v1095_v53  ;;  %v3632_v10 = vpop.eup %2839  ;;  %v1097_v5 = vmul.f32 1.442695, %v1072_v54  ;;  %v1338_v54 = vmul.f32 1.442695, %v1313_v4 }
 0x1d0   : > { %2851 = vpow2.f32 %v1575_v9  ;;  %v1579_v4 = vmul.f32 1.442695, %v1554_v28  ;;  %v832_v44 = vsub.f32 %v3328_v16, %v3623_v2 }
 0x1d1   : > { %v1336_v14 = vmul.f32 1.442695, %v1312_v0  ;;  %v3634_v29 = vpop.eup %2841 }
 0x1d2   : > { %4631 = vst [vmem:[#allocation20_spill] sm:$0xff] %v3634_v29  ;;  %v3636_v30 = vpop.xlane.xlu1 %1049  ;;  %v1523_v8 = vpop.xlane.xlu0 %1522  ;;  %899 = vrot.lane.b32.xlu1 %v3632_v10, %s3144_s7  ;;  %1621 = vrot.lane.b32.xlu0 %v3634_v29, %s3147_s10  ;;  %v859_v28 = vmul.f32 1.442695, %v832_v44 }
 0x1d3   : > { %v1553_v46 = vsub.f32 %v3323_v13, %v1523_v8  ;;  %2853 = vpow2.f32 %v1336_v14  ;;  %v3645_v48 = vpop.eup %2843  ;;  %v1074_v2 = vsub.f32 %v3328_v16, %v3636_v30 }
 0x1d4   : > { %2855 = vpow2.f32 %v855_v32 }
 0x1d5   : > { %v1577_v51 = vmul.f32 1.442695, %v1553_v46  ;;  %v3647_v22 = vpop.eup %2845  ;;  %v1101_v44 = vmul.f32 1.442695, %v1074_v2 }
 0x1d6   : > { %v3649_v57 = vpop.xlane.xlu1 %1290  ;;  %v805_v53 = vpop.xlane.xlu0 %804  ;;  %1141 = vrot.lane.b32.xlu1 %v3645_v48, %s3145_s8  ;;  %901 = vrot.lane.b32.xlu0 %v3647_v22, %s3144_s7 }
 0x1d7   : > { %v831_v9 = vsub.f32 %v3331_v18, %v805_v53  ;;  %2857 = vpow2.f32 %v1577_v51  ;;  %v3658_v41 = vpop.eup %2847  ;;  %v1315_v30 = vsub.f32 %v3328_v16, %v3649_v57 }
 0x1d8   : > { %2859 = vpow2.f32 %v1097_v5 }
 0x1d9   : > { %v857_v0 = vmul.f32 1.442695, %v831_v9  ;;  %v3660_v14 = vpop.eup %2849  ;;  %v1342_v2 = vmul.f32 1.442695, %v1315_v30 }
 0x1da   : > { %v1532_v8 = vpop.xlane.xlu1 %1531  ;;  %v1047_v32 = vpop.xlane.xlu0 %1046  ;;  %1382 = vrot.lane.b32.xlu1 %v3658_v41, %s3146_s9  ;;  %1143 = vrot.lane.b32.xlu0 %v3660_v14, %s3145_s8 }
 0x1db   : > { %v1073_v46 = vsub.f32 %v3331_v18, %v1047_v32  ;;  %2861 = vpow2.f32 %v857_v0  ;;  %v3669_v51 = vpop.eup %2851  ;;  %v1556_v57 = vsub.f32 %v3328_v16, %v1532_v8 }
 0x1dc   : > { %4632 = vst [vmem:[#allocation21_spill] sm:$0xff] %v3669_v51  ;;  %2863 = vpow2.f32 %v1338_v54 }
 0x1dd   : > { %v1099_v53 = vmul.f32 1.442695, %v1073_v46  ;;  %v3671_v9 = vpop.eup %2853 }
 0x1de   : > { %v814_v40 = vpop.xlane.xlu1 %813  ;;  %v1288_v5 = vpop.xlane.xlu0 %1287  ;;  %1623 = vrot.lane.b32.xlu1 %v3669_v51, %s3147_s10  ;;  %1384 = vrot.lane.b32.xlu0 %v3671_v9, %s3146_s9 }
 0x1df   : > { %v1314_v0 = vsub.f32 %v3331_v18, %v1288_v5  ;;  %2865 = vpow2.f32 %v1099_v53  ;;  %v3680_v32 = vpop.eup %2855  ;;  %v834_v30 = vsub.f32 %v3344_v24, %v814_v40 }
 0x1e0   : > { %4633 = vst [vmem:[#allocation22_spill] sm:$0xff] %v3680_v32  ;;  %2867 = vpow2.f32 %v1579_v4 }
 0x1e1   : > { %v1340_v46 = vmul.f32 1.442695, %v1314_v0  ;;  %v3682_v50 = vpop.eup %2857 }
 0x1e2   : > { %4634 = vst [vmem:[#allocation23_spill] sm:$0xff] %v3682_v50  ;;  %v1056_v23 = vpop.xlane.xlu1 %1055  ;;  %v1529_v54 = vpop.xlane.xlu0 %1528  ;;  %903 = vrot.lane.b32.xlu1 %v3680_v32, %s3144_s7  ;;  %1625 = vrot.lane.b32.xlu0 %v3682_v50, %s3147_s10 }
 0x1e3   : > { %v1555_v53 = vsub.f32 %v3331_v18, %v1529_v54  ;;  %2869 = vpow2.f32 %v1340_v46  ;;  %v3691_v5 = vpop.eup %2859  ;;  %v1076_v40 = vsub.f32 %v3344_v24, %v1056_v23 }
 0x1e4   : > { %4635 = vst [vmem:[#allocation24_spill] sm:$0xff] %v3691_v5  ;;  %2871 = vpow2.f32 %v859_v28 }
 0x1e5   : > { %v1581_v0 = vmul.f32 1.442695, %v1555_v53  ;;  %v3693_v61 = vpop.eup %2861 }
 0x1e6   : > { %4636 = vst [vmem:[#allocation25_spill] sm:$0xff] %v3693_v61  ;;  %v1297_v56 = vpop.xlane.xlu1 %1296  ;;  %v811_v4 = vpop.xlane.xlu0 %810  ;;  %1145 = vrot.lane.b32.xlu1 %v3691_v5, %s3145_s8  ;;  %905 = vrot.lane.b32.xlu0 %v3693_v61, %s3144_s7 }
 0x1e7   : > { %v833_v46 = vsub.f32 %v3347_v26, %v811_v4  ;;  %2873 = vpow2.f32 %v1581_v0  ;;  %v3702_v54 = vpop.eup %2863  ;;  %v1317_v23 = vsub.f32 %v3344_v24, %v1297_v56 }
 0x1e8   : > { %4637 = vst [vmem:[#allocation26_spill] sm:$0xff] %v3702_v54  ;;  %2875 = vpow2.f32 %v1101_v44  ;;  %v1583_v44 = vmul.f32 1.442695, %v1556_v57 }
 0x1e9   : > { %v861_v53 = vmul.f32 1.442695, %v833_v46  ;;  %v3704_v18 = vpop.eup %2865 }
 0x1ea   : > { %4638 = vst [vmem:[#allocation27_spill] sm:$0xff] %v3704_v18  ;;  %v3706_v13 = vpop.xlane.xlu1 %1537  ;;  %v1053_v28 = vpop.xlane.xlu0 %1052  ;;  %1386 = vrot.lane.b32.xlu1 %v3702_v54, %s3146_s9  ;;  %1147 = vrot.lane.b32.xlu0 %v3704_v18, %s3145_s8 }
 0x1eb   : > { %v1075_v0 = vsub.f32 %v3347_v26, %v1053_v28  ;;  %2877 = vpow2.f32 %v861_v53  ;;  %v3714_v4 = vpop.eup %2867 }
 0x1ec   : > { %4639 = vst [vmem:[#allocation28_spill] sm:$0xff] %v3714_v4  ;;  %2879 = vpow2.f32 %v1342_v2  ;;  %v863_v2 = vmul.f32 1.442695, %v834_v30 }
 0x1ed   : > { %v1103_v46 = vmul.f32 1.442695, %v1075_v0  ;;  %v3716_v45 = vpop.eup %2869 }
 0x1ee   : > { %4640 = vst [vmem:[#allocation29_spill] sm:$0xff] %v3716_v45  ;;  %v1294_v35 = vpop.xlane.xlu0 %1293  ;;  %v820_v8 = vpop.xlane.xlu1 %819  ;;  %1627 = vrot.lane.b32.xlu1 %v3714_v4, %s3147_s10  ;;  %1388 = vrot.lane.b32.xlu0 %v3716_v45, %s3146_s9 }
 0x1ef   : > { %v1316_v28 = vsub.f32 %v3347_v26, %v1294_v35  ;;  %2881 = vpow2.f32 %v1103_v46  ;;  %v3724_v53 = vpop.eup %2871  ;;  %v836_v58 = vsub.f32 %v3356_v31, %v820_v8 }
 0x1f0   : > { %4641 = vst [vmem:[#allocation30_spill] sm:$0xff] %v3724_v53  ;;  %2883 = vpow2.f32 %v1583_v44  ;;  %v1105_v44 = vmul.f32 1.442695, %v1076_v40 }
 0x1f1   : > { %v1344_v0 = vmul.f32 1.442695, %v1316_v28  ;;  %v3726_v16 = vpop.eup %2873 }
 0x1f2   : > { %4642 = vst [vmem:[#allocation31_spill] sm:$0xff] %v3726_v16  ;;  %v1535_v19 = vpop.xlane.xlu0 %1534  ;;  %907 = vrot.lane.b32.xlu1 %v3724_v53, %s3144_s7  ;;  %1629 = vrot.lane.b32.xlu0 %v3726_v16, %s3147_s10  ;;  %v3734_v35 = vpop.eup %2875 }
 0x1f3   : > { %v1557_v57 = vsub.f32 %v3347_v26, %v1535_v19  ;;  %2885 = vpow2.f32 %v1344_v0  ;;  %4643 = vst [vmem:[#allocation32_spill] sm:$0xff] %v3734_v35  ;;  %v1062_v46 = vpop.xlane.xlu1 %1061 }
 0x1f4   : > { %2887 = vpow2.f32 %v863_v2  ;;  %v1346_v2 = vmul.f32 1.442695, %v1317_v23  ;;  %v1078_v8 = vsub.f32 %v3356_v31, %v1062_v46 }
 0x1f5   : > { %v1585_v28 = vmul.f32 1.442695, %v1557_v57  ;;  %v3736_v63 = vpop.eup %2877 }
 0x1f6   : > { %4644 = vst [vmem:[#allocation33_spill] sm:$0xff] %v3736_v63  ;;  %v817_v4 = vpop.xlane.xlu0 %816  ;;  %1149 = vrot.lane.b32.xlu1 %v3734_v35, %s3145_s8  ;;  %909 = vrot.lane.b32.xlu0 %v3736_v63, %s3144_s7  ;;  %v3744_v30 = vpop.eup %2879 }
 0x1f7   : > { %v835_v19 = vsub.f32 %v3359_v33, %v817_v4  ;;  %2889 = vpow2.f32 %v1585_v28  ;;  %4645 = vst [vmem:[#allocation34_spill] sm:$0xff] %v3744_v30  ;;  %v1303_v40 = vpop.xlane.xlu1 %1302  ;;  %v1558_v4 = vsub.f32 %v3344_v24, %v3706_v13 }
 0x1f8   : > { %2891 = vpow2.f32 %v1105_v44 }
 0x1f9   : > { %v865_v0 = vmul.f32 1.442695, %v835_v19  ;;  %v3746_v57 = vpop.eup %2881 }
 0x1fa   : > { %4646 = vst [vmem:[#allocation35_spill] sm:$0xff] %v3746_v57  ;;  %v1059_v26 = vpop.xlane.xlu0 %1058  ;;  %1390 = vrot.lane.b32.xlu1 %v3744_v30, %s3146_s9  ;;  %1151 = vrot.lane.b32.xlu0 %v3746_v57, %s3145_s8  ;;  %v3755_v28 = vpop.eup %2883 }
 0x1fb   : > { %v1077_v56 = vsub.f32 %v3359_v33, %v1059_v26  ;;  %2893 = vpow2.f32 %v865_v0  ;;  %4647 = vst [vmem:[#allocation36_spill] sm:$0xff] %v3755_v28  ;;  %v1587_v26 = vmul.f32 1.442695, %v1558_v4  ;;  %v1544_v0 = vpop.xlane.xlu1 %1543  ;;  %v867_v4 = vmul.f32 1.442695, %v836_v58 }
 0x1fc   : > { %2895 = vpow2.f32 %v1346_v2  ;;  %v1319_v58 = vsub.f32 %v3356_v31, %v1303_v40 }
 0x1fd   : > { %v1107_v19 = vmul.f32 1.442695, %v1077_v56  ;;  %v3757_v51 = vpop.eup %2885 }
 0x1fe   : > { %4648 = vst [vmem:[#allocation37_spill] sm:$0xff] %v3757_v51  ;;  %v1300_v44 = vpop.xlane.xlu0 %1299  ;;  %1631 = vrot.lane.b32.xlu1 %v3755_v28, %s3147_s10  ;;  %1392 = vrot.lane.b32.xlu0 %v3757_v51, %s3146_s9  ;;  %v3765_v13 = vpop.eup %2887 }
 0x1ff   : > { %v1318_v23 = vsub.f32 %v3359_v33, %v1300_v44  ;;  %2897 = vpow2.f32 %v1107_v19  ;;  %4649 = vst [vmem:[#allocation38_spill] sm:$0xff] %v3765_v13 }
 0x201   : > { %v1348_v56 = vmul.f32 1.442695, %v1318_v23  ;;  %v3767_v24 = vpop.eup %2889 }
 0x202   : > { %4650 = vst [vmem:[#allocation39_spill] sm:$0xff] %v3767_v24  ;;  %v1541_v16 = vpop.xlane.xlu0 %1540  ;;  %911 = vrot.lane.b32.xlu1 %v3765_v13, %s3144_s7  ;;  %1633 = vrot.lane.b32.xlu0 %v3767_v24, %s3147_s10  ;;  %v3775_v19 = vpop.eup %2891 }
 0x203   : > { %2899 = vpow2.f32 %v1348_v56  ;;  %v1559_v2 = vsub.f32 %v3359_v33, %v1541_v16  ;;  %4651 = vst [vmem:[#allocation40_spill] sm:$0xff] %v3775_v19  ;;  %v1109_v16 = vmul.f32 1.442695, %v1078_v8 }
 0x204   : > { %2901 = vpow2.f32 %v1587_v26  ;;  %v3777_v23 = vpop.permute.xlu1 %887 }
 0x205   : > { %v1589_v44 = vmul.f32 1.442695, %v1559_v2  ;;  %v3779_v28 = vpop.eup %2893  ;;  %v1350_v2 = vmul.f32 1.442695, %v1319_v58 }
 0x206   : > { %4652 = vst [vmem:[#allocation41_spill] sm:$0xff] %v3779_v28  ;;  %1153 = vrot.lane.b32.xlu1 %v3775_v19, %s3145_s8  ;;  %913 = vrot.lane.b32.xlu0 %v3779_v28, %s3144_s7  ;;  %v3786_v26 = vpop.eup %2895 }
 0x207   : > { %2903 = vpow2.f32 %v1589_v44  ;;  %4653 = vst [vmem:[#allocation42_spill] sm:$0xff] %v3786_v26  ;;  %v1560_v44 = vsub.f32 %v3356_v31, %v1544_v0 }
 0x208   : > { %2905 = vpow2.f32 %v867_v4  ;;  %v3788_v46 = vpop.permute.xlu1 %1129 }
 0x209   : > { %v3790_v56 = vpop.eup %2897  ;;  %2907 = vpow2.f32 %v1109_v16  ;;  %v1591_v33 = vmul.f32 1.442695, %v1560_v44 }
 0x20a   : > { %4654 = vst [vmem:[#allocation43_spill] sm:$0xff] %v3790_v56  ;;  %1394 = vrot.lane.b32.xlu1 %v3786_v26, %s3146_s9  ;;  %1155 = vrot.lane.b32.xlu0 %v3790_v56, %s3145_s8  ;;  %2909 = vpow2.f32 %v1350_v2 }
 0x20b   : > { %2911 = vpow2.f32 %v1591_v33 }
 0x20c   : > { %v3799_v8 = vpop.permute.xlu1 %1370  ;;  %v886_v0 = vpop.permute.xlu0 %885 }
 0x20d   : > { %v3797_v4 = vpop.eup %2899 }
 0x20e   : > { %4655 = vst [vmem:[#allocation44_spill] sm:$0xff] %v3797_v4  ;;  %v3801_v40 = vpop.eup %2901  ;;  %1396 = vrot.lane.b32.xlu0 %v3797_v4, %s3146_s9 }
 0x20f   : > { %4656 = vst [vmem:[#allocation45_spill] sm:$0xff] %v3801_v40  ;;  %1635 = vrot.lane.b32.xlu1 %v3801_v40, %s3147_s10 }
 0x210   : > { %v3809_v16 = vpop.permute.xlu1 %1611  ;;  %v1128_v2 = vpop.permute.xlu0 %1127 }
 0x211   : > { %v3807_v24 = vpop.eup %2903 }
 0x212   : > { %4657 = vst [vmem:[#allocation46_spill] sm:$0xff] %v3807_v24  ;;  %v3811_v58 = vpop.eup %2905  ;;  %1637 = vrot.lane.b32.xlu0 %v3807_v24, %s3147_s10 }
 0x213   : > { %4658 = vst [vmem:[#allocation47_spill] sm:$0xff] %v3811_v58  ;;  %915 = vrot.lane.b32.xlu1 %v3811_v58, %s3144_s7  ;;  %v3817_v40 = vpop.eup %2907 }
 0x214   : > { %v892_v31 = vpop.permute.xlu1 %891  ;;  %4659 = vst [vmem:[#allocation48_spill] sm:$0xff] %v3817_v40  ;;  %v3821_v50 = vpop.eup %2909 }
 0x215   : > { %4660 = vst [vmem:[#allocation49_spill] sm:$0xff] %v3821_v50  ;;  %v3825_v26 = vpop.eup %2911  ;;  %v1369_v58 = vpop.permute.xlu0 %1368 }
 0x216   : > { %4661 = vst [vmem:[#allocation50_spill] sm:$0xff] %v3825_v26  ;;  %v1416_v63 = vsel %vm933_vm5, %v1369_v58, 0.0 }
 0x217   : > { %1157 = vrot.lane.b32.xlu1 %v3817_v40, %s3145_s8  ;;  %s2229_s8 = ssub.s32 (%p3210_p4), 20, %s3224_s12 }
 0x218   : > { %v1134_v44 = vpop.permute.xlu1 %1133  ;;  %p2230_p8 = scmp.lt.s32.totalorder (%p3210_p4), %s2229_s8, 16 }
 0x219   : > { %v1610_v24 = vpop.permute.xlu0 %1609 }
 0x21a   : > { %v1657_v5 = vsel %vm933_vm5, %v1610_v24, 0.0  ;;  %v1178_v24 = vsel %vm933_vm5, %v3788_v46, 0.0 }
 0x21b   : > { %1398 = vrot.lane.b32.xlu1 %v3821_v50, %s3146_s9  ;;  %v934_v50 = vsel %vm933_vm5, %v886_v0, 0.0  ;;  %s2568_s9 = sshll.u32 (%p3210_p4), %s3198_s24, 7 }
 0x21c   : > { %v1375_v29 = vpop.permute.xlu1 %1374  ;;  %s4465_s13 = scalar_lea.vmem (%p3210_p4), %s4564_s6, %s2568_s9  }
 0x21f   : > { %1639 = vrot.lane.b32.xlu1 %v3825_v26, %s3147_s10  ;;  %v1175_v26 = vsel %vm933_vm5, %v1128_v2, 0.0  ;;  %v937_v2 = vsel %vm933_vm5, %v3777_v23, 0.0 }
 0x220   : > { %v3829_v33 = vpop.permute.xlu1 %1615 }
 0x224   : > { %v890_v4 = vpop.permute.xlu1 %889 }
 0x225   : > { %v940_v61 = vsel %vm933_vm5, %v890_v4, 0.0 }
 0x228   : > { %v1132_v19 = vpop.permute.xlu1 %1131  ;;  %v894_v40 = vpop.permute.xlu0 %893 }
 0x22c   : > { %v1373_v56 = vpop.permute.xlu1 %1372  ;;  %v1136_v13 = vpop.permute.xlu0 %1135 }
 0x230   : > { %v3831_v28 = vpop.permute.xlu1 %1613  ;;  %v1377_v30 = vpop.permute.xlu0 %1376 }
 0x231   : > { %935 = vadd.xlane.f32.xlu0 %v934_v50  ;;  %v943_v50 = vsel %vm933_vm5, %v892_v31, 0.0  ;;  %v1419_v31 = vsel %vm933_vm5, %v3799_v8, 0.0 }
 0x234   : > { %v896_v51 = vpop.permute.xlu1 %895  ;;  %v3834_v35 = vpop.permute.xlu0 %1617 }
 0x235   : > { %1176 = vadd.xlane.f32.xlu0 %v1175_v26 }
 0x238   : > { %v1138_v57 = vpop.permute.xlu1 %1137  ;;  %v898_v53 = vpop.permute.xlu0 %897 }
 0x239   : > { %1417 = vadd.xlane.f32.xlu0 %v1416_v63  ;;  %v1184_v63 = vsel %vm933_vm5, %v1134_v44, 0.0  ;;  %v1425_v44 = vsel %vm933_vm5, %v1375_v29, 0.0 }
 0x23c   : > { %v1379_v54 = vpop.permute.xlu1 %1378  ;;  %v1140_v45 = vpop.permute.xlu0 %1139 }
 0x23d   : > { %1658 = vadd.xlane.f32.xlu0 %v1657_v5 }
 0x240   : > { %v3839_v18 = vpop.permute.xlu1 %1619  ;;  %v1381_v0 = vpop.permute.xlu0 %1380 }
 0x241   : > { %944 = vadd.xlane.f32.xlu0 %v943_v50 }
 0x243   : > { %938 = vadd.xlane.f32.xlu1 %v937_v2  ;;  %v1181_v2 = vsel %vm933_vm5, %v1132_v19, 0.0  ;;  %v1190_v19 = vsel %vm933_vm5, %v1138_v57, 0.0  ;;  %v952_v57 = vsel %vm933_vm5, %v898_v53, 0.0 }
 0x244   : > { %v900_v26 = vpop.permute.xlu1 %899  ;;  %v3844_v32 = vpop.permute.xlu0 %1621 }
 0x245   : > { %1185 = vadd.xlane.f32.xlu0 %v1184_v63 }
 0x247   : > { %1179 = vadd.xlane.f32.xlu1 %v1178_v24  ;;  %v1422_v24 = vsel %vm933_vm5, %v1373_v56, 0.0  ;;  %v1431_v56 = vsel %vm933_vm5, %v1379_v54, 0.0  ;;  %v1193_v54 = vsel %vm933_vm5, %v1140_v45, 0.0 }
 0x248   : > { %v1142_v5 = vpop.permute.xlu1 %1141  ;;  %v902_v58 = vpop.permute.xlu0 %901 }
 0x249   : > { %941 = vadd.xlane.f32.xlu0 %v940_v61  ;;  %v949_v61 = vsel %vm933_vm5, %v896_v51, 0.0  ;;  %v1428_v51 = vsel %vm933_vm5, %v1377_v30, 0.0 }
 0x24b   : > { %1420 = vadd.xlane.f32.xlu1 %v1419_v31  ;;  %v946_v31 = vsel %vm933_vm5, %v894_v40, 0.0 }
 0x24c   : > { %v1383_v23 = vpop.permute.xlu1 %1382  ;;  %v1144_v50 = vpop.permute.xlu0 %1143 }
 0x24d   : > { %1182 = vadd.xlane.f32.xlu0 %v1181_v2  ;;  %v1187_v2 = vsel %vm933_vm5, %v1136_v13, 0.0  ;;  %v1196_v13 = vsel %vm933_vm5, %v1142_v5, 0.0  ;;  %v1437_v30 = vsel %vm933_vm5, %v1383_v23, 0.0  ;;  %v958_v5 = vsel %vm933_vm5, %v902_v58, 0.0 }
 0x24e   : > { %v1199_v23 = vsel %vm933_vm5, %v1144_v50, 0.0 }
 0x24f   : > { %1426 = vadd.xlane.f32.xlu1 %v1425_v44 }
 0x250   : > { %v3854_v63 = vpop.permute.xlu1 %1623  ;;  %v1385_v46 = vpop.permute.xlu0 %1384 }
 0x251   : > { %1423 = vadd.xlane.f32.xlu0 %v1422_v24 }
 0x253   : > { %950 = vadd.xlane.f32.xlu1 %v949_v61  ;;  %v955_v61 = vsel %vm933_vm5, %v900_v26, 0.0  ;;  %v1434_v26 = vsel %vm933_vm5, %v1381_v0, 0.0 }
 0x254   : > { %v904_v4 = vpop.permute.xlu1 %903  ;;  %v3858_v8 = vpop.permute.xlu0 %1625 }
 0x255   : > { %947 = vadd.xlane.f32.xlu0 %v946_v31 }
 0x257   : > { %1191 = vadd.xlane.f32.xlu1 %v1190_v19 }
 0x258   : > { %v1146_v29 = vpop.permute.xlu1 %1145  ;;  %v906_v44 = vpop.permute.xlu0 %905 }
 0x259   : > { %1188 = vadd.xlane.f32.xlu0 %v1187_v2  ;;  %v1202_v45 = vsel %vm933_vm5, %v1146_v29, 0.0  ;;  %v964_v29 = vsel %vm933_vm5, %v906_v44, 0.0 }
 0x25b   : > { %1432 = vadd.xlane.f32.xlu1 %v1431_v56 }
 0x25c   : > { %v1387_v24 = vpop.permute.xlu1 %1386  ;;  %v1148_v40 = vpop.permute.xlu0 %1147 }
 0x25d   : > { %1429 = vadd.xlane.f32.xlu0 %v1428_v51  ;;  %v961_v51 = vsel %vm933_vm5, %v904_v4, 0.0  ;;  %v1443_v0 = vsel %vm933_vm5, %v1387_v24, 0.0 }
 0x25f   : > { %956 = vadd.xlane.f32.xlu1 %v955_v61 }
 0x260   : > { %v3866_v31 = vpop.permute.xlu1 %1627  ;;  %v1389_v2 = vpop.permute.xlu0 %1388 }
 0x261   : > { %953 = vadd.xlane.f32.xlu0 %v952_v57 }
 0x263   : > { %1197 = vadd.xlane.f32.xlu1 %v1196_v13 }
 0x264   : > { %v908_v19 = vpop.permute.xlu1 %907  ;;  %v3874_v53 = vpop.permute.xlu0 %1629 }
 0x265   : > { %1194 = vadd.xlane.f32.xlu0 %v1193_v54  ;;  %v1440_v54 = vsel %vm933_vm5, %v1385_v46, 0.0 }
 0x267   : > { %1438 = vadd.xlane.f32.xlu1 %v1437_v30  ;;  %v967_v30 = vsel %vm933_vm5, %v908_v19, 0.0  ;;  %v1446_v19 = vsel %vm933_vm5, %v1389_v2, 0.0 }
 0x268   : > { %v1150_v56 = vpop.permute.xlu1 %1149  ;;  %v910_v13 = vpop.permute.xlu0 %909 }
 0x269   : > { %1435 = vadd.xlane.f32.xlu0 %v1434_v26 }
 0x26b   : > { %962 = vadd.xlane.f32.xlu1 %v961_v51  ;;  %v1208_v51 = vsel %vm933_vm5, %v1150_v56, 0.0  ;;  %v970_v56 = vsel %vm933_vm5, %v910_v13, 0.0 }
 0x26c   : > { %v1391_v61 = vpop.permute.xlu1 %1390  ;;  %v1152_v58 = vpop.permute.xlu0 %1151 }
 0x26d   : > { %959 = vadd.xlane.f32.xlu0 %v958_v5  ;;  %v1205_v5 = vsel %vm933_vm5, %v1148_v40, 0.0 }
 0x26f   : > { %1203 = vadd.xlane.f32.xlu1 %v1202_v45  ;;  %v1449_v45 = vsel %vm933_vm5, %v1391_v61, 0.0 }
 0x270   : > { %v3878_v57 = vpop.permute.xlu1 %1631  ;;  %v1393_v24 = vpop.permute.xlu0 %1392 }
 0x271   : > { %1200 = vadd.xlane.f32.xlu0 %v1199_v23 }
 0x273   : > { %1444 = vadd.xlane.f32.xlu1 %v1443_v0 }
 0x274   : > { %v912_v4 = vpop.permute.xlu1 %911  ;;  %v3890_v44 = vpop.permute.xlu0 %1633 }
 0x275   : > { %1441 = vadd.xlane.f32.xlu0 %v1440_v54  ;;  %v973_v23 = vsel %vm933_vm5, %v912_v4, 0.0  ;;  %v1211_v54 = vsel %vm933_vm5, %v1152_v58, 0.0  ;;  %v1452_v4 = vsel %vm933_vm5, %v1393_v24, 0.0 }
 0x277   : > { %968 = vadd.xlane.f32.xlu1 %v967_v30 }
 0x278   : > { %v1154_v26 = vpop.permute.xlu1 %1153  ;;  %v914_v61 = vpop.permute.xlu0 %913 }
 0x279   : > { %965 = vadd.xlane.f32.xlu0 %v964_v29  ;;  %v1214_v0 = vsel %vm933_vm5, %v1154_v26, 0.0 }
 0x27b   : > { %1209 = vadd.xlane.f32.xlu1 %v1208_v51  ;;  %v976_v51 = vsel %vm933_vm5, %v914_v61, 0.0 }
 0x27c   : > { %v1395_v50 = vpop.permute.xlu1 %1394  ;;  %v1156_v13 = vpop.permute.xlu0 %1155 }
 0x27d   : > { %1206 = vadd.xlane.f32.xlu0 %v1205_v5  ;;  %v1455_v30 = vsel %vm933_vm5, %v1395_v50, 0.0  ;;  %v1217_v58 = vsel %vm933_vm5, %v1156_v13, 0.0  ;;  %v3041_v13 = vld [vmem:[%s3234_s19 + $0x8] sm:$0xff] }
 0x27f   : > { %1450 = vadd.xlane.f32.xlu1 %v1449_v45 }
 0x280   : > { %v1397_v45 = vpop.permute.xlu0 %1396 }
 0x281   : > { %v1636_v46 = vpop.permute.xlu1 %1635  ;;  %1447 = vadd.xlane.f32.xlu0 %v1446_v19  ;;  %v1458_v24 = vsel %vm933_vm5, %v1397_v45, 0.0  ;;  %v1660_v19 = vsel %vm933_vm5, %v3809_v16, 0.0  ;;  %v1669_v16 = vsel %vm933_vm5, %v3834_v35, 0.0  ;;  %v363_v35 = vld [vmem:[%s4560_s2] sm:$0xff]  ;;  %v3046_v45 = vld [vmem:[%s3234_s19 + $0x30] sm:$0xff] }
 0x283   : > { %974 = vadd.xlane.f32.xlu1 %v973_v23  ;;  %v1663_v23 = vsel %vm933_vm5, %v3831_v28, 0.0  ;;  %v1684_v28 = vsel %vm933_vm5, %v3866_v31, 0.0  ;;  %v364_v31 = vld [vmem:[%s4560_s2 + $0x8] sm:$0xff] }
 0x284   : > { %v2675_v61 = vpack.c.bf16 %v364_v31, %v363_v35  ;;  %v3053_v31 = vld [vmem:[%s3234_s19 + $0x68] sm:$0xff] }
 0x285   : > { %971 = vadd.xlane.f32.xlu0 %v970_v56  ;;  %v916_v40 = vpop.permute.xlu1 %915  ;;  %v1672_v56 = vsel %vm933_vm5, %v3839_v18, 0.0  ;;  %v1675_v18 = vsel %vm933_vm5, %v3844_v32, 0.0 }
 0x286   : > { %v979_v29 = vsel %vm933_vm5, %v916_v40, 0.0  ;;  %v1678_v40 = vsel %vm933_vm5, %v3854_v63, 0.0  ;;  %v1681_v63 = vsel %vm933_vm5, %v3858_v8, 0.0  ;;  %2676 = vmatprep.subr.bf16.mxu0 %v2675_v61 }
 0x287   : > { %1215 = vadd.xlane.f32.xlu1 %v1214_v0  ;;  %v1666_v0 = vsel %vm933_vm5, %v3829_v33, 0.0  ;;  %v1690_v33 = vsel %vm933_vm5, %v3878_v57, 0.0  ;;  %v1687_v57 = vsel %vm933_vm5, %v3874_v53, 0.0  ;;  %2678 = vmatpush3.bf16.msra.mxu0 %v2675_v61  ;;  %v1693_v53 = vsel %vm933_vm5, %v3890_v44, 0.0  ;;  %v3044_v44 = vld [vmem:[%s3234_s19 + $0x20] sm:$0xff]  ;;  %v3054_v61 = vld [vmem:[%s3234_s19 + $0x70] sm:$0xff] }
 0x289   : > { %1212 = vadd.xlane.f32.xlu0 %v1211_v54  ;;  %v1158_v2 = vpop.permute.xlu1 %1157  ;;  %v1696_v54 = vsel %vm933_vm5, %v1636_v46, 0.0  ;;  %v365_v46 = vld [vmem:[%s4560_s2 + $0x10] sm:$0xff] }
 0x28a   : > { %v1220_v26 = vsel %vm933_vm5, %v1158_v2, 0.0 }
 0x28b   : > { %1456 = vadd.xlane.f32.xlu1 %v1455_v30  ;;  %v366_v30 = vld [vmem:[%s4560_s2 + $0x18] sm:$0xff] }
 0x28c   : > { %v2679_v2 = vpack.c.bf16 %v366_v30, %v365_v46  ;;  %v3055_v46 = vld [vmem:[%s3234_s19 + $0x78] sm:$0xff] }
 0x28d   : > { %1453 = vadd.xlane.f32.xlu0 %v1452_v4  ;;  %v1399_v5 = vpop.permute.xlu1 %1398  ;;  %v1638_v4 = vpop.permute.xlu0 %1637 }
 0x28e   : > { %v1461_v50 = vsel %vm933_vm5, %v1399_v5, 0.0  ;;  %2680 = vmatprep.subr.bf16.mxu0 %v2679_v2 }
 0x28f   : > { %980 = vadd.xlane.f32.xlu1 %v979_v29  ;;  %2682 = vmatpush3.bf16.msra.mxu0 %v2679_v2  ;;  %v1699_v29 = vsel %vm933_vm5, %v1638_v4, 0.0 }
 0x291   : > { %977 = vadd.xlane.f32.xlu0 %v976_v51  ;;  %v1640_v32 = vpop.permute.xlu1 %1639  ;;  %v3042_v51 = vld [vmem:[%s3234_s19 + $0x10] sm:$0xff] }
 0x292   : > { %v1702_v8 = vsel %vm933_vm5, %v1640_v32, 0.0  ;;  %2620 = vmatmul.mubr.msk.f32.vlgmr.msra.gmra.mrb[0].mxu0 %vm374_vm0, %v3041_v13 }
 0x293   : > { %1221 = vadd.xlane.f32.xlu1 %v1220_v26  ;;  %2622 = vmatprep.mubr.msk.f32.mxu0 %vm374_vm0, %v3042_v51  ;;  %v3043_v26 = vld [vmem:[%s3234_s19 + $0x18] sm:$0xff] }
 0x295   : > { %1218 = vadd.xlane.f32.xlu0 %v1217_v58  ;;  %v3045_v58 = vld [vmem:[%s3234_s19 + $0x28] sm:$0xff] }
 0x296   : > { %2623 = vmatmul.mubr.msk.f32.gmra.mrb[2].mxu0 %vm374_vm0, %v3043_v26 }
 0x297   : > { %1462 = vadd.xlane.f32.xlu1 %v1461_v50  ;;  %2625 = vmatprep.mubr.msk.f32.mxu0 %vm374_vm0, %v3044_v44 }
 0x299   : > { %1459 = vadd.xlane.f32.xlu0 %v1458_v24  ;;  %v3047_v24 = vld [vmem:[%s3234_s19 + $0x38] sm:$0xff] }
 0x29a   : > { %2626 = vmatmul.mubr.msk.f32.gmra.mrb[4].mxu0 %vm374_vm0, %v3045_v58 }
 0x29b   : > { %1661 = vadd.xlane.f32.xlu1 %v1660_v19  ;;  %2628 = vmatprep.mubr.msk.f32.mxu0 %vm374_vm0, %v3046_v45  ;;  %v3048_v19 = vld [vmem:[%s3234_s19 + $0x40] sm:$0xff] }
 0x29d   : > { %1664 = vadd.xlane.f32.xlu0 %v1663_v23 }
 0x29e   : > { %2629 = vmatmul.mubr.msk.f32.gmra.mrb[6].mxu0 %vm374_vm0, %v3047_v24 }
 0x29f   : > { %1673 = vadd.xlane.f32.xlu1 %v1672_v56  ;;  %2631 = vmatprep.mubr.msk.f32.mxu0 %vm374_vm0, %v3048_v19  ;;  %v3049_v56 = vld [vmem:[%s3234_s19 + $0x48] sm:$0xff] }
 0x2a1   : > { %1667 = vadd.xlane.f32.xlu0 %v1666_v0  ;;  %v3050_v0 = vld [vmem:[%s3234_s19 + $0x50] sm:$0xff] }
 0x2a2   : > { %2632 = vmatmul.mubr.msk.f32.gmra.mrb[8].mxu0 %vm374_vm0, %v3049_v56 }
 0x2a3   : > { %1679 = vadd.xlane.f32.xlu1 %v1678_v40  ;;  %2634 = vmatprep.mubr.msk.f32.mxu0 %vm374_vm0, %v3050_v0 }
 0x2a5   : > { %1670 = vadd.xlane.f32.xlu0 %v1669_v16 }
 0x2a7   : > { %1685 = vadd.xlane.f32.xlu1 %v1684_v28  ;;  %v3051_v28 = vld [vmem:[%s3234_s19 + $0x58] sm:$0xff] }
 0x2a8   : > { %2635 = vmatmul.mubr.msk.f32.gmra.mrb[10].mxu0 %vm374_vm0, %v3051_v28 }
 0x2a9   : > { %1676 = vadd.xlane.f32.xlu0 %v1675_v18 }
 0x2ab   : > { %1691 = vadd.xlane.f32.xlu1 %v1690_v33  ;;  %v3052_v33 = vld [vmem:[%s3234_s19 + $0x60] sm:$0xff] }
 0x2ac   : > { %2637 = vmatprep.mubr.msk.f32.mxu0 %vm374_vm0, %v3052_v33 }
 0x2ad   : > { %1682 = vadd.xlane.f32.xlu0 %v1681_v63  ;;  %2638 = vmatmul.mubr.msk.f32.gmra.mrb[12].mxu0 %vm374_vm0, %v3053_v31 }
 0x2ae   : > { %2640 = vmatprep.mubr.msk.f32.mxu0 %vm374_vm0, %v3054_v61 }
 0x2af   : > { %1697 = vadd.xlane.f32.xlu1 %v1696_v54 }
 0x2b1   : > { %1688 = vadd.xlane.f32.xlu0 %v1687_v57  ;;  %2641 = vmatmul.mubr.msk.f32.gmra.mrb[14].mxu0 %vm374_vm0, %v3055_v46 }
 0x2b3   : > { %1703 = vadd.xlane.f32.xlu1 %v1702_v8 }
 0x2b5   : > { %1694 = vadd.xlane.f32.xlu0 %v1693_v53 }
 0x2b9   : > { %1700 = vadd.xlane.f32.xlu0 %v1699_v29 }
 0x2be   : > { %v936_v5 = vpop.xlane.xlu0 %935 }
 0x2bf   : > { %2913 = vrcp.f32 %v936_v5 }
 0x2c2   : > { %v1177_v50 = vpop.xlane.xlu0 %1176 }
 0x2c3   : > { %2915 = vrcp.f32 %v1177_v50 }
 0x2c6   : > { %v1418_v23 = vpop.xlane.xlu0 %1417 }
 0x2c7   : > { %2917 = vrcp.f32 %v1418_v23 }
 0x2c9   : > { %v2914_v40 = vpop.eup %2913 }
 0x2ca   : > { %v1659_v16 = vpop.xlane.xlu0 %1658  ;;  %v983_v18 = vmul.f32 %v2914_v40, %v3492_v15 }
 0x2cb   : > { %2919 = vrcp.f32 %v1659_v16 }
 0x2cd   : > { %v2916_v63 = vpop.eup %2915 }
 0x2ce   : > { %v3967_v54 = vpop.xlane.xlu0 %944  ;;  %v1224_v32 = vmul.f32 %v2916_v63, %v3501_v27 }
 0x2cf   : > { %1753 = vrot.lane.b32.xlu0 %v983_v18, %s3144_s7 }
 0x2d0   : > { %v939_v35 = vpop.xlane.xlu1 %938 }
 0x2d1   : > { %2921 = vrcp.f32 %v939_v35  ;;  %v2918_v15 = vpop.eup %2917 }
 0x2d2   : > { %v3975_v57 = vpop.xlane.xlu0 %1185  ;;  %v1465_v30 = vmul.f32 %v2918_v15, %v3510_v36 }
 0x2d3   : > { %1817 = vrot.lane.b32.xlu0 %v1224_v32, %s3144_s7 }
 0x2d4   : > { %v1180_v8 = vpop.xlane.xlu1 %1179 }
 0x2d5   : > { %2923 = vrcp.f32 %v1180_v8  ;;  %v2920_v2 = vpop.eup %2919 }
 0x2d6   : > { %v3981_v53 = vpop.xlane.xlu0 %941  ;;  %v1706_v27 = vmul.f32 %v2920_v2, %v3519_v43 }
 0x2d7   : > { %1881 = vrot.lane.b32.xlu0 %v1465_v30, %s3144_s7 }
 0x2d8   : > { %v1421_v4 = vpop.xlane.xlu1 %1420 }
 0x2d9   : > { %2925 = vrcp.f32 %v1421_v4 }
 0x2da   : > { %v1183_v13 = vpop.xlane.xlu0 %1182 }
 0x2db   : > { %v2922_v29 = vpop.eup %2921  ;;  %2927 = vrcp.f32 %v1183_v13  ;;  %1945 = vrot.lane.b32.xlu0 %v1706_v27, %s3144_s7 }
 0x2dc   : > { %v3985_v51 = vpop.xlane.xlu1 %1426  ;;  %v985_v26 = vmul.f32 %v2922_v29, %v3478_v62 }
 0x2de   : > { %1755 = vrot.lane.b32.xlu1 %v985_v26, %s3144_s7  ;;  %v1424_v44 = vpop.xlane.xlu0 %1423 }
 0x2df   : > { %v2924_v36 = vpop.eup %2923  ;;  %2929 = vrcp.f32 %v1424_v44 }
 0x2e0   : > { %v3990_v5 = vpop.xlane.xlu1 %950  ;;  %v1226_v58 = vmul.f32 %v2924_v36, %v3484_v6 }
 0x2e2   : > { %1819 = vrot.lane.b32.xlu1 %v1226_v58, %s3144_s7  ;;  %v948_v45 = vpop.xlane.xlu0 %947 }
 0x2e3   : > { %v2926_v43 = vpop.eup %2925 }
 0x2e4   : > { %v3994_v50 = vpop.xlane.xlu1 %1191  ;;  %v1467_v24 = vmul.f32 %v2926_v43, %v3490_v12 }
 0x2e5   : > { %v2928_v19 = vpop.eup %2927 }
 0x2e6   : > { %1883 = vrot.lane.b32.xlu1 %v1467_v24, %s3144_s7  ;;  %v1189_v62 = vpop.xlane.xlu0 %1188  ;;  %v1228_v23 = vmul.f32 %v2928_v19, %v3545_v17 }
 0x2e8   : > { %v3999_v56 = vpop.xlane.xlu1 %1432  ;;  %1821 = vrot.lane.b32.xlu0 %v1228_v23, %s3144_s7 }
 0x2e9   : > { %v2930_v0 = vpop.eup %2929 }
 0x2ea   : > { %v1430_v6 = vpop.xlane.xlu0 %1429  ;;  %v1469_v40 = vmul.f32 %v2930_v0, %v3557_v37 }
 0x2ec   : > { %v4003_v16 = vpop.xlane.xlu1 %956  ;;  %1885 = vrot.lane.b32.xlu0 %v1469_v40, %s3144_s7 }
 0x2ee   : > { %v954_v28 = vpop.xlane.xlu0 %953 }
 0x2f0   : > { %v4006_v12 = vpop.xlane.xlu1 %1197 }
 0x2f2   : > { %v4008_v18 = vpop.xlane.xlu0 %1194 }
 0x2f4   : > { %v4010_v33 = vpop.xlane.xlu1 %1438 }
 0x2f6   : > { %v4012_v17 = vpop.xlane.xlu0 %1435 }
 0x2f8   : > { %v4014_v63 = vpop.xlane.xlu1 %962 }
 0x2fa   : > { %v4016_v35 = vpop.xlane.xlu0 %959 }
 0x2fc   : > { %v4018_v31 = vpop.xlane.xlu1 %1203 }
 0x2fe   : > { %v4020_v37 = vpop.xlane.xlu0 %1200 }
 0x300   : > { %v4022_v32 = vpop.xlane.xlu1 %1444 }
 0x302   : > { %v4024_v61 = vpop.xlane.xlu0 %1441 }
 0x304   : > { %v4026_v15 = vpop.xlane.xlu1 %968 }
 0x306   : > { %v4028_v8 = vpop.xlane.xlu0 %965 }
 0x308   : > { %v4030_v46 = vpop.xlane.xlu1 %1209 }
 0x30a   : > { %v4032_v30 = vpop.xlane.xlu0 %1206 }
 0x30c   : > { %v4034_v2 = vpop.xlane.xlu1 %1450 }
 0x30e   : > { %v4036_v4 = vpop.xlane.xlu0 %1447 }
 0x310   : > { %v4038_v27 = vpop.xlane.xlu1 %974 }
 0x312   : > { %v4040_v29 = vpop.xlane.xlu0 %971 }
 0x314   : > { %v4042_v13 = vpop.xlane.xlu1 %1215 }
 0x315   : > { %4662 = vst [vmem:[#allocation51_spill] sm:$0xff] %v4042_v13 }
 0x316   : > { %v4044_v26 = vpop.xlane.xlu0 %1212 }
 0x318   : > { %v4046_v36 = vpop.xlane.xlu1 %1456 }
 0x319   : > { %4663 = vst [vmem:[#allocation52_spill] sm:$0xff] %v4046_v36 }
 0x31a   : > { %v4048_v44 = vpop.xlane.xlu0 %1453 }
 0x31c   : > { %v4050_v58 = vpop.xlane.xlu1 %980 }
 0x31d   : > { %4664 = vst [vmem:[#allocation53_spill] sm:$0xff] %v4050_v58 }
 0x31e   : > { %v4052_v43 = vpop.xlane.xlu0 %977 }
 0x320   : > { %v4054_v24 = vpop.xlane.xlu1 %1221 }
 0x321   : > { %4665 = vst [vmem:[#allocation54_spill] sm:$0xff] %v4054_v24 }
 0x322   : > { %v4056_v19 = vpop.xlane.xlu0 %1218 }
 0x323   : > { %4666 = vst [vmem:[#allocation55_spill] sm:$0xff] %v4056_v19 }
 0x324   : > { %v4058_v23 = vpop.xlane.xlu1 %1462 }
 0x325   : > { %4667 = vst [vmem:[#allocation56_spill] sm:$0xff] %v4058_v23 }
 0x326   : > { %v4060_v0 = vpop.xlane.xlu0 %1459 }
 0x328   : > { %v1662_v40 = vpop.xlane.xlu1 %1661 }
 0x329   : > { %2931 = vrcp.f32 %v1662_v40 }
 0x32a   : > { %2933 = vrcp.f32 %v3967_v54  ;;  %v1665_v13 = vpop.xlane.xlu0 %1664 }
 0x32b   : > { %2935 = vrcp.f32 %v1665_v13 }
 0x32c   : > { %2937 = vrcp.f32 %v948_v45 }
 0x32d   : > { %2939 = vrcp.f32 %v3975_v57 }
 0x32e   : > { %v1668_v58 = vpop.xlane.xlu0 %1667  ;;  %2941 = vrcp.f32 %v1189_v62 }
 0x32f   : > { %2943 = vrcp.f32 %v3985_v51 }
 0x330   : > { %2945 = vrcp.f32 %v1430_v6 }
 0x331   : > { %2947 = vrcp.f32 %v1668_v58 }
 0x332   : > { %v1671_v40 = vpop.xlane.xlu0 %1670 }
 0x333   : > { %v2932_v36 = vpop.eup %2931  ;;  %2949 = vrcp.f32 %v1671_v40 }
 0x334   : > { %v1708_v24 = vmul.f32 %v2932_v36, %v3499_v25  ;;  %v2934_v19 = vpop.eup %2933  ;;  %2951 = vrcp.f32 %v3981_v53 }
 0x335   : > { %v2936_v23 = vpop.eup %2935  ;;  %v989_v45 = vmul.f32 %v2934_v19, %v3508_v34  ;;  %2953 = vrcp.f32 %v954_v28  ;;  %v4671_v19 = vld [vmem:[#allocation24_spill] sm:$0xff] }
 0x336   : > { %1947 = vrot.lane.b32.xlu1 %v1708_v24, %s3144_s7  ;;  %v1710_v54 = vmul.f32 %v2936_v23, %v3569_v49  ;;  %v2938_v13 = vpop.eup %2937  ;;  %2955 = vrcp.f32 %v3990_v5  ;;  %v1677_v40 = vpop.xlane.xlu0 %1676 }
 0x337   : > { %v2940_v57 = vpop.eup %2939  ;;  %v991_v25 = vmul.f32 %v2938_v13, %v3547_v21  ;;  %2957 = vrcp.f32 %v4008_v18 }
 0x338   : > { %1949 = vrot.lane.b32.xlu0 %v1710_v54, %s3144_s7  ;;  %v2942_v51 = vpop.eup %2941  ;;  %v1230_v62 = vmul.f32 %v2940_v57, %v3517_v42  ;;  %2959 = vrcp.f32 %v3994_v50 }
 0x339   : > { %v2944_v6 = vpop.eup %2943  ;;  %v1232_v34 = vmul.f32 %v2942_v51, %v3559_v39  ;;  %2961 = vrcp.f32 %v4012_v17 }
 0x33a   : > { %1759 = vrot.lane.b32.xlu1 %v989_v45, %s3144_s7  ;;  %v2946_v49 = vpop.eup %2945  ;;  %v1471_v36 = vmul.f32 %v2944_v6, %v3527_v52  ;;  %2963 = vrcp.f32 %v3999_v56  ;;  %v4673_v45 = vld [vmem:[#allocation26_spill] sm:$0xff] }
 0x33b   : > { %v2948_v58 = vpop.eup %2947  ;;  %v1473_v42 = vmul.f32 %v2946_v49, %v3571_v55  ;;  %2965 = vrcp.f32 %v4016_v35  ;;  %v4676_v49 = vld [vmem:[#allocation55_spill] sm:$0xff] }
 0x33c   : > { %1761 = vrot.lane.b32.xlu0 %v991_v25, %s3144_s7  ;;  %v1712_v53 = vmul.f32 %v2948_v58, %v3533_v60  ;;  %2967 = vrcp.f32 %v4003_v16 }
 0x33d   : > { %v2950_v21 = vpop.eup %2949  ;;  %2969 = vrcp.f32 %v4020_v37 }
 0x33e   : > { %1823 = vrot.lane.b32.xlu1 %v1230_v62, %s3144_s7  ;;  %v2952_v5 = vpop.eup %2951  ;;  %v1714_v52 = vmul.f32 %v2950_v21, %v3583_v3  ;;  %2971 = vrcp.f32 %v4006_v12  ;;  %v4675_v62 = vld [vmem:[#allocation30_spill] sm:$0xff]  ;;  %v4679_v21 = vld [vmem:[#allocation32_spill] sm:$0xff] }
 0x33f   : > { %v2954_v39 = vpop.eup %2953  ;;  %v987_v28 = vmul.f32 %v2952_v5, %v3539_v7  ;;  %2973 = vrcp.f32 %v4024_v61  ;;  %v1674_v5 = vpop.xlane.xlu1 %1673 }
 0x340   : > { %1825 = vrot.lane.b32.xlu0 %v1232_v34, %s3144_s7  ;;  %v2956_v50 = vpop.eup %2955  ;;  %v995_v60 = vmul.f32 %v2954_v39, %v3595_v20  ;;  %2975 = vrcp.f32 %v4010_v33  ;;  %v1683_v34 = vpop.xlane.xlu0 %1682 }
 0x341   : > { %v2958_v55 = vpop.eup %2957  ;;  %v993_v18 = vmul.f32 %v2956_v50, %v3581_v1  ;;  %2977 = vrcp.f32 %v4028_v8 }
 0x342   : > { %1887 = vrot.lane.b32.xlu1 %v1471_v36, %s3144_s7  ;;  %v2960_v56 = vpop.eup %2959  ;;  %v1236_v7 = vmul.f32 %v2958_v55, %v3608_v47  ;;  %2979 = vrcp.f32 %v4014_v63  ;;  %v4677_v36 = vld [vmem:[#allocation51_spill] sm:$0xff]  ;;  %v4682_v55 = vld [vmem:[#allocation34_spill] sm:$0xff] }
 0x343   : > { %v2962_v3 = vpop.eup %2961  ;;  %v1234_v17 = vmul.f32 %v2960_v56, %v3593_v11  ;;  %2981 = vrcp.f32 %v4032_v30 }
 0x344   : > { %1889 = vrot.lane.b32.xlu0 %v1473_v42, %s3144_s7  ;;  %v2964_v16 = vpop.eup %2963  ;;  %v1477_v1 = vmul.f32 %v2962_v3, %v3621_v59  ;;  %2983 = vrcp.f32 %v4018_v31  ;;  %v1689_v39 = vpop.xlane.xlu0 %1688 }
 0x345   : > { %v2966_v20 = vpop.eup %2965  ;;  %v1475_v35 = vmul.f32 %v2964_v16, %v3606_v38  ;;  %2985 = vrcp.f32 %v4036_v4  ;;  %v4669_v4 = vld [vmem:[#allocation22_spill] sm:$0xff]  ;;  %v1680_v16 = vpop.xlane.xlu1 %1679 }
 0x346   : > { %1951 = vrot.lane.b32.xlu1 %v1712_v53, %s3144_s7  ;;  %v2968_v12 = vpop.eup %2967  ;;  %v999_v11 = vmul.f32 %v2966_v20, %v3647_v22  ;;  %2987 = vrcp.f32 %v4022_v32 }
 0x347   : > { %v2970_v47 = vpop.eup %2969  ;;  %v997_v37 = vmul.f32 %v2968_v12, %v3632_v10  ;;  %2989 = vrcp.f32 %v4040_v29 }
 0x348   : > { %1953 = vrot.lane.b32.xlu0 %v1714_v52, %s3144_s7  ;;  %v2972_v33 = vpop.eup %2971  ;;  %v1240_v38 = vmul.f32 %v2970_v47, %v3660_v14  ;;  %2991 = vrcp.f32 %v4026_v15  ;;  %v4680_v52 = vld [vmem:[#allocation52_spill] sm:$0xff]  ;;  %v1695_v12 = vpop.xlane.xlu0 %1694  ;;  %v4687_v47 = vld [vmem:[#allocation43_spill] sm:$0xff] }
 0x349   : > { %v2974_v59 = vpop.eup %2973  ;;  %v1238_v61 = vmul.f32 %v2972_v33, %v3645_v48  ;;  %v4668_v48 = vld [vmem:[#allocation25_spill] sm:$0xff]  ;;  %2993 = vrcp.f32 %v4044_v26 }
 0x34a   : > { %1757 = vrot.lane.b32.xlu1 %v987_v28, %s3144_s7  ;;  %v2976_v63 = vpop.eup %2975  ;;  %v1481_v10 = vmul.f32 %v2974_v59, %v3671_v9  ;;  %2995 = vrcp.f32 %v4030_v46  ;;  %v4672_v26 = vld [vmem:[#allocation29_spill] sm:$0xff] }
 0x34b   : > { %v2978_v22 = vpop.eup %2977  ;;  %v1479_v8 = vmul.f32 %v2976_v63, %v3658_v41  ;;  %v4670_v41 = vld [vmem:[#allocation27_spill] sm:$0xff]  ;;  %2997 = vrcp.f32 %v4048_v44  ;;  %v4674_v44 = vld [vmem:[#allocation33_spill] sm:$0xff]  ;;  %v1686_v63 = vpop.xlane.xlu1 %1685 }
 0x34c   : > { %1765 = vrot.lane.b32.xlu0 %v995_v60, %s3144_s7  ;;  %v2980_v31 = vpop.eup %2979  ;;  %v1003_v14 = vmul.f32 %v2978_v22, %v4668_v48  ;;  %2999 = vrcp.f32 %v4034_v2  ;;  %v4681_v28 = vld [vmem:[#allocation37_spill] sm:$0xff]  ;;  %v1701_v22 = vpop.xlane.xlu0 %1700 }
 0x34d   : > { %v2982_v30 = vpop.eup %2981  ;;  %v1001_v24 = vmul.f32 %v2980_v31, %v4669_v4  ;;  %3001 = vrcp.f32 %v4052_v43  ;;  %v4678_v43 = vld [vmem:[#allocation35_spill] sm:$0xff] }
 0x34e   : > { %1763 = vrot.lane.b32.xlu1 %v993_v18, %s3144_s7  ;;  %v2984_v32 = vpop.eup %2983  ;;  %v1244_v9 = vmul.f32 %v2982_v30, %v4670_v41  ;;  %3003 = vrcp.f32 %v4038_v27 }
 0x34f   : > { %v2986_v29 = vpop.eup %2985  ;;  %v1242_v23 = vmul.f32 %v2984_v32, %v4671_v19  ;;  %3005 = vrcp.f32 %v4676_v49 }
 0x350   : > { %1829 = vrot.lane.b32.xlu0 %v1236_v7, %s3144_s7  ;;  %v2988_v15 = vpop.eup %2987  ;;  %v1485_v54 = vmul.f32 %v2986_v29, %v4672_v26  ;;  %3007 = vrcp.f32 %v4677_v36  ;;  %v4683_v7 = vld [vmem:[#allocation53_spill] sm:$0xff]  ;;  %v4693_v29 = vld [vmem:[#allocation47_spill] sm:$0xff] }
 0x351   : > { %v2990_v13 = vpop.eup %2989  ;;  %v1483_v46 = vmul.f32 %v2988_v15, %v4673_v45  ;;  %3009 = vrcp.f32 %v4060_v0  ;;  %v4684_v0 = vld [vmem:[#allocation41_spill] sm:$0xff]  ;;  %v4182_v15 = vpop.permute.xlu0 %1753 }
 0x352   : > { %1827 = vrot.lane.b32.xlu1 %v1234_v17, %s3144_s7  ;;  %v2992_v57 = vpop.eup %2991  ;;  %v1007_v25 = vmul.f32 %v2990_v13, %v4674_v44  ;;  %3011 = vrcp.f32 %v4680_v52  ;;  %v4695_v13 = vld [vmem:[#allocation48_spill] sm:$0xff] }
 0x353   : > { %v2994_v51 = vpop.eup %2993  ;;  %v1005_v2 = vmul.f32 %v2992_v57, %v4675_v62  ;;  %3013 = vrcp.f32 %v1677_v40  ;;  %v4694_v40 = vld [vmem:[#allocation23_spill] sm:$0xff] }
 0x354   : > { %1893 = vrot.lane.b32.xlu0 %v1477_v1, %s3144_s7  ;;  %v2996_v6 = vpop.eup %2995  ;;  %v1248_v58 = vmul.f32 %v2994_v51, %v4678_v43  ;;  %3015 = vrcp.f32 %v4683_v7  ;;  %v4685_v1 = vld [vmem:[#allocation38_spill] sm:$0xff]  ;;  %v4696_v62 = vld [vmem:[#allocation31_spill] sm:$0xff] }
 0x355   : > { %v2998_v42 = vpop.eup %2997  ;;  %v1246_v27 = vmul.f32 %v2996_v6, %v4679_v21  ;;  %3017 = vrcp.f32 %v1683_v34  ;;  %v4194_v51 = vpop.permute.xlu0 %1817  ;;  %v4697_v34 = vld [vmem:[#allocation49_spill] sm:$0xff] }
 0x356   : > { %1891 = vrot.lane.b32.xlu1 %v1475_v35, %s3144_s7  ;;  %v3000_v53 = vpop.eup %2999  ;;  %v1489_v50 = vmul.f32 %v2998_v42, %v4681_v28  ;;  %v4698_v42 = vld [vmem:[#allocation39_spill] sm:$0xff] }
 0x357   : > { %v3002_v60 = vpop.eup %3001  ;;  %v1487_v18 = vmul.f32 %v3000_v53, %v4682_v55 }
 0x358   : > { %1769 = vrot.lane.b32.xlu0 %v999_v11, %s3144_s7  ;;  %v3004_v56 = vpop.eup %3003  ;;  %v1011_v3 = vmul.f32 %v3002_v60, %v4684_v0  ;;  %v4686_v11 = vld [vmem:[#allocation54_spill] sm:$0xff] }
 0x359   : > { %v3006_v17 = vpop.eup %3005  ;;  %v1009_v20 = vmul.f32 %v3004_v56, %v4685_v1  ;;  %3019 = vrcp.f32 %v4686_v11  ;;  %v4211_v60 = vpop.permute.xlu0 %1881  ;;  %v4700_v56 = vld [vmem:[#allocation46_spill] sm:$0xff] }
 0x35a   : > { %1767 = vrot.lane.b32.xlu1 %v997_v37, %s3144_s7  ;;  %v3008_v35 = vpop.eup %3007  ;;  %v1252_v37 = vmul.f32 %v3006_v17, %v4687_v47  ;;  %3021 = vrcp.f32 %v1689_v39  ;;  %v4209_v39 = vld [vmem:[%s4561_s3] ss:$0 sm:$0xff]  ;;  %v4702_v47 = vld [vmem:[#allocation28_spill] sm:$0xff] }
 0x35b   : > { %v3010_v33 = vpop.eup %3009 }
 0x35c   : > { %1833 = vrot.lane.b32.xlu0 %v1240_v38, %s3144_s7  ;;  %v4688_v38 = vld [vmem:[#allocation40_spill] sm:$0xff] }
 0x35d   : > { %v1250_v59 = vmul.f32 %v3008_v35, %v4688_v38  ;;  %v1946_v11 = vpop.permute.xlu0 %1945 }
 0x35e   : > { %1831 = vrot.lane.b32.xlu1 %v1238_v61, %s3144_s7  ;;  %v3012_v61 = vpop.eup %3011 }
 0x35f   : > { %v3014_v48 = vpop.eup %3013 }
 0x360   : > { %1897 = vrot.lane.b32.xlu0 %v1481_v10, %s3144_s7  ;;  %v4689_v10 = vld [vmem:[#allocation56_spill] sm:$0xff]  ;;  %v3016_v4 = vpop.eup %3015 }
 0x361   : > { %3023 = vrcp.f32 %v4689_v10  ;;  %v3018_v41 = vpop.eup %3017  ;;  %v1013_v19 = vmul.f32 %v3016_v4, %v4693_v29  ;;  %v4705_v4 = vld [vmem:[#allocation9_spill] sm:$0xff] }
 0x362   : > { %1895 = vrot.lane.b32.xlu1 %v1479_v8, %s3144_s7  ;;  %v4690_v8 = vld [vmem:[#allocation44_spill] sm:$0xff]  ;;  %3025 = vrcp.f32 %v1695_v12  ;;  %v1722_v26 = vmul.f32 %v3018_v41, %v4694_v40  ;;  %v4706_v29 = vld [vmem:[#allocation45_spill] sm:$0xff] }
 0x363   : > { %v1493_v31 = vmul.f32 %v3010_v33, %v4690_v8  ;;  %3027 = vrcp.f32 %v1674_v5  ;;  %v4699_v5 = vld [vmem:[#allocation19_spill] sm:$0xff]  ;;  %v4704_v8 = vld [vmem:[#allocation36_spill] sm:$0xff] }
 0x364   : > { %1773 = vrot.lane.b32.xlu0 %v1003_v14, %s3144_s7  ;;  %v4691_v14 = vld [vmem:[#allocation42_spill] sm:$0xff]  ;;  %3029 = vrcp.f32 %v1701_v22 }
 0x365   : > { %v1491_v30 = vmul.f32 %v3012_v61, %v4691_v14  ;;  %3031 = vrcp.f32 %v1680_v16 }
 0x366   : > { %1771 = vrot.lane.b32.xlu1 %v1001_v24, %s3144_s7  ;;  %v4692_v24 = vld [vmem:[#allocation20_spill] sm:$0xff]  ;;  %3033 = vrcp.f32 %v1686_v63 }
 0x367   : > { %v1718_v32 = vmul.f32 %v3014_v48, %v4692_v24 }
 0x368   : > { %1837 = vrot.lane.b32.xlu0 %v1244_v9, %s3144_s7  ;;  %v1692_v9 = vpop.xlane.xlu1 %1691 }
 0x369   : > { %3035 = vrcp.f32 %v1692_v9 }
 0x36a   : > { %1835 = vrot.lane.b32.xlu1 %v1242_v23, %s3144_s7  ;;  %v3020_v23 = vpop.eup %3019 }
 0x36b   : > { %v1254_v45 = vmul.f32 %v3020_v23, %v4695_v13 }
 0x36c   : > { %1901 = vrot.lane.b32.xlu0 %v1485_v54, %s3144_s7  ;;  %v3022_v54 = vpop.eup %3021 }
 0x36d   : > { %v3024_v57 = vpop.eup %3023 }
 0x36e   : > { %1899 = vrot.lane.b32.xlu1 %v1483_v46, %s3144_s7  ;;  %v4188_v46 = vpop.f32.mrb[0].mxu0  ;;  %v3026_v6 = vpop.eup %3025  ;;  %v1495_v49 = vmul.f32 %v3024_v57, %v4697_v34  ;;  %v4709_v34 = vld [vmem:[#allocation17_spill] sm:$0xff] }
 0x36f   : > { %v4191_v44 = vpop.f32.mrb[1].mxu0  ;;  %v3028_v43 = vpop.eup %3027  ;;  %v1730_v21 = vmul.f32 %v3026_v6, %v4698_v42 }
 0x370   : > { %1777 = vrot.lane.b32.xlu0 %v1007_v25, %s3144_s7  ;;  %v1698_v25 = vpop.xlane.xlu1 %1697  ;;  %v4198_v36 = vpop.f32.mrb[2].mxu0  ;;  %v1716_v52 = vmul.f32 %v3028_v43, %v4699_v5  ;;  %v4711_v5 = vld [vmem:[#allocation3_spill] sm:$0xff] }
 0x371   : > { %3037 = vrcp.f32 %v1698_v25 }
 0x372   : > { %1775 = vrot.lane.b32.xlu1 %v1005_v2, %s3144_s7  ;;  %v1726_v2 = vmul.f32 %v3022_v54, %v4696_v62  ;;  %v4708_v62 = vld [vmem:[#allocation50_spill] sm:$0xff] }
 0x374   : > { %1841 = vrot.lane.b32.xlu0 %v1248_v58, %s3144_s7  ;;  %v4201_v58 = vpop.f32.mrb[3].mxu0  ;;  %v1704_v53 = vpop.xlane.xlu1 %1703 }
 0x375   : > { %v2627_v28 = vpop.f32.mrb[4].mxu0  ;;  %3039 = vrcp.f32 %v1704_v53  ;;  %v4710_v53 = vld [vmem:[#allocation6_spill] sm:$0xff] }
 0x376   : > { %1839 = vrot.lane.b32.xlu1 %v1246_v27, %s3144_s7  ;;  %v3030_v27 = vpop.eup %3029  ;;  %v4215_v55 = vadd.f32 %v2627_v28, %v4209_v39 }
 0x377   : > { %v1734_v7 = vmul.f32 %v3030_v27, %v4700_v56  ;;  %v4713_v56 = vld [vmem:[#allocation4_spill] sm:$0xff] }
 0x378   : > { %1905 = vrot.lane.b32.xlu0 %v1489_v50, %s3144_s7  ;;  %v3032_v50 = vpop.eup %3031  ;;  %v4221_v0 = vpop.permute.xlu1 %1755 }
 0x379   : > { %v3034_v1 = vpop.eup %3033 }
 0x37a   : > { %1903 = vrot.lane.b32.xlu1 %v1487_v18, %s3144_s7  ;;  %v4217_v18 = vpop.f32.mrb[5].mxu0  ;;  %v3036_v38 = vpop.eup %3035 }
 0x37b   : > { %v2630_v16 = vpop.f32.mrb[6].mxu0  ;;  %v3038_v14 = vpop.eup %3037 }
 0x37c   : > { %1781 = vrot.lane.b32.xlu0 %v1011_v3, %s3144_s7  ;;  %v4701_v3 = vld [vmem:[#allocation21_spill] sm:$0xff]  ;;  %v519_v35 = vpop.f32.mrb[7].mxu0  ;;  %v4238_v10 = vpop.permute.xlu1 %1819 }
 0x37d   : > { %v1720_v17 = vmul.f32 %v3032_v50, %v4701_v3  ;;  %v4230_v12 = vadd.f32 %v4209_v39, %v519_v35  ;;  %v2633_v33 = vpop.f32.mrb[8].mxu0  ;;  %v4712_v50 = vld [vmem:[#allocation8_spill] sm:$0xff] }
 0x37e   : > { %1779 = vrot.lane.b32.xlu1 %v1009_v20, %s3144_s7  ;;  %v4226_v20 = vadd.f32 %v2630_v16, %v4209_v39  ;;  %v4236_v61 = vadd.f32 %v2633_v33, %v4209_v39  ;;  %v529_v63 = vpop.f32.mrb[9].mxu0  ;;  %v4715_v16 = vld [vmem:[#allocation10_spill] sm:$0xff]  ;;  %v4717_v33 = vld [vmem:[#allocation16_spill] sm:$0xff] }
 0x37f   : > { %v4242_v22 = vadd.f32 %v4209_v39, %v529_v63  ;;  %v2636_v48 = vpop.f32.mrb[10].mxu0  ;;  %v3040_v40 = vpop.eup %3039 }
 0x380   : > { %1845 = vrot.lane.b32.xlu0 %v1252_v37, %s3144_s7  ;;  %v1724_v37 = vmul.f32 %v3034_v1, %v4702_v47  ;;  %v4248_v24 = vadd.f32 %v2636_v48, %v4209_v39  ;;  %v4254_v9 = vpop.permute.xlu1 %1883  ;;  %v4716_v47 = vld [vmem:[#allocation14_spill] sm:$0xff] }
 0x382   : > { %1843 = vrot.lane.b32.xlu1 %v1250_v59, %s3144_s7  ;;  %v4703_v59 = vld [vmem:[#allocation5_spill] sm:$0xff] }
 0x384   : > { %1909 = vrot.lane.b32.xlu0 %v1493_v31, %s3144_s7  ;;  %v1728_v31 = vmul.f32 %v3036_v38, %v4704_v8 }
 0x386   : > { %1907 = vrot.lane.b32.xlu1 %v1491_v30, %s3144_s7  ;;  %v1822_v30 = vpop.permute.xlu0 %1821 }
 0x388   : > { %1957 = vrot.lane.b32.xlu0 %v1718_v32, %s3144_s7  ;;  %v539_v32 = vpop.f32.mrb[11].mxu0 }
 0x389   : > { %v4252_v41 = vadd.f32 %v4209_v39, %v539_v32  ;;  %v2639_v23 = vpop.f32.mrb[12].mxu0 }
 0x38a   : > { %1783 = vrot.lane.b32.xlu1 %v1013_v19, %s3144_s7  ;;  %v1732_v19 = vmul.f32 %v3038_v14, %v4706_v29  ;;  %v4260_v54 = vadd.f32 %v2639_v23, %v4209_v39  ;;  %v549_v13 = vpop.f32.mrb[13].mxu0  ;;  %v1886_v57 = vpop.permute.xlu0 %1885  ;;  %v4718_v14 = vld [vmem:[#allocation18_spill] sm:$0xff] }
 0x38b   : > { %v2642_v6 = vpop.f32.mrb[14].mxu0 }
 0x38c   : > { %1961 = vrot.lane.b32.xlu0 %v1722_v26, %s3144_s7  ;;  %v4707_v26 = vld [vmem:[#allocation15_spill] sm:$0xff]  ;;  %v559_v43 = vpop.f32.mrb[15].mxu0 }
 0x38d   : > { %v4274_v42 = vadd.f32 %v4209_v39, %v559_v43 }
 0x38e   : > { %1847 = vrot.lane.b32.xlu1 %v1254_v45, %s3144_s7  ;;  %v4264_v45 = vadd.f32 %v4209_v39, %v549_v13 }
 0x390   : > { %1965 = vrot.lane.b32.xlu0 %v1726_v2, %s3144_s7  ;;  %v1736_v2 = vmul.f32 %v3040_v40, %v4708_v62  ;;  %v4720_v40 = vld [vmem:[#allocation11_spill] sm:$0xff]  ;;  %v1994_v62 = vsel %vm933_vm5, %v4221_v0, %v4238_v10 }
 0x392   : > { %1911 = vrot.lane.b32.xlu1 %v1495_v49, %s3144_s7  ;;  %v4270_v49 = vadd.f32 %v2642_v6, %v4209_v39  ;;  %v2011_v6 = vsel %vm2009_vm6, %v1994_v62, %v4254_v9 }
 0x394   : > { %1969 = vrot.lane.b32.xlu0 %v1730_v21, %s3144_s7 }
 0x396   : > { %1955 = vrot.lane.b32.xlu1 %v1716_v52, %s3144_s7 }
 0x398   : > { %1973 = vrot.lane.b32.xlu0 %v1734_v7, %s3144_s7 }
 0x39a   : > { %1959 = vrot.lane.b32.xlu1 %v1720_v17, %s3144_s7  ;;  %v4714_v17 = vld [vmem:[#allocation12_spill] sm:$0xff] }
 0x39c   : > { %2059 = vrot.lane.b32.xlu0 %v4703_v59, %s3148_s26 }
 0x39e   : > { %1963 = vrot.lane.b32.xlu1 %v1724_v37, %s3144_s7  ;;  %v1993_v37 = vsel %vm933_vm5, %v4182_v15, %v4194_v51 }
 0x39f   : > { %v2010_v38 = vsel %vm2009_vm6, %v1993_v37, %v4211_v60 }
 0x3a0   : > { %2063 = vrot.lane.b32.xlu0 %v4705_v4, %s3148_s26  ;;  %v2027_v63 = vsel %vm2026_vm7, %v2010_v38, %v1946_v11  ;;  %v4719_v11 = vld [vmem:[#allocation7_spill] sm:$0xff] }
 0x3a2   : > { %1967 = vrot.lane.b32.xlu1 %v1728_v31, %s3144_s7 }
 0x3a4   : > { %2067 = vrot.lane.b32.xlu0 %v4707_v26, %s3148_s26 }
 0x3a6   : > { %1971 = vrot.lane.b32.xlu1 %v1732_v19, %s3144_s7 }
 0x3a8   : > { %v1948_v25 = vpop.permute.xlu1 %1947  ;;  %2071 = vrot.lane.b32.xlu0 %v4709_v34, %s3148_s26 }
 0x3a9   : > { %v2028_v43 = vsel %vm2026_vm7, %v2011_v6, %v1948_v25 }
 0x3aa   : > { %1975 = vrot.lane.b32.xlu1 %v1736_v2, %s3144_s7  ;;  %v1950_v21 = vpop.permute.xlu0 %1949  ;;  %s2512_s7 = sshll.u32 %s279_s30, 7 }
 0x3ab   : > { %s4391_s21 = scalar_lea.vmem [#allocation2], %s2512_s7  }
 0x3ac   : > { %v1760_v27 = vpop.permute.xlu1 %1759  ;;  %2075 = vrot.lane.b32.xlu0 %v4710_v53, %s3148_s26 }
 0x3ae   : > { %2061 = vrot.lane.b32.xlu1 %v4711_v5, %s3148_s26  ;;  %v1762_v52 = vpop.permute.xlu0 %1761 }
 0x3b0   : > { %v1824_v28 = vpop.permute.xlu1 %1823  ;;  %2079 = vrot.lane.b32.xlu0 %v4712_v50, %s3148_s26 }
 0x3b2   : > { %2065 = vrot.lane.b32.xlu1 %v4713_v56, %s3148_s26  ;;  %v1826_v7 = vpop.permute.xlu0 %1825 }
 0x3b3   : > { %v1997_v60 = vsel %vm933_vm5, %v1762_v52, %v1826_v7 }
 0x3b4   : > { %v1888_v3 = vpop.permute.xlu1 %1887  ;;  %2083 = vrot.lane.b32.xlu0 %v4714_v17, %s3148_s26 }
 0x3b6   : > { %2069 = vrot.lane.b32.xlu1 %v4715_v16, %s3148_s26  ;;  %v1890_v1 = vpop.permute.xlu0 %1889 }
 0x3b8   : > { %v1952_v35 = vpop.permute.xlu1 %1951  ;;  %2087 = vrot.lane.b32.xlu0 %v4716_v47, %s3148_s26 }
 0x3ba   : > { %2073 = vrot.lane.b32.xlu1 %v4717_v33, %s3148_s26  ;;  %v1954_v59 = vpop.permute.xlu0 %1953 }
 0x3bc   : > { %v1758_v8 = vpop.permute.xlu1 %1757  ;;  %2123 = vrot.lane.b32.xlu0 %v2027_v63, %s3149_s27 }
 0x3bd   : > { %v1995_v31 = vsel %vm933_vm5, %v1758_v8, %v1822_v30  ;;  %v2014_v30 = vsel %vm2009_vm6, %v1997_v60, %v1890_v1 }
 0x3be   : > { %v2012_v48 = vsel %vm2009_vm6, %v1995_v31, %v1886_v57  ;;  %2077 = vrot.lane.b32.xlu1 %v4718_v14, %s3148_s26  ;;  %v1766_v15 = vpop.permute.xlu0 %1765  ;;  %v2031_v29 = vsel %vm2026_vm7, %v2014_v30, %v1954_v59  ;;  %v4721_v57 = vld [vmem:[#allocation13_spill] sm:$0xff] }
 0x3bf   : > { %v2029_v51 = vsel %vm2026_vm7, %v2012_v48, %v1950_v21  ;;  %v1996_v21 = vsel %vm933_vm5, %v1760_v27, %v1824_v28 }
 0x3c0   : > { %v1764_v4 = vpop.permute.xlu1 %1763  ;;  %2127 = vrot.lane.b32.xlu0 %v2029_v51, %s3149_s27  ;;  %v2013_v5 = vsel %vm2009_vm6, %v1996_v21, %v1888_v3 }
 0x3c1   : > { %v2030_v50 = vsel %vm2026_vm7, %v2013_v5, %v1952_v35 }
 0x3c2   : > { %2081 = vrot.lane.b32.xlu1 %v4719_v11, %s3148_s26  ;;  %v1830_v32 = vpop.permute.xlu0 %1829 }
 0x3c3   : > { %v1999_v31 = vsel %vm933_vm5, %v1766_v15, %v1830_v32 }
 0x3c4   : > { %v1828_v19 = vpop.permute.xlu1 %1827  ;;  %2131 = vrot.lane.b32.xlu0 %v2031_v29, %s3149_s27 }
 0x3c5   : > { %v1998_v23 = vsel %vm933_vm5, %v1764_v4, %v1828_v19 }
 0x3c6   : > { %2085 = vrot.lane.b32.xlu1 %v4720_v40, %s3148_s26  ;;  %v1894_v26 = vpop.permute.xlu0 %1893 }
 0x3c7   : > { %v2016_v48 = vsel %vm2009_vm6, %v1999_v31, %v1894_v26 }
 0x3c8   : > { %v1892_v13 = vpop.permute.xlu1 %1891 }
 0x3ca   : > { %2089 = vrot.lane.b32.xlu1 %v4721_v57, %s3148_s26  ;;  %v1770_v2 = vpop.permute.xlu0 %1769 }
 0x3cc   : > { %v1768_v34 = vpop.permute.xlu1 %1767 }
 0x3ce   : > { %2125 = vrot.lane.b32.xlu1 %v2028_v43, %s3149_s27  ;;  %v1834_v53 = vpop.permute.xlu0 %1833  ;;  %v2015_v43 = vsel %vm2009_vm6, %v1998_v23, %v1892_v13 }
 0x3cf   : > { %v2001_v60 = vsel %vm933_vm5, %v1770_v2, %v1834_v53 }
 0x3d0   : > { %v1832_v52 = vpop.permute.xlu1 %1831 }
 0x3d2   : > { %2129 = vrot.lane.b32.xlu1 %v2030_v50, %s3149_s27  ;;  %v1898_v0 = vpop.permute.xlu0 %1897 }
 0x3d3   : > { %v2018_v11 = vsel %vm2009_vm6, %v2001_v60, %v1898_v0  ;;  %v2000_v0 = vsel %vm933_vm5, %v1768_v34, %v1832_v52 }
 0x3d4   : > { %v1896_v10 = vpop.permute.xlu1 %1895 }
 0x3d6   : > { %v1774_v56 = vpop.permute.xlu0 %1773 }
 0x3d8   : > { %v1772_v7 = vpop.permute.xlu1 %1771 }
 0x3da   : > { %v1838_v9 = vpop.permute.xlu0 %1837 }
 0x3db   : > { %v2003_v15 = vsel %vm933_vm5, %v1774_v56, %v1838_v9 }
 0x3dc   : > { %v1836_v17 = vpop.permute.xlu1 %1835 }
 0x3de   : > { %v1902_v16 = vpop.permute.xlu0 %1901 }
 0x3df   : > { %v2020_v32 = vsel %vm2009_vm6, %v2003_v15, %v1902_v16  ;;  %v2017_v16 = vsel %vm2009_vm6, %v2000_v0, %v1896_v10 }
 0x3e0   : > { %v1900_v25 = vpop.permute.xlu1 %1899 }
 0x3e2   : > { %v1778_v1 = vpop.permute.xlu0 %1777 }
 0x3e4   : > { %v1776_v47 = vpop.permute.xlu1 %1775 }
 0x3e6   : > { %v1842_v37 = vpop.permute.xlu0 %1841 }
 0x3e7   : > { %v2005_v62 = vsel %vm933_vm5, %v1778_v1, %v1842_v37  ;;  %v2002_v37 = vsel %vm933_vm5, %v1772_v7, %v1836_v17 }
 0x3e8   : > { %v1840_v27 = vpop.permute.xlu1 %1839 }
 0x3e9   : > { %v2004_v10 = vsel %vm933_vm5, %v1776_v47, %v1840_v27 }
 0x3ea   : > { %v1906_v28 = vpop.permute.xlu0 %1905 }
 0x3eb   : > { %v2022_v2 = vsel %vm2009_vm6, %v2005_v62, %v1906_v28 }
 0x3ec   : > { %v1904_v33 = vpop.permute.xlu1 %1903 }
 0x3ee   : > { %v1782_v3 = vpop.permute.xlu0 %1781 }
 0x3f0   : > { %v1780_v38 = vpop.permute.xlu1 %1779 }
 0x3f2   : > { %v1846_v59 = vpop.permute.xlu0 %1845 }
 0x3f3   : > { %v2007_v50 = vsel %vm933_vm5, %v1782_v3, %v1846_v59  ;;  %v2019_v3 = vsel %vm2009_vm6, %v2002_v37, %v1900_v25 }
 0x3f4   : > { %v1844_v35 = vpop.permute.xlu1 %1843 }
 0x3f5   : > { %v2006_v7 = vsel %vm933_vm5, %v1780_v38, %v1844_v35 }
 0x3f6   : > { %v1910_v63 = vpop.permute.xlu0 %1909 }
 0x3f7   : > { %v2024_v56 = vsel %vm2009_vm6, %v2007_v50, %v1910_v63  ;;  %v2021_v63 = vsel %vm2009_vm6, %v2004_v10, %v1904_v33 }
 0x3f8   : > { %v1908_v8 = vpop.permute.xlu1 %1907 }
 0x3f9   : > { %v2023_v25 = vsel %vm2009_vm6, %v2006_v7, %v1908_v8 }
 0x3fa   : > { %v1958_v14 = vpop.permute.xlu0 %1957 }
 0x3fb   : > { %v2033_v51 = vsel %vm2026_vm7, %v2016_v48, %v1958_v14 }
 0x3fc   : > { %v1784_v4 = vpop.permute.xlu1 %1783  ;;  %2135 = vrot.lane.b32.xlu0 %v2033_v51, %s3149_s27 }
 0x3fe   : > { %v1962_v30 = vpop.permute.xlu0 %1961 }
 0x3ff   : > { %v2035_v29 = vsel %vm2026_vm7, %v2018_v11, %v1962_v30 }
 0x400   : > { %v1848_v19 = vpop.permute.xlu1 %1847  ;;  %2139 = vrot.lane.b32.xlu0 %v2035_v29, %s3149_s27 }
 0x401   : > { %v2008_v47 = vsel %vm933_vm5, %v1784_v4, %v1848_v19 }
 0x402   : > { %v1966_v40 = vpop.permute.xlu0 %1965 }
 0x403   : > { %v2037_v26 = vsel %vm2026_vm7, %v2020_v32, %v1966_v40 }
 0x404   : > { %v1912_v57 = vpop.permute.xlu1 %1911  ;;  %2143 = vrot.lane.b32.xlu0 %v2037_v26, %s3149_s27  ;;  %v490_v26 = vadd.f32 %v4209_v39, %v4191_v44 }
 0x405   : > { %v2025_v33 = vsel %vm2009_vm6, %v2008_v47, %v1912_v57 }
 0x406   : > { %v1970_v6 = vpop.permute.xlu0 %1969 }
 0x407   : > { %v2039_v21 = vsel %vm2026_vm7, %v2022_v2, %v1970_v6  ;;  %v500_v2 = vadd.f32 %v4209_v39, %v4201_v58 }
 0x408   : > { %v1956_v53 = vpop.permute.xlu1 %1955  ;;  %2147 = vrot.lane.b32.xlu0 %v2039_v21, %s3149_s27 }
 0x409   : > { %v2032_v5 = vsel %vm2026_vm7, %v2015_v43, %v1956_v53  ;;  %v510_v43 = vadd.f32 %v4209_v39, %v4217_v18 }
 0x40a   : > { %2133 = vrot.lane.b32.xlu1 %v2032_v5, %s3149_s27  ;;  %v1974_v9 = vpop.permute.xlu0 %1973 }
 0x40b   : > { %v2041_v23 = vsel %vm2026_vm7, %v2024_v56, %v1974_v9  ;;  %v495_v9 = vadd.f32 %v4188_v46, %v4209_v39 }
 0x40c   : > { %v1960_v13 = vpop.permute.xlu1 %1959  ;;  %2151 = vrot.lane.b32.xlu0 %v2041_v23, %s3149_s27  ;;  %v505_v23 = vadd.f32 %v4198_v36, %v4209_v39 }
 0x40d   : > { %v2034_v1 = vsel %vm2026_vm7, %v2017_v16, %v1960_v13 }
 0x40e   : > { %2137 = vrot.lane.b32.xlu1 %v2034_v1, %s3149_s27  ;;  %v2060_v28 = vpop.permute.xlu0 %2059 }
 0x410   : > { %v1964_v34 = vpop.permute.xlu1 %1963 }
 0x411   : > { %v2036_v52 = vsel %vm2026_vm7, %v2019_v3, %v1964_v34 }
 0x412   : > { %2141 = vrot.lane.b32.xlu1 %v2036_v52, %s3149_s27  ;;  %v2064_v59 = vpop.permute.xlu0 %2063 }
 0x414   : > { %v1968_v31 = vpop.permute.xlu1 %1967 }
 0x415   : > { %v2038_v48 = vsel %vm2026_vm7, %v2021_v63, %v1968_v31 }
 0x416   : > { %2145 = vrot.lane.b32.xlu1 %v2038_v48, %s3149_s27  ;;  %v2068_v17 = vpop.permute.xlu0 %2067 }
 0x417   : > { %v2175_v50 = vsel %vm374_vm0, %v510_v43, %v2068_v17 }
 0x418   : > { %v1972_v14 = vpop.permute.xlu1 %1971 }
 0x419   : > { %v2040_v51 = vsel %vm2026_vm7, %v2023_v25, %v1972_v14 }
 0x41a   : > { %2149 = vrot.lane.b32.xlu1 %v2040_v51, %s3149_s27  ;;  %v2072_v27 = vpop.permute.xlu0 %2071 }
 0x41b   : > { %v2177_v60 = vsel %vm374_vm0, %v4230_v12, %v2072_v27 }
 0x41c   : > { %v1976_v11 = vpop.permute.xlu1 %1975 }
 0x41d   : > { %v2042_v38 = vsel %vm2026_vm7, %v2025_v33, %v1976_v11 }
 0x41e   : > { %2153 = vrot.lane.b32.xlu1 %v2042_v38, %s3149_s27  ;;  %v2076_v35 = vpop.permute.xlu0 %2075 }
 0x41f   : > { %v2179_v8 = vsel %vm374_vm0, %v4242_v22, %v2076_v35 }
 0x420   : > { %v2062_v30 = vpop.permute.xlu1 %2061 }
 0x421   : > { %v2172_v13 = vsel %vm374_vm0, %v495_v9, %v2062_v30 }
 0x422   : > { %v2080_v29 = vpop.permute.xlu0 %2079 }
 0x423   : > { %v2181_v4 = vsel %vm374_vm0, %v4252_v41, %v2080_v29 }
 0x424   : > { %v2066_v19 = vpop.permute.xlu1 %2065 }
 0x426   : > { %v2084_v15 = vpop.permute.xlu0 %2083 }
 0x427   : > { %v2183_v32 = vsel %vm374_vm0, %v4264_v45, %v2084_v15  ;;  %v2171_v45 = vsel %vm374_vm0, %v490_v26, %v2060_v28 }
 0x428   : > { %v2070_v12 = vpop.permute.xlu1 %2069 }
 0x429   : > { %v2176_v40 = vsel %vm374_vm0, %v4215_v55, %v2070_v12 }
 0x42a   : > { %v2088_v57 = vpop.permute.xlu0 %2087 }
 0x42b   : > { %v2185_v22 = vsel %vm374_vm0, %v4274_v42, %v2088_v57  ;;  %v2173_v42 = vsel %vm374_vm0, %v500_v2, %v2064_v59 }
 0x42c   : > { %v2074_v62 = vpop.permute.xlu1 %2073 }
 0x42d   : > { %v2178_v41 = vsel %vm374_vm0, %v4226_v20, %v2074_v62 }
 0x42e   : > { %v2124_v55 = vpop.permute.xlu0 %2123 }
 0x42f   : > { %v2188_v6 = vsel %vm2187_vm8, %v2171_v45, %v2124_v55 }
 0x430   : > { %v2078_v44 = vpop.permute.xlu1 %2077  ;;  %2205 = vst.msk [vmem:[%s4391_s21] sm:$0xff] %vm2204_vm9, %v2188_v6 }
 0x431   : > { %v2180_v20 = vsel %vm374_vm0, %v4236_v61, %v2078_v44 }
 0x432   : > { %v2128_v58 = vpop.permute.xlu0 %2127 }
 0x433   : > { %v2190_v21 = vsel %vm2187_vm8, %v2173_v42, %v2128_v58 }
 0x434   : > { %v2082_v53 = vpop.permute.xlu1 %2081  ;;  %2207 = vst.msk [vmem:[%s4391_s21 + $0x10] sm:$0xff] %vm2204_vm9, %v2190_v21 }
 0x435   : > { %v2182_v5 = vsel %vm374_vm0, %v4248_v24, %v2082_v53 }
 0x436   : > { %v2132_v0 = vpop.permute.xlu0 %2131 }
 0x437   : > { %v2192_v61 = vsel %vm2187_vm8, %v2175_v50, %v2132_v0 }
 0x438   : > { %v2086_v56 = vpop.permute.xlu1 %2085  ;;  %2209 = vst.msk [vmem:[%s4391_s21 + $0x20] sm:$0xff] %vm2204_vm9, %v2192_v61 }
 0x439   : > { %v2184_v18 = vsel %vm374_vm0, %v4260_v54, %v2086_v56  ;;  %v2174_v54 = vsel %vm374_vm0, %v505_v23, %v2066_v19 }
 0x43c   : > { %v2090_v16 = vpop.permute.xlu1 %2089 }
 0x43d   : > { %v2186_v24 = vsel %vm374_vm0, %v4270_v49, %v2090_v16 }
 0x440   : > { %v2126_v1 = vpop.permute.xlu1 %2125 }
 0x441   : > { %v2189_v37 = vsel %vm2187_vm8, %v2172_v13, %v2126_v1 }
 0x442   : > { %2206 = vst.msk [vmem:[%s4391_s21 + $0x8] sm:$0xff] %vm2204_vm9, %v2189_v37 }
 0x444   : > { %v2130_v46 = vpop.permute.xlu1 %2129 }
 0x445   : > { %v2191_v28 = vsel %vm2187_vm8, %v2174_v54, %v2130_v46 }
 0x446   : > { %2208 = vst.msk [vmem:[%s4391_s21 + $0x18] sm:$0xff] %vm2204_vm9, %v2191_v28 }
 0x46e   : > { %v2136_v49 = vpop.permute.xlu0 %2135 }
 0x46f   : > { %v2194_v36 = vsel %vm2187_vm8, %v2177_v60, %v2136_v49 }
 0x470   : > { %2211 = vst.msk [vmem:[%s4391_s21 + $0x30] sm:$0xff] %vm2204_vm9, %v2194_v36 }
 0x472   : > { %v2140_v39 = vpop.permute.xlu0 %2139 }
 0x473   : > { %v2196_v3 = vsel %vm2187_vm8, %v2179_v8, %v2140_v39 }
 0x474   : > { %2213 = vst.msk [vmem:[%s4391_s21 + $0x40] sm:$0xff] %vm2204_vm9, %v2196_v3 }
 0x476   : > { %v2144_v34 = vpop.permute.xlu0 %2143 }
 0x477   : > { %v2198_v52 = vsel %vm2187_vm8, %v2181_v4, %v2144_v34 }
 0x478   : > { %2215 = vst.msk [vmem:[%s4391_s21 + $0x50] sm:$0xff] %vm2204_vm9, %v2198_v52 }
 0x47a   : > { %v2148_v10 = vpop.permute.xlu0 %2147 }
 0x47b   : > { %v2200_v59 = vsel %vm2187_vm8, %v2183_v32, %v2148_v10 }
 0x47c   : > { %v2134_v63 = vpop.permute.xlu1 %2133  ;;  %2217 = vst.msk [vmem:[%s4391_s21 + $0x60] sm:$0xff] %vm2204_vm9, %v2200_v59 }
 0x47d   : > { %v2193_v31 = vsel %vm2187_vm8, %v2176_v40, %v2134_v63 }
 0x47e   : > { %2210 = vst.msk [vmem:[%s4391_s21 + $0x28] sm:$0xff] %vm2204_vm9, %v2193_v31  ;;  %v2152_v48 = vpop.permute.xlu0 %2151 }
 0x47f   : > { %v2202_v7 = vsel %vm2187_vm8, %v2185_v22, %v2152_v48 }
 0x480   : > { %v2138_v17 = vpop.permute.xlu1 %2137  ;;  %2219 = vst.msk [vmem:[%s4391_s21 + $0x70] sm:$0xff] %vm2204_vm9, %v2202_v7 }
 0x481   : > { %v2195_v25 = vsel %vm2187_vm8, %v2178_v41, %v2138_v17 }
 0x482   : > { %2212 = vst.msk [vmem:[%s4391_s21 + $0x38] sm:$0xff] %vm2204_vm9, %v2195_v25 }
 0x484   : > { %v2142_v14 = vpop.permute.xlu1 %2141 }
 0x485   : > { %v2197_v51 = vsel %vm2187_vm8, %v2180_v20, %v2142_v14 }
 0x486   : > { %2214 = vst.msk [vmem:[%s4391_s21 + $0x48] sm:$0xff] %vm2204_vm9, %v2197_v51 }
 0x488   : > { %v2146_v47 = vpop.permute.xlu1 %2145 }
 0x489   : > { %v2199_v27 = vsel %vm2187_vm8, %v2182_v5, %v2146_v47 }
 0x48a   : > { %2216 = vst.msk [vmem:[%s4391_s21 + $0x58] sm:$0xff] %vm2204_vm9, %v2199_v27 }
 0x48c   : > { %v2150_v33 = vpop.permute.xlu1 %2149  ;;  %2227 = sbr.rel (!%p3210_p4) target bundleno = 1220 (0x4c4), region = 48 }
 0x48d   : > { %v2201_v60 = vsel %vm2187_vm8, %v2184_v18, %v2150_v33 }
 0x48e   : > { %2218 = vst.msk [vmem:[%s4391_s21 + $0x68] sm:$0xff] %vm2204_vm9, %v2201_v60 }
 0x490   : > { %v2154_v11 = vpop.permute.xlu1 %2153 }
 0x491   : > { %v2203_v38 = vsel %vm2187_vm8, %v2186_v24, %v2154_v11 }
 0x492   : > { %2220 = vst.msk [vmem:[%s4391_s21 + $0x78] sm:$0xff] %vm2204_vm9, %v2203_v38 }
 0x493   : > { %s4729_s8 = smov (!%p2230_p8, %s2229_s8), 16 }
 0x494   : > { %s2553_s14 = sshll.u32 %s4729_s8, 7 }
 0x495   : > { %p2556_p9 = scmp.eq.s32.totalorder %s2553_s14, 0 }
 0x496   : > { %s4471_s15 = sshrl.u32 (!%p2556_p9), %s4729_s8, 4 }
 0x497   : > { %2238 = sbr.rel (%p2556_p9) target bundleno = 1220 (0x4c4), region = 52  ;;  %p2557_p10 = scmp.le.s32.totalorder (!%p2556_p9), %s4471_s15, 0 }
 0x49e   : > { %2458 = sbr.rel (%p2557_p10) target bundleno = 1199 (0x4af), region = 131  ;;  %s4722_s24 = smov (!%p2557_p10), %s4465_s13 }
 0x49f   : > { %s4723_s29 = smov (!%p2557_p10), %s4391_s21  ;;  %s4480_s12 = smov (!%p2557_p10), 0  }
 0x4a0   : > { %s4482_s16 = smov (!%p2557_p10), 0  }
 0x4a5 LB: >> { %v2330_v35 = vld [vmem:[%s3118_s29] sm:$0xff]  ;;  %v2332_v8 = vld [vmem:[%s3118_s29 + $0x8] sm:$0xff]  ;;  %v2334_v30 = vld [vmem:[%s3118_s29 + $0x10] sm:$0xff]  ;;  %s2362_s17 = sadd.s32 1, %s3122_s12  ;;  %s2324_s16 = sadd.s32 1, %s3126_s16   ;;  %s3126_s16 = sphi %s4482_s16, %s2324_s16   ;;  %s3122_s12 = sphi %s4480_s12, %s4724_s12   ;;  %s3118_s29 = sphi %s4723_s29, %s2367_s29   ;;  %s3114_s24 = sphi %s4722_s24, %s2368_s24  }
 0x4a6   : >> { %2331 = vst [vmem:[%s3114_s24] sm:$0xff] %v2330_v35  ;;  %2333 = vst [vmem:[%s3114_s24 + $0x8] sm:$0xff] %v2332_v8  ;;  %v2336_v29 = vld [vmem:[%s3118_s29 + $0x18] sm:$0xff]  ;;  %v2338_v4 = vld [vmem:[%s3118_s29 + $0x20] sm:$0xff]  ;;  %p2363_p11 = scmp.ge.s32.totalorder %s2362_s17, %s4471_s15  ;;  %p2323_p12 = scmp.ge.s32.totalorder %s2324_s16, %s4471_s15 }
 0x4a7   : >> { %2335 = vst [vmem:[%s3114_s24 + $0x10] sm:$0xff] %v2334_v30  ;;  %v2340_v19 = vld [vmem:[%s3118_s29 + $0x28] sm:$0xff]  ;;  %2337 = vst [vmem:[%s3114_s24 + $0x18] sm:$0xff] %v2336_v29  ;;  %v2342_v15 = vld [vmem:[%s3118_s29 + $0x30] sm:$0xff] }
 0x4a8   : >> { %2339 = vst [vmem:[%s3114_s24 + $0x20] sm:$0xff] %v2338_v4  ;;  %2341 = vst [vmem:[%s3114_s24 + $0x28] sm:$0xff] %v2340_v19  ;;  %v2344_v32 = vld [vmem:[%s3118_s29 + $0x38] sm:$0xff]  ;;  %v2346_v12 = vld [vmem:[%s3118_s29 + $0x40] sm:$0xff]  ;;  %s4731_s17 = smov (%p2363_p11, %s2362_s17), 0  ;;  %2326 = sbr.rel (!%p2323_p12) target bundleno = 1189 (0x4a5), region = 137 }
 0x4a9   : >> { %2343 = vst [vmem:[%s3114_s24 + $0x30] sm:$0xff] %v2342_v15  ;;  %2345 = vst [vmem:[%s3114_s24 + $0x38] sm:$0xff] %v2344_v32  ;;  %v2348_v40 = vld [vmem:[%s3118_s29 + $0x48] sm:$0xff]  ;;  %v2350_v26 = vld [vmem:[%s3118_s29 + $0x50] sm:$0xff]  ;;  %s2558_s18 = sshll.u32 %s4731_s17, 7  ;;  %s4724_s12 = smov %s4731_s17 }
 0x4aa   : >> { %2347 = vst [vmem:[%s3114_s24 + $0x40] sm:$0xff] %v2346_v12  ;;  %v2352_v57 = vld [vmem:[%s3118_s29 + $0x58] sm:$0xff]  ;;  %2349 = vst [vmem:[%s3114_s24 + $0x48] sm:$0xff] %v2348_v40  ;;  %v2354_v22 = vld [vmem:[%s3118_s29 + $0x60] sm:$0xff] }
 0x4ab   : >> { %2351 = vst [vmem:[%s3114_s24 + $0x50] sm:$0xff] %v2350_v26  ;;  %2353 = vst [vmem:[%s3114_s24 + $0x58] sm:$0xff] %v2352_v57  ;;  %v2356_v62 = vld [vmem:[%s3118_s29 + $0x68] sm:$0xff]  ;;  %v2358_v41 = vld [vmem:[%s3118_s29 + $0x70] sm:$0xff] }
 0x4ac   : >> { %2355 = vst [vmem:[%s3114_s24 + $0x60] sm:$0xff] %v2354_v22  ;;  %2357 = vst [vmem:[%s3114_s24 + $0x68] sm:$0xff] %v2356_v62  ;;  %v2360_v45 = vld [vmem:[%s3118_s29 + $0x78] sm:$0xff]  ;;  %s2367_s29 = scalar_lea.vmem %s4391_s21, %s2558_s18 [#allocation2]  }
 0x4ad   : >> { %2359 = vst [vmem:[%s3114_s24 + $0x70] sm:$0xff] %v2358_v41  ;;  %2361 = vst [vmem:[%s3114_s24 + $0x78] sm:$0xff] %v2360_v45  ;;  %s2368_s24 = scalar_lea.vmem %s4465_s13, %s2558_s18  }
 0x4af PF: > { %s4540_s20 = sand.u32 15, %s4729_s8   ;;  %s2569_s19 = sshll.u32 %s4471_s15, 7 }
 0x4b0   : > { %s2373_s23 = scalar_lea.vmem %s4391_s21, %s2569_s19 [#allocation2]   ;;  %s2375_s26 = scalar_lea.vmem %s4465_s13, %s2569_s19  }
 0x4b1   : > { %p2563_p13 = scmp.le.s32.totalorder %s4540_s20, 0 }
 0x4b2   : > { %s3128_s27 = smov (!%p2563_p13), %s2375_s26   ;;  %s3132_s30 = smov (!%p2563_p13), %s2373_s23  }
 0x4b3   : > { %2472 = sbr.rel (%p2563_p13) target bundleno = 1220 (0x4c4), region = 142  ;;  %s3136_s7 = smov (!%p2563_p13), 0  }
 0x4b4   : > { %s3140_s9 = smov (!%p2563_p13), 0  }
 0x4ba LB: >> { %v2385_v2 = vld [vmem:[%s3134_s30] sm:$0xff]  ;;  %s2387_s8 = sadd.s32 1, %s3138_s7  ;;  %s2379_s9 = sadd.s32 1, %s3142_s9   ;;  %s3142_s9 = sphi %s3140_s9, %s2379_s9   ;;  %s3138_s7 = sphi %s3136_s7, %s3137_s7   ;;  %s3134_s30 = sphi %s3132_s30, %s2392_s30   ;;  %s3130_s27 = sphi %s3128_s27, %s2393_s27  }
 0x4bb   : >> { %2386 = vst [vmem:[%s3130_s27] sm:$0xff] %v2385_v2  ;;  %p2388_p0 = scmp.ge.s32.totalorder %s2387_s8, %s4540_s20  ;;  %p2378_p1 = scmp.ge.s32.totalorder %s2379_s9, %s4540_s20 }
 0x4bd   : >> { %s4733_s8 = smov (%p2388_p0, %s2387_s8), 0  ;;  %2381 = sbr.rel (!%p2378_p1) target bundleno = 1210 (0x4ba), region = 148 }
 0x4be   : >> { %s2564_s21 = sshll.u32 %s4733_s8, 3  ;;  %s3137_s7 = smov %s4733_s8  }
 0x4bf   : >> { %s2392_s30 = scalar_lea.vmem %s2373_s23, %s2564_s21 [#allocation2]   ;;  %s2393_s27 = scalar_lea.vmem %s2375_s26, %s2564_s21  }
 0x4c4 PF: > { %p13_p2 = scmp.ge.s32.totalorder %s3200_s25, 4   ;;  %s4725_s21 = smov %s3106_s22 }
 0x4c5   : > { %s4726_s22 = smov %s3208_s28  ;;  %s4727_s23 = smov %s3200_s25 }
 0x4c6   :  { %15 = sbr.rel (!%p13_p2) target bundleno = 2 (0x2), region = 159 }

// kernel: deformable_transformer_encoder.5
= control target key start
LH: loop header
LB: loop body
LE: loop exit
PB: predicated region body
PF: predicated region fallthrough
CT: control target
= control target key end

     0   :  { %s3522_s25 = smov 0   ;;  %s4003_s0 = inlined_call_operand.vmem [shape: f32[2,4,80,80], index: 0, kind: input, shape index: {}]   ;;  %s4004_s1 = inlined_call_operand.vmem [shape: f32[2,80,32], index: 1, kind: input, shape index: {}]   ;;  %s4005_s2 = inlined_call_operand.vmem [shape: f32[2,80,32], index: 2, kind: input, shape index: {}]   ;;  %s4006_s3 = inlined_call_operand.vmem [shape: f32[32,32], index: 3, kind: input, shape index: {}]   ;;  %s4007_s4 = inlined_call_operand.vmem [shape: f32[1,32], index: 4, kind: input, shape index: {}]   ;;  %s4008_s5 = inlined_call_operand.vmem [shape: f32[1,32], index: 5, kind: input, shape index: {}]   ;;  %s4009_s6 = inlined_call_operand.vmem [shape: f32[1,32], index: 6, kind: input, shape index: {}]   ;;  %s4010_s7 = inlined_call_operand.vmem [shape: f32[32,64], index: 7, kind: input, shape index: {}]   ;;  %s4011_s8 = inlined_call_operand.vmem [shape: f32[1,64], index: 8, kind: input, shape index: {}]   ;;  %s4012_s9 = inlined_call_operand.vmem [shape: f32[64,32], index: 9, kind: input, shape index: {}]   ;;  %s4013_s10 = inlined_call_operand.vmem [shape: f32[1,32], index: 10, kind: input, shape index: {}]   ;;  %s4014_s11 = inlined_call_operand.vmem [shape: f32[1,32], index: 11, kind: input, shape index: {}]   ;;  %s4015_s12 = inlined_call_operand.vmem [shape: f32[1,32], index: 12, kind: input, shape index: {}]   ;;  %s4016_s13 = inlined_call_operand.vmem [shape: f32[2,80,32], index: 13, kind: output, shape index: {}]  }
   0x1 LB: > { %s2613_s26 = sadd.s32 4294967295, %s3447_s25   ;;  %p2617_p0 = scmp.ge.s32.totalorder %s3447_s25, 1  ;;  %s3447_s25 = sphi %s3522_s25, %s23_s25  }
   0x2   : > { %p407_p1 = scmp.lt.s32.totalorder %s3447_s25, 3 }
   0x4   : > { %p408_p2 = pnand %p2617_p0, %p407_p1 }
   0x5   : > { %p461_p3 = scmp.lt.s32.totalorder (!%p408_p2), %s2613_s26, 1  ;;  %s3449_s14 = smov (!%p408_p2), 120   ;;  %vm511_vm0 = vcmask (!%p408_p2), 654336   ;;  %v854_v31 = vld [vmem:[%s4006_s3 + $0x8] sm:$0xff] (!%p408_p2)  ;;  %vm855_vm1 = vcmask (!%p408_p2), 64512   ;;  %vm1857_vm2 = vcmask (!%p408_p2), 261120  }
   0x6   : > { %411 = sbr.rel (%p408_p2) target bundleno = 1730 (0x6c2), region = 72  ;;  %s3450_s19 = smov (!%p408_p2), 112   ;;  %vm2204_vm3 = vcmask (!%p408_p2), 523264  }
   0x7   : > { %s3451_s20 = smov (!%p408_p2), 104  }
   0xd   : > { %s4018_s26 = smov (!%p461_p3, %s2613_s26), 1 }
   0xe   : > { %s3530_s27 = smul.u32 80, %s4018_s26 }
   0xf   : > { %s3313_s15 = smul.u32 320, %s4018_s26 }
  0x10   : > { %s470_s30 = scalar_lea.vmem %s4004_s1, %s3530_s27  ;;  %s3677_s16 = scalar_lea.vmem %s4005_s2, %s3530_s27 }
  0x11   : > { %v491_v0 = vld [vmem:[%s470_s30] sm:$0xff]  ;;  %v492_v1 = vld [vmem:[%s470_s30 + $0x8] sm:$0xff]  ;;  %v493_v2 = vld [vmem:[%s470_s30 + $0x10] sm:$0xff]  ;;  %s3539_s18 = scalar_lea.vmem %s4003_s0, %s3313_s15  ;;  %s3970_s29 = scalar_lea.vmem %s4016_s13, %s3530_s27 }
  0x12   : > { %v3326_v3 = vpack.i.bf16 %v492_v1, %v491_v0  ;;  %v494_v4 = vld [vmem:[%s470_s30 + $0x18] sm:$0xff]  ;;  %v495_v5 = vld [vmem:[%s470_s30 + $0x20] sm:$0xff]  ;;  %v496_v6 = vld [vmem:[%s470_s30 + $0x28] sm:$0xff]  ;;  %v3179_v15 = vpack.c.bf16 %v492_v1, %v491_v0 }
  0x13   : > { %v3336_v7 = vpack.i.bf16 %v496_v6, %v495_v5  ;;  %v497_v8 = vld [vmem:[%s470_s30 + $0x30] sm:$0xff]  ;;  %v498_v9 = vld [vmem:[%s470_s30 + $0x38] sm:$0xff]  ;;  %v3331_v10 = vpack.i.bf16 %v494_v4, %v493_v2  ;;  %v499_v12 = vld [vmem:[%s470_s30 + $0x40] sm:$0xff]  ;;  %v3183_v17 = vpack.c.bf16 %v494_v4, %v493_v2  ;;  %v3187_v18 = vpack.c.bf16 %v496_v6, %v495_v5 }
  0x14   : > { %3327 = vrot.lane.b32.xlu0 %v3326_v3, %s3449_s14  ;;  %v3341_v11 = vpack.i.bf16 %v498_v9, %v497_v8  ;;  %v500_v13 = vld [vmem:[%s470_s30 + $0x48] sm:$0xff]  ;;  %v2632_v16 = vld [vmem:[%s3539_s18 + $0x50] sm:$0xff]  ;;  %3180 = vmatprep.subr.bf16.mxu0 %v3179_v15  ;;  %v3191_v19 = vpack.c.bf16 %v498_v9, %v497_v8  ;;  %v501_v21 = vld [vmem:[%s3539_s18] sm:$0xff] }
  0x15   : > { %3337 = vrot.lane.b32.xlu1 %v3336_v7, %s3449_s14  ;;  %v3346_v14 = vpack.i.bf16 %v500_v13, %v499_v12  ;;  %2972 = vmatprep.mubr.msk.f32.mxu1 %vm511_vm0, %v2632_v16  ;;  %v3195_v20 = vpack.c.bf16 %v500_v13, %v499_v12  ;;  %v502_v22 = vld [vmem:[%s3539_s18 + $0x8] sm:$0xff]  ;;  %v503_v23 = vld [vmem:[%s3539_s18 + $0x10] sm:$0xff]  ;;  %v504_v24 = vld [vmem:[%s3539_s18 + $0x18] sm:$0xff] }
  0x16   : > { %3182 = vmatpush3.bf16.msra.mxu0 %v3179_v15  ;;  %2937 = vmatprep.mubr.msk.f32.mxu0 %vm511_vm0, %v501_v21  ;;  %v505_v25 = vld [vmem:[%s3539_s18 + $0x20] sm:$0xff]  ;;  %v506_v26 = vld [vmem:[%s3539_s18 + $0x28] sm:$0xff]  ;;  %v507_v27 = vld [vmem:[%s3539_s18 + $0x30] sm:$0xff] }
  0x17   : > { %3184 = vmatprep.subr.bf16.mxu0 %v3183_v17  ;;  %v508_v28 = vld [vmem:[%s3539_s18 + $0x38] sm:$0xff]  ;;  %v509_v29 = vld [vmem:[%s3539_s18 + $0x40] sm:$0xff]  ;;  %v510_v30 = vld [vmem:[%s3539_s18 + $0x48] sm:$0xff] }
  0x18   : > { %3332 = vrot.lane.b32.xlu0 %v3331_v10, %s3449_s14  ;;  %v2633_v60 = vld [vmem:[%s3539_s18 + $0x58] sm:$0xff]  ;;  %v2634_v61 = vld [vmem:[%s3539_s18 + $0x60] sm:$0xff]  ;;  %v2635_v2 = vld [vmem:[%s3539_s18 + $0x68] sm:$0xff] }
  0x19   : > { %3342 = vrot.lane.b32.xlu1 %v3341_v11, %s3449_s14  ;;  %v2637_v8 = vld [vmem:[%s3539_s18 + $0x78] sm:$0xff]  ;;  %v2638_v9 = vld [vmem:[%s3539_s18 + $0x80] sm:$0xff]  ;;  %v2640_v15 = vld [vmem:[%s3539_s18 + $0x90] sm:$0xff] }
  0x1a   : > { %3186 = vmatpush3.bf16.msra.mxu0 %v3183_v17 }
  0x1b   : > { %3188 = vmatprep.subr.bf16.mxu0 %v3187_v18 }
  0x1c   : > { %3347 = vrot.lane.b32.xlu0 %v3346_v14, %s3449_s14 }
  0x1d   : > { %3352 = vrot.lane.b32.xlu1 %v3326_v3, %s3450_s19 }
  0x1e   : > { %3190 = vmatpush3.bf16.msra.mxu0 %v3187_v18 }
  0x1f   : > { %3192 = vmatprep.subr.bf16.mxu0 %v3191_v19 }
  0x20   : > { %3357 = vrot.lane.b32.xlu0 %v3331_v10, %s3450_s19 }
  0x21   : > { %3362 = vrot.lane.b32.xlu1 %v3336_v7, %s3450_s19 }
  0x22   : > { %3194 = vmatpush3.bf16.msra.mxu0 %v3191_v19 }
  0x23   : > { %3196 = vmatprep.subr.bf16.mxu0 %v3195_v20 }
  0x24   : > { %3367 = vrot.lane.b32.xlu0 %v3341_v11, %s3450_s19 }
  0x25   : > { %3372 = vrot.lane.b32.xlu1 %v3346_v14, %s3450_s19 }
  0x26   : > { %3198 = vmatpush3.bf16.msra.mxu0 %v3195_v20  ;;  %v2641_v20 = vld [vmem:[%s3539_s18 + $0x98] sm:$0xff] }
  0x27   : > { %2987 = vmatprep.subr.mxu0 %v854_v31 }
  0x28   : > { %3377 = vrot.lane.b32.xlu0 %v3326_v3, %s3451_s20  ;;  %v2636_v3 = vld [vmem:[%s3539_s18 + $0x70] sm:$0xff] }
  0x29   : > { %3382 = vrot.lane.b32.xlu1 %v3331_v10, %s3451_s20  ;;  %2938 = vmatmul.mubr.msk.f32.vlgmr.msra.gmra.mrb[0].mxu0 %vm511_vm0, %v502_v22 }
  0x2a   : > { %2940 = vmatprep.mubr.msk.f32.mxu0 %vm511_vm0, %v503_v23  ;;  %2988 = vmatpush3.msra.mxu0 %v854_v31 }
  0x2c   : > { %3387 = vrot.lane.b32.xlu0 %v3336_v7, %s3451_s20 }
  0x2d   : > { %3392 = vrot.lane.b32.xlu1 %v3341_v11, %s3451_s20  ;;  %2941 = vmatmul.mubr.msk.f32.gmra.mrb[2].mxu0 %vm511_vm0, %v504_v24  ;;  %v2672_v24 = vld [vmem:[%s3539_s18 + $0xa0] sm:$0xff] }
  0x2e   : > { %2943 = vmatprep.mubr.msk.f32.mxu0 %vm511_vm0, %v505_v25 }
  0x30   : > { %3397 = vrot.lane.b32.xlu0 %v3346_v14, %s3451_s20  ;;  %v2639_v14 = vld [vmem:[%s3539_s18 + $0x88] sm:$0xff] }
  0x31   : > { %2944 = vmatmul.mubr.msk.f32.gmra.mrb[4].mxu0 %vm511_vm0, %v506_v26  ;;  %v2673_v26 = vld [vmem:[%s3539_s18 + $0xa8] sm:$0xff] }
  0x32   : > { %2946 = vmatprep.mubr.msk.f32.mxu0 %vm511_vm0, %v507_v27 }
  0x35   : > { %2947 = vmatmul.mubr.msk.f32.gmra.mrb[6].mxu0 %vm511_vm0, %v508_v28 }
  0x36   : > { %2949 = vmatprep.mubr.msk.f32.mxu0 %vm511_vm0, %v509_v29 }
  0x39   : > { %2950 = vmatmul.mubr.msk.f32.gmra.mrb[8].mxu0 %vm511_vm0, %v510_v30  ;;  %v2674_v30 = vld [vmem:[%s3539_s18 + $0xb0] sm:$0xff] }
  0x86   : > { %v3328_v32 = vpop.permute.xlu0 %3327 }
  0x87   : > { %v3330_v33 = vunpack.i.h.bf16 %v3328_v32  ;;  %v3329_v34 = vunpack.i.l.bf16 %v3328_v32  ;;  %v3338_v35 = vpop.permute.xlu1 %3337  ;;  %v2675_v32 = vld [vmem:[%s3539_s18 + $0xb8] sm:$0xff] }
  0x88   : > { %v3340_v37 = vunpack.i.h.bf16 %v3338_v35  ;;  %v3339_v38 = vunpack.i.l.bf16 %v3338_v35 }
  0x89   : > { %v3199_v36 = vpack.c.bf16 %v3330_v33, %v3329_v34 }
  0x8a   : > { %v3333_v39 = vpop.permute.xlu0 %3332  ;;  %v3207_v44 = vpack.c.bf16 %v3340_v37, %v3339_v38  ;;  %v2677_v38 = vld [vmem:[%s3539_s18 + $0xc8] sm:$0xff] }
  0x8b   : > { %v3335_v40 = vunpack.i.h.bf16 %v3333_v39  ;;  %v3334_v41 = vunpack.i.l.bf16 %v3333_v39  ;;  %3200 = vmatprep.subr.bf16.mxu1 %v3199_v36  ;;  %v3343_v42 = vpop.permute.xlu1 %3342 }
  0x8c   : > { %3202 = vmatpush3.bf16.msra.mxu1 %v3199_v36  ;;  %v3345_v45 = vunpack.i.h.bf16 %v3343_v42  ;;  %v3344_v46 = vunpack.i.l.bf16 %v3343_v42  ;;  %v2676_v36 = vld [vmem:[%s3539_s18 + $0xc0] sm:$0xff]  ;;  %v2678_v42 = vld [vmem:[%s3539_s18 + $0xd0] sm:$0xff] }
  0x8d   : > { %v3203_v43 = vpack.c.bf16 %v3335_v40, %v3334_v41 }
  0x8e   : > { %v3348_v47 = vpop.permute.xlu0 %3347  ;;  %v3211_v48 = vpack.c.bf16 %v3345_v45, %v3344_v46  ;;  %v2680_v45 = vld [vmem:[%s3539_s18 + $0xe0] sm:$0xff]  ;;  %v2681_v46 = vld [vmem:[%s3539_s18 + $0xe8] sm:$0xff] }
  0x8f   : > { %3204 = vmatprep.subr.bf16.mxu1 %v3203_v43  ;;  %v3350_v49 = vunpack.i.h.bf16 %v3348_v47  ;;  %v3349_v50 = vunpack.i.l.bf16 %v3348_v47  ;;  %v3353_v51 = vpop.permute.xlu1 %3352  ;;  %v2702_v47 = vld [vmem:[%s3539_s18 + $0xf0] sm:$0xff] }
  0x90   : > { %3206 = vmatpush3.bf16.msra.mxu1 %v3203_v43  ;;  %v3355_v53 = vunpack.i.h.bf16 %v3353_v51  ;;  %v3354_v54 = vunpack.i.l.bf16 %v3353_v51  ;;  %v2679_v43 = vld [vmem:[%s3539_s18 + $0xd8] sm:$0xff]  ;;  %v2706_v51 = vld [vmem:[%s3539_s18 + $0x110] sm:$0xff] }
  0x91   : > { %3208 = vmatprep.subr.bf16.mxu1 %v3207_v44  ;;  %v3215_v52 = vpack.c.bf16 %v3350_v49, %v3349_v50  ;;  %v2704_v49 = vld [vmem:[%s3539_s18 + $0x100] sm:$0xff]  ;;  %v2705_v50 = vld [vmem:[%s3539_s18 + $0x108] sm:$0xff] }
  0x92   : > { %v3358_v55 = vpop.permute.xlu0 %3357  ;;  %v3219_v56 = vpack.c.bf16 %v3355_v53, %v3354_v54  ;;  %v2708_v53 = vld [vmem:[%s3539_s18 + $0x120] sm:$0xff]  ;;  %v2709_v54 = vld [vmem:[%s3539_s18 + $0x128] sm:$0xff] }
  0x93   : > { %v3360_v57 = vunpack.i.h.bf16 %v3358_v55  ;;  %v3359_v58 = vunpack.i.l.bf16 %v3358_v55  ;;  %v3363_v59 = vpop.permute.xlu1 %3362  ;;  %v2710_v55 = vld [vmem:[%s3539_s18 + $0x130] sm:$0xff] }
  0x94   : > { %3210 = vmatpush3.bf16.msra.mxu1 %v3207_v44  ;;  %v3365_v63 = vunpack.i.h.bf16 %v3363_v59  ;;  %v3364_v0 = vunpack.i.l.bf16 %v3363_v59 }
  0x95   : > { %3212 = vmatprep.subr.bf16.mxu1 %v3211_v48  ;;  %v3223_v62 = vpack.c.bf16 %v3360_v57, %v3359_v58  ;;  %v657_v57 = vld [vmem:[%s4006_s3] sm:$0xff] }
  0x96   : > { %v3368_v1 = vpop.permute.xlu0 %3367  ;;  %v3227_v4 = vpack.c.bf16 %v3365_v63, %v3364_v0  ;;  %3004 = vmatprep.subr.mxu0 %v657_v57 }
  0x97   : > { %v3370_v5 = vunpack.i.h.bf16 %v3368_v1  ;;  %v3369_v6 = vunpack.i.l.bf16 %v3368_v1  ;;  %v3373_v7 = vpop.permute.xlu1 %3372 }
  0x98   : > { %3214 = vmatpush3.bf16.msra.mxu1 %v3211_v48  ;;  %v3375_v11 = vunpack.i.h.bf16 %v3373_v7  ;;  %v3374_v12 = vunpack.i.l.bf16 %v3373_v7  ;;  %v2703_v48 = vld [vmem:[%s3539_s18 + $0xf8] sm:$0xff] }
  0x99   : > { %3216 = vmatprep.subr.bf16.mxu1 %v3215_v52  ;;  %v3231_v10 = vpack.c.bf16 %v3370_v5, %v3369_v6  ;;  %v1332_v6 = vld [vmem:[%s4006_s3 + $0x10] sm:$0xff] }
  0x9a   : > { %v3378_v13 = vpop.permute.xlu0 %3377  ;;  %v3235_v16 = vpack.c.bf16 %v3375_v11, %v3374_v12 }
  0x9b   : > { %v3380_v17 = vunpack.i.h.bf16 %v3378_v13  ;;  %v3379_v18 = vunpack.i.l.bf16 %v3378_v13  ;;  %v3383_v19 = vpop.permute.xlu1 %3382 }
  0x9c   : > { %3218 = vmatpush3.bf16.msra.mxu1 %v3215_v52  ;;  %v3385_v22 = vunpack.i.h.bf16 %v3383_v19  ;;  %v3384_v23 = vunpack.i.l.bf16 %v3383_v19  ;;  %v2707_v52 = vld [vmem:[%s3539_s18 + $0x118] sm:$0xff] }
  0x9d   : > { %3220 = vmatprep.subr.bf16.mxu1 %v3219_v56  ;;  %v3239_v21 = vpack.c.bf16 %v3380_v17, %v3379_v18  ;;  %v1674_v17 = vld [vmem:[%s4006_s3 + $0x18] sm:$0xff] }
  0x9e   : > { %v3388_v25 = vpop.permute.xlu0 %3387  ;;  %v3243_v27 = vpack.c.bf16 %v3385_v22, %v3384_v23 }
  0x9f   : > { %2973 = vmatmul.mubr.msk.f32.vlgmr.msra.gmra.mrb[0].mxu1 %vm511_vm0, %v2633_v60  ;;  %v3390_v28 = vunpack.i.h.bf16 %v3388_v25  ;;  %v3389_v29 = vunpack.i.l.bf16 %v3388_v25  ;;  %v3393_v31 = vpop.permute.xlu1 %3392 }
  0xa0   : > { %2975 = vmatprep.mubr.msk.f32.mxu1 %vm511_vm0, %v2634_v61  ;;  %3222 = vmatpush3.bf16.msra.mxu1 %v3219_v56  ;;  %v3395_v34 = vunpack.i.h.bf16 %v3393_v31  ;;  %v3394_v35 = vunpack.i.l.bf16 %v3393_v31  ;;  %v2711_v56 = vld [vmem:[%s3539_s18 + $0x138] sm:$0xff] }
  0xa1   : > { %3224 = vmatprep.subr.bf16.mxu1 %v3223_v62  ;;  %v3247_v33 = vpack.c.bf16 %v3390_v28, %v3389_v29 }
  0xa2   : > { %v3398_v37 = vpop.permute.xlu0 %3397  ;;  %v3251_v39 = vpack.c.bf16 %v3395_v34, %v3394_v35 }
  0xa3   : > { %2976 = vmatmul.mubr.msk.f32.gmra.mrb[2].mxu1 %vm511_vm0, %v2635_v2  ;;  %v3400_v40 = vunpack.i.h.bf16 %v3398_v37  ;;  %v3399_v41 = vunpack.i.l.bf16 %v3398_v37 }
  0xa4   : > { %2978 = vmatprep.mubr.msk.f32.mxu1 %vm511_vm0, %v2636_v3  ;;  %3226 = vmatpush3.bf16.msra.mxu1 %v3223_v62 }
  0xa5   : > { %3228 = vmatprep.subr.bf16.mxu1 %v3227_v4  ;;  %v3255_v44 = vpack.c.bf16 %v3400_v40, %v3399_v41  ;;  %v481_v41 = vld [vmem:[%s3677_s16] sm:$0xff] }
  0xa7   : > { %2979 = vmatmul.mubr.msk.f32.gmra.mrb[4].mxu1 %vm511_vm0, %v2637_v8 }
  0xa8   : > { %2981 = vmatprep.mubr.msk.f32.mxu1 %vm511_vm0, %v2638_v9  ;;  %3230 = vmatpush3.bf16.msra.mxu1 %v3227_v4 }
  0xa9   : > { %3232 = vmatprep.subr.bf16.mxu1 %v3231_v10 }
  0xab   : > { %2982 = vmatmul.mubr.msk.f32.gmra.mrb[6].mxu1 %vm511_vm0, %v2639_v14 }
  0xac   : > { %2984 = vmatprep.mubr.msk.f32.mxu1 %vm511_vm0, %v2640_v15  ;;  %3234 = vmatpush3.bf16.msra.mxu1 %v3231_v10 }
  0xad   : > { %3236 = vmatprep.subr.bf16.mxu1 %v3235_v16 }
  0xaf   : > { %2985 = vmatmul.mubr.msk.f32.gmra.mrb[8].mxu1 %vm511_vm0, %v2641_v20 }
  0xb0   : > { %3238 = vmatpush3.bf16.msra.mxu1 %v3235_v16  ;;  %3041 = vmatprep.mubr.msk.f32.mxu1 %vm511_vm0, %v2672_v24 }
  0xb1   : > { %3240 = vmatprep.subr.bf16.mxu1 %v3239_v21 }
  0xb3   : > { %3042 = vmatmul.mubr.msk.f32.vlgmr.msra.gmra.mrb[10].mxu1 %vm511_vm0, %v2673_v26 }
  0xb4   : > { %3242 = vmatpush3.bf16.msra.mxu1 %v3239_v21  ;;  %3044 = vmatprep.mubr.msk.f32.mxu1 %vm511_vm0, %v2674_v30 }
  0xb5   : > { %3244 = vmatprep.subr.bf16.mxu1 %v3243_v27 }
  0xb7   : > { %3045 = vmatmul.mubr.msk.f32.gmra.mrb[12].mxu1 %vm511_vm0, %v2675_v32 }
  0xb8   : > { %3246 = vmatpush3.bf16.msra.mxu1 %v3243_v27  ;;  %3047 = vmatprep.mubr.msk.f32.mxu1 %vm511_vm0, %v2676_v36  ;;  %v2732_v36 = vld [vmem:[%s4007_s4] ss:$0 sm:$0xff] }
  0xb9   : > { %3248 = vmatprep.subr.bf16.mxu1 %v3247_v33 }
  0xbb   : > { %3048 = vmatmul.mubr.msk.f32.gmra.mrb[14].mxu1 %vm511_vm0, %v2677_v38  ;;  %v482_v38 = vld [vmem:[%s3677_s16 + $0x8] sm:$0xff] }
  0xbc   : > { %3250 = vmatpush3.bf16.msra.mxu1 %v3247_v33  ;;  %3050 = vmatprep.mubr.msk.f32.mxu1 %vm511_vm0, %v2678_v42 }
  0xbd   : > { %3252 = vmatprep.subr.bf16.mxu1 %v3251_v39 }
  0xbf   : > { %3051 = vmatmul.mubr.msk.f32.gmra.mrb[16].mxu1 %vm511_vm0, %v2679_v43 }
  0xc0   : > { %3254 = vmatpush3.bf16.msra.mxu1 %v3251_v39  ;;  %3053 = vmatprep.mubr.msk.f32.mxu1 %vm511_vm0, %v2680_v45 }
  0xc1   : > { %3256 = vmatprep.subr.bf16.mxu1 %v3255_v44 }
  0xc3   : > { %3054 = vmatmul.mubr.msk.f32.gmra.mrb[18].mxu1 %vm511_vm0, %v2681_v46  ;;  %v484_v46 = vld [vmem:[%s3677_s16 + $0x18] sm:$0xff] }
  0xc4   : > { %3258 = vmatpush3.bf16.msra.mxu1 %v3255_v44  ;;  %3093 = vmatprep.mubr.msk.f32.mxu1 %vm511_vm0, %v2702_v47 }
  0xc7   : > { %3094 = vmatmul.mubr.msk.f32.vlgmr.msra.gmra.mrb[20].mxu1 %vm511_vm0, %v2703_v48 }
  0xc8   : > { %3096 = vmatprep.mubr.msk.f32.mxu1 %vm511_vm0, %v2704_v49 }
  0xcb   : > { %3097 = vmatmul.mubr.msk.f32.gmra.mrb[22].mxu1 %vm511_vm0, %v2705_v50  ;;  %v483_v50 = vld [vmem:[%s3677_s16 + $0x10] sm:$0xff] }
  0xcc   : > { %3099 = vmatprep.mubr.msk.f32.mxu1 %vm511_vm0, %v2706_v51 }
  0xcf   : > { %3100 = vmatmul.mubr.msk.f32.gmra.mrb[24].mxu1 %vm511_vm0, %v2707_v52 }
  0xd0   : > { %3102 = vmatprep.mubr.msk.f32.mxu1 %vm511_vm0, %v2708_v53 }
  0xd3   : > { %3103 = vmatmul.mubr.msk.f32.gmra.mrb[26].mxu1 %vm511_vm0, %v2709_v54 }
  0xd4   : > { %3105 = vmatprep.mubr.msk.f32.mxu1 %vm511_vm0, %v2710_v55 }
  0xd7   : > { %3106 = vmatmul.mubr.msk.f32.gmra.mrb[28].mxu1 %vm511_vm0, %v2711_v56  ;;  %v486_v56 = vld [vmem:[%s3677_s16 + $0x28] sm:$0xff] }
  0xfc   : > { %v2939_v58 = vpop.f32.mrb[0].mxu0 }
  0xfd   : > { %v608_v59 = vpop.f32.mrb[1].mxu0 }
 0x100   : > { %v2942_v60 = vpop.f32.mrb[2].mxu0 }
 0x101   : > { %v618_v61 = vpop.f32.mrb[3].mxu0 }
 0x104   : > { %v2945_v62 = vpop.f32.mrb[4].mxu0 }
 0x105   : > { %v628_v63 = vpop.f32.mrb[5].mxu0 }
 0x108   : > { %v2948_v0 = vpop.f32.mrb[6].mxu0 }
 0x109   : > { %v638_v1 = vpop.f32.mrb[7].mxu0 }
 0x10c   : > { %v2951_v2 = vpop.f32.mrb[8].mxu0 }
 0x10d   : > { %v648_v3 = vpop.f32.mrb[9].mxu0 }
 0x172   : > { %v2974_v4 = vpop.f32.mrb[0].mxu1 }
 0x173   : > { %v805_v5 = vpop.f32.mrb[1].mxu1 }
 0x174   : > { %2989 = vmatprep.mubr.msk.f32.mxu0 %vm855_vm1, %v805_v5 }
 0x175   : > { %2990 = vmatmul.mubr.msk.f32.vlgmr.msra.gmra.mrb[10].mxu0 %vm855_vm1, %v2974_v4 }
 0x176   : > { %3005 = vmatpush3.msra.mxu0 %v657_v57  ;;  %v2977_v7 = vpop.f32.mrb[2].mxu1 }
 0x177   : > { %v815_v8 = vpop.f32.mrb[3].mxu1  ;;  %3056 = vmatprep.subr.mxu0 %v1332_v6 }
 0x178   : > { %2992 = vmatprep.mubr.msk.f32.mxu0 %vm855_vm1, %v815_v8 }
 0x179   : > { %2993 = vmatmul.mubr.msk.f32.gmra.mrb[12].mxu0 %vm855_vm1, %v2977_v7 }
 0x17a   : > { %v2980_v9 = vpop.f32.mrb[4].mxu1 }
 0x17b   : > { %v825_v10 = vpop.f32.mrb[5].mxu1 }
 0x17c   : > { %2995 = vmatprep.mubr.msk.f32.mxu0 %vm855_vm1, %v825_v10 }
 0x17d   : > { %2996 = vmatmul.mubr.msk.f32.gmra.mrb[14].mxu0 %vm855_vm1, %v2980_v9 }
 0x17e   : > { %v2983_v11 = vpop.f32.mrb[6].mxu1 }
 0x17f   : > { %v835_v12 = vpop.f32.mrb[7].mxu1 }
 0x180   : > { %2998 = vmatprep.mubr.msk.f32.mxu0 %vm855_vm1, %v835_v12  ;;  %v490_v12 = vld [vmem:[%s3677_s16 + $0x48] sm:$0xff] }
 0x181   : > { %2999 = vmatmul.mubr.msk.f32.gmra.mrb[16].mxu0 %vm855_vm1, %v2983_v11 }
 0x182   : > { %v2986_v13 = vpop.f32.mrb[8].mxu1 }
 0x183   : > { %v845_v14 = vpop.f32.mrb[9].mxu1 }
 0x184   : > { %3001 = vmatprep.mubr.msk.f32.mxu0 %vm855_vm1, %v845_v14 }
 0x185   : > { %3002 = vmatmul.mubr.msk.f32.gmra.mrb[18].mxu0 %vm855_vm1, %v2986_v13 }
 0x186   : > { %3006 = vmatprep.mubr.msk.f32.mxu0 %vm855_vm1, %v608_v59  ;;  %v3043_v15 = vpop.f32.mrb[10].mxu1 }
 0x187   : > { %v1283_v16 = vpop.f32.mrb[11].mxu1 }
 0x189   : > { %3007 = vmatmul.mubr.msk.f32.vlgmr.msra.gmra.mrb[10].mxu0 %vm855_vm1, %v2939_v58 }
 0x18a   : > { %3057 = vmatpush3.msra.mxu0 %v1332_v6  ;;  %3009 = vmatprep.mubr.msk.f32.mxu0 %vm855_vm1, %v618_v61  ;;  %v3046_v18 = vpop.f32.mrb[12].mxu1  ;;  %v487_v6 = vld [vmem:[%s3677_s16 + $0x30] sm:$0xff] }
 0x18b   : > { %3108 = vmatprep.subr.mxu0 %v1674_v17  ;;  %v1293_v19 = vpop.f32.mrb[13].mxu1 }
 0x18d   : > { %3010 = vmatmul.mubr.msk.f32.gmra.mrb[12].mxu0 %vm855_vm1, %v2942_v60  ;;  %v485_v60 = vld [vmem:[%s3677_s16 + $0x20] sm:$0xff] }
 0x18e   : > { %3012 = vmatprep.mubr.msk.f32.mxu0 %vm855_vm1, %v628_v63  ;;  %v3049_v20 = vpop.f32.mrb[14].mxu1 }
 0x18f   : > { %v1303_v21 = vpop.f32.mrb[15].mxu1 }
 0x191   : > { %3013 = vmatmul.mubr.msk.f32.gmra.mrb[14].mxu0 %vm855_vm1, %v2945_v62 }
 0x192   : > { %3015 = vmatprep.mubr.msk.f32.mxu0 %vm855_vm1, %v638_v1  ;;  %v3052_v22 = vpop.f32.mrb[16].mxu1 }
 0x193   : > { %v1313_v23 = vpop.f32.mrb[17].mxu1 }
 0x195   : > { %3016 = vmatmul.mubr.msk.f32.gmra.mrb[16].mxu0 %vm855_vm1, %v2948_v0 }
 0x196   : > { %3018 = vmatprep.mubr.msk.f32.mxu0 %vm855_vm1, %v648_v3  ;;  %v3055_v24 = vpop.f32.mrb[18].mxu1 }
 0x197   : > { %v1323_v25 = vpop.f32.mrb[19].mxu1 }
 0x199   : > { %3019 = vmatmul.mubr.msk.f32.gmra.mrb[18].mxu0 %vm855_vm1, %v2951_v2  ;;  %v488_v2 = vld [vmem:[%s3677_s16 + $0x38] sm:$0xff] }
 0x19a   : > { %3058 = vmatprep.mubr.msk.f32.mxu0 %vm855_vm1, %v1283_v16  ;;  %v3095_v26 = vpop.f32.mrb[20].mxu1  ;;  %v489_v16 = vld [vmem:[%s3677_s16 + $0x40] sm:$0xff] }
 0x19b   : > { %v1625_v27 = vpop.f32.mrb[21].mxu1 }
 0x19d   : > { %3059 = vmatmul.mubr.msk.f32.vlgmr.msra.gmra.mrb[10].mxu0 %vm855_vm1, %v3043_v15 }
 0x19e   : > { %3109 = vmatpush3.msra.mxu0 %v1674_v17  ;;  %3061 = vmatprep.mubr.msk.f32.mxu0 %vm855_vm1, %v1293_v19  ;;  %v3098_v28 = vpop.f32.mrb[22].mxu1 }
 0x19f   : > { %v1635_v29 = vpop.f32.mrb[23].mxu1 }
 0x1a1   : > { %3062 = vmatmul.mubr.msk.f32.gmra.mrb[12].mxu0 %vm855_vm1, %v3046_v18 }
 0x1a2   : > { %3064 = vmatprep.mubr.msk.f32.mxu0 %vm855_vm1, %v1303_v21  ;;  %v3101_v30 = vpop.f32.mrb[24].mxu1 }
 0x1a3   : > { %v1645_v31 = vpop.f32.mrb[25].mxu1 }
 0x1a5   : > { %3065 = vmatmul.mubr.msk.f32.gmra.mrb[14].mxu0 %vm855_vm1, %v3049_v20 }
 0x1a6   : > { %3067 = vmatprep.mubr.msk.f32.mxu0 %vm855_vm1, %v1313_v23  ;;  %v3104_v32 = vpop.f32.mrb[26].mxu1 }
 0x1a7   : > { %v1655_v33 = vpop.f32.mrb[27].mxu1 }
 0x1a9   : > { %3068 = vmatmul.mubr.msk.f32.gmra.mrb[16].mxu0 %vm855_vm1, %v3052_v22 }
 0x1aa   : > { %3070 = vmatprep.mubr.msk.f32.mxu0 %vm855_vm1, %v1323_v25  ;;  %v3107_v34 = vpop.f32.mrb[28].mxu1 }
 0x1ab   : > { %v1665_v35 = vpop.f32.mrb[29].mxu1 }
 0x1ad   : > { %3071 = vmatmul.mubr.msk.f32.gmra.mrb[18].mxu0 %vm855_vm1, %v3055_v24 }
 0x1ae   : > { %3110 = vmatprep.mubr.msk.f32.mxu0 %vm855_vm1, %v1625_v27 }
 0x1b1   : > { %3111 = vmatmul.mubr.msk.f32.vlgmr.msra.gmra.mrb[10].mxu0 %vm855_vm1, %v3095_v26 }
 0x1b2   : > { %3113 = vmatprep.mubr.msk.f32.mxu0 %vm855_vm1, %v1635_v29 }
 0x1b5   : > { %3114 = vmatmul.mubr.msk.f32.gmra.mrb[12].mxu0 %vm855_vm1, %v3098_v28 }
 0x1b6   : > { %3116 = vmatprep.mubr.msk.f32.mxu0 %vm855_vm1, %v1645_v31 }
 0x1b9   : > { %3117 = vmatmul.mubr.msk.f32.gmra.mrb[14].mxu0 %vm855_vm1, %v3101_v30 }
 0x1ba   : > { %3119 = vmatprep.mubr.msk.f32.mxu0 %vm855_vm1, %v1655_v33 }
 0x1bd   : > { %3120 = vmatmul.mubr.msk.f32.gmra.mrb[16].mxu0 %vm855_vm1, %v3104_v32 }
 0x1be   : > { %3122 = vmatprep.mubr.msk.f32.mxu0 %vm855_vm1, %v1665_v35 }
 0x1c1   : > { %3123 = vmatmul.mubr.msk.f32.gmra.mrb[18].mxu0 %vm855_vm1, %v3107_v34 }
 0x284   : > { %v3112_v37 = vpop.f32.mrb[10].mxu0 }
 0x285   : > { %v1838_v39 = vadd.f32 %v3112_v37, %v2732_v36  ;;  %v1771_v40 = vpop.f32.mrb[11].mxu0 }
 0x286   : > { %v1837_v42 = vadd.f32 %v2732_v36, %v1771_v40 }
 0x287   : > { %v1848_v43 = vadd.f32 %v1838_v39, %v482_v38 }
 0x288   : > { %v3115_v44 = vpop.f32.mrb[12].mxu0  ;;  %v1847_v45 = vadd.f32 %v1837_v42, %v481_v41 }
 0x289   : > { %v1840_v47 = vadd.f32 %v3115_v44, %v2732_v36  ;;  %v1781_v48 = vpop.f32.mrb[13].mxu0  ;;  %v1861_v49 = vsel %vm1857_vm2, %v1848_v43, 0.0 }
 0x28a   : > { %v1839_v51 = vadd.f32 %v2732_v36, %v1781_v48  ;;  %1862 = vadd.xlane.f32.xlu0 %v1861_v49  ;;  %v1858_v52 = vsel %vm1857_vm2, %v1847_v45, 0.0 }
 0x28b   : > { %1859 = vadd.xlane.f32.xlu1 %v1858_v52  ;;  %v1850_v53 = vadd.f32 %v1840_v47, %v484_v46 }
 0x28c   : > { %v3118_v54 = vpop.f32.mrb[14].mxu0  ;;  %v1849_v55 = vadd.f32 %v1839_v51, %v483_v50 }
 0x28d   : > { %v1842_v57 = vadd.f32 %v3118_v54, %v2732_v36  ;;  %v1791_v58 = vpop.f32.mrb[15].mxu0  ;;  %v1867_v59 = vsel %vm1857_vm2, %v1850_v53, 0.0 }
 0x28e   : > { %v1841_v61 = vadd.f32 %v2732_v36, %v1791_v58  ;;  %v1864_v62 = vsel %vm1857_vm2, %v1849_v55, 0.0 }
 0x28f   : > { %1868 = vadd.xlane.f32.xlu1 %v1867_v59  ;;  %1865 = vadd.xlane.f32.xlu0 %v1864_v62  ;;  %v1852_v63 = vadd.f32 %v1842_v57, %v486_v56 }
 0x290   : > { %v3121_v0 = vpop.f32.mrb[16].mxu0  ;;  %v1851_v1 = vadd.f32 %v1841_v61, %v485_v60 }
 0x291   : > { %v1844_v3 = vadd.f32 %v3121_v0, %v2732_v36  ;;  %v1801_v4 = vpop.f32.mrb[17].mxu0  ;;  %v1873_v5 = vsel %vm1857_vm2, %v1852_v63, 0.0 }
 0x292   : > { %v1843_v7 = vadd.f32 %v2732_v36, %v1801_v4  ;;  %v1870_v8 = vsel %vm1857_vm2, %v1851_v1, 0.0 }
 0x293   : > { %1874 = vadd.xlane.f32.xlu1 %v1873_v5  ;;  %1871 = vadd.xlane.f32.xlu0 %v1870_v8  ;;  %v1854_v9 = vadd.f32 %v1844_v3, %v488_v2 }
 0x294   : > { %v3124_v10 = vpop.f32.mrb[18].mxu0  ;;  %v1853_v11 = vadd.f32 %v1843_v7, %v487_v6 }
 0x295   : > { %v1846_v13 = vadd.f32 %v3124_v10, %v2732_v36  ;;  %v1811_v14 = vpop.f32.mrb[19].mxu0  ;;  %v1879_v15 = vsel %vm1857_vm2, %v1854_v9, 0.0  ;;  %v2024_v10 = vld [vmem:[%s4010_s7 + $0x8] sm:$0xff] }
 0x296   : > { %v1845_v17 = vadd.f32 %v2732_v36, %v1811_v14  ;;  %v1876_v18 = vsel %vm1857_vm2, %v1853_v11, 0.0 }
 0x297   : > { %1880 = vadd.xlane.f32.xlu1 %v1879_v15  ;;  %1877 = vadd.xlane.f32.xlu0 %v1876_v18  ;;  %v1856_v19 = vadd.f32 %v1846_v13, %v490_v12  ;;  %v2025_v12 = vld [vmem:[%s4010_s7 + $0x10] sm:$0xff]  ;;  %v2026_v13 = vld [vmem:[%s4010_s7 + $0x18] sm:$0xff]  ;;  %v2189_v15 = vld [vmem:[%s4012_s9] sm:$0xff] }
 0x298   : > { %v1855_v20 = vadd.f32 %v1845_v17, %v489_v16  ;;  %v3263_v14 = vpack.c.bf16 %v2026_v13, %v2025_v12  ;;  %v2190_v16 = vld [vmem:[%s4012_s9 + $0x8] sm:$0xff] }
 0x299   : > { %v1885_v21 = vsel %vm1857_vm2, %v1856_v19, 0.0  ;;  %v3770_v17 = vpack.c.bf16 %v2190_v16, %v2189_v15 }
 0x29a   : > { %v1882_v22 = vsel %vm1857_vm2, %v1855_v20, 0.0 }
 0x29b   : > { %1886 = vadd.xlane.f32.xlu1 %v1885_v21  ;;  %1883 = vadd.xlane.f32.xlu0 %v1882_v22 }
 0x317   : > { %v1863_v23 = vpop.xlane.xlu0 %1862 }
 0x318   : > { %v1890_v24 = vmul.f32 0.03125, %v1863_v23  ;;  %v1860_v25 = vpop.xlane.xlu1 %1859 }
 0x319   : > { %v1889_v26 = vmul.f32 0.03125, %v1860_v25 }
 0x31a   : > { %v3702_v27 = vsub.f32 %v1848_v43, %v1890_v24 }
 0x31b   : > { %v3704_v28 = vsub.f32 %v1847_v45, %v1889_v26 }
 0x31c   : > { %v1869_v29 = vpop.xlane.xlu1 %1868  ;;  %v1866_v30 = vpop.xlane.xlu0 %1865  ;;  %v1910_v31 = vmul.f32 %v3702_v27, %v3702_v27 }
 0x31d   : > { %v1892_v32 = vmul.f32 0.03125, %v1869_v29  ;;  %v1891_v33 = vmul.f32 0.03125, %v1866_v30  ;;  %v1909_v34 = vmul.f32 %v3704_v28, %v3704_v28 }
 0x31e   : > { %v1922_v35 = vsel %vm1857_vm2, %v1910_v31, 0.0 }
 0x31f   : > { %v3711_v36 = vsub.f32 %v1850_v53, %v1892_v32  ;;  %v3713_v37 = vsub.f32 %v1849_v55, %v1891_v33  ;;  %1923 = vadd.xlane.f32.xlu1 %v1922_v35  ;;  %v1919_v38 = vsel %vm1857_vm2, %v1909_v34, 0.0 }
 0x320   : > { %v1875_v39 = vpop.xlane.xlu1 %1874  ;;  %v1872_v40 = vpop.xlane.xlu0 %1871  ;;  %1920 = vadd.xlane.f32.xlu0 %v1919_v38 }
 0x321   : > { %v1894_v41 = vmul.f32 0.03125, %v1875_v39  ;;  %v1893_v42 = vmul.f32 0.03125, %v1872_v40  ;;  %v1912_v43 = vmul.f32 %v3711_v36, %v3711_v36  ;;  %v1911_v44 = vmul.f32 %v3713_v37, %v3713_v37 }
 0x323   : > { %v3720_v45 = vsub.f32 %v1852_v63, %v1894_v41  ;;  %v3722_v46 = vsub.f32 %v1851_v1, %v1893_v42  ;;  %v1928_v47 = vsel %vm1857_vm2, %v1912_v43, 0.0  ;;  %v1925_v48 = vsel %vm1857_vm2, %v1911_v44, 0.0 }
 0x324   : > { %v1881_v49 = vpop.xlane.xlu1 %1880  ;;  %v1878_v50 = vpop.xlane.xlu0 %1877  ;;  %1929 = vadd.xlane.f32.xlu1 %v1928_v47  ;;  %1926 = vadd.xlane.f32.xlu0 %v1925_v48  ;;  %v3776_v47 = vld [vmem:[%s4008_s5] ss:$0 sm:$0xff] }
 0x325   : > { %v1896_v51 = vmul.f32 0.03125, %v1881_v49  ;;  %v1895_v52 = vmul.f32 0.03125, %v1878_v50  ;;  %v1914_v53 = vmul.f32 %v3720_v45, %v3720_v45  ;;  %v1913_v54 = vmul.f32 %v3722_v46, %v3722_v46 }
 0x327   : > { %v3730_v55 = vsub.f32 %v1854_v9, %v1896_v51  ;;  %v3732_v56 = vsub.f32 %v1853_v11, %v1895_v52  ;;  %v1934_v57 = vsel %vm1857_vm2, %v1914_v53, 0.0  ;;  %v1931_v58 = vsel %vm1857_vm2, %v1913_v54, 0.0  ;;  %v2023_v9 = vld [vmem:[%s4010_s7] sm:$0xff] }
 0x328   : > { %1935 = vadd.xlane.f32.xlu1 %v1934_v57  ;;  %v1887_v59 = vpop.xlane.xlu1 %1886  ;;  %1932 = vadd.xlane.f32.xlu0 %v1931_v58  ;;  %v1884_v60 = vpop.xlane.xlu0 %1883  ;;  %v3259_v11 = vpack.c.bf16 %v2024_v10, %v2023_v9  ;;  %v3783_v57 = vld [vmem:[%s4009_s6] ss:$0 sm:$0xff] }
 0x329   : > { %v1898_v61 = vmul.f32 0.03125, %v1887_v59  ;;  %v1897_v62 = vmul.f32 0.03125, %v1884_v60  ;;  %v1916_v63 = vmul.f32 %v3730_v55, %v3730_v55  ;;  %v1915_v0 = vmul.f32 %v3732_v56, %v3732_v56 }
 0x32a   : > { %3260 = vmatprep.subr.bf16.mxu1 %v3259_v11 }
 0x32b   : > { %v3740_v1 = vsub.f32 %v1856_v19, %v1898_v61  ;;  %v3742_v2 = vsub.f32 %v1855_v20, %v1897_v62  ;;  %v1940_v3 = vsel %vm1857_vm2, %v1916_v63, 0.0  ;;  %v1937_v4 = vsel %vm1857_vm2, %v1915_v0, 0.0  ;;  %3262 = vmatpush3.bf16.msra.mxu1 %v3259_v11 }
 0x32c   : > { %1941 = vadd.xlane.f32.xlu1 %v1940_v3  ;;  %1938 = vadd.xlane.f32.xlu0 %v1937_v4 }
 0x32d   : > { %v1918_v5 = vmul.f32 %v3740_v1, %v3740_v1  ;;  %v1917_v6 = vmul.f32 %v3742_v2, %v3742_v2  ;;  %3264 = vmatprep.subr.bf16.mxu1 %v3263_v14 }
 0x32f   : > { %v1946_v7 = vsel %vm1857_vm2, %v1918_v5, 0.0  ;;  %v1943_v8 = vsel %vm1857_vm2, %v1917_v6, 0.0  ;;  %3266 = vmatpush3.bf16.msra.mxu1 %v3263_v14 }
 0x330   : > { %1947 = vadd.xlane.f32.xlu1 %v1946_v7  ;;  %1944 = vadd.xlane.f32.xlu0 %v1943_v8 }
 0x331   : > { %3268 = vmatprep.subr.bf16.mxu1 %v3770_v17 }
 0x3ac   : > { %v1924_v18 = vpop.xlane.xlu1 %1923 }
 0x3ad   : > { %v1950_v19 = vmul.f32 0.03125, %v1924_v18  ;;  %v1921_v20 = vpop.xlane.xlu0 %1920 }
 0x3ae   : > { %v1949_v21 = vmul.f32 0.03125, %v1921_v20 }
 0x3af   : > { %v1960_v22 = vadd.f32 1e-05, %v1950_v19 }
 0x3b0   : > { %v1959_v23 = vadd.f32 1e-05, %v1949_v21 }
 0x3b1   : > { %3401 = vrsqrt.f32 %v1960_v22  ;;  %v1930_v24 = vpop.xlane.xlu1 %1929  ;;  %v1927_v25 = vpop.xlane.xlu0 %1926 }
 0x3b2   : > { %3403 = vrsqrt.f32 %v1959_v23  ;;  %v1952_v26 = vmul.f32 0.03125, %v1930_v24  ;;  %v1951_v29 = vmul.f32 0.03125, %v1927_v25 }
 0x3b4   : > { %v1962_v30 = vadd.f32 1e-05, %v1952_v26  ;;  %v1961_v31 = vadd.f32 1e-05, %v1951_v29 }
 0x3b5   : > { %v1936_v32 = vpop.xlane.xlu1 %1935  ;;  %v1933_v33 = vpop.xlane.xlu0 %1932 }
 0x3b6   : > { %3405 = vrsqrt.f32 %v1962_v30  ;;  %v1954_v34 = vmul.f32 0.03125, %v1936_v32  ;;  %v1953_v35 = vmul.f32 0.03125, %v1933_v33 }
 0x3b7   : > { %3407 = vrsqrt.f32 %v1961_v31 }
 0x3b8   : > { %v1964_v38 = vadd.f32 1e-05, %v1954_v34  ;;  %v1963_v39 = vadd.f32 1e-05, %v1953_v35  ;;  %v2196_v35 = vld [vmem:[%s4012_s9 + $0x38] sm:$0xff] }
 0x3b9   : > { %v1942_v40 = vpop.xlane.xlu1 %1941  ;;  %v1939_v41 = vpop.xlane.xlu0 %1938 }
 0x3ba   : > { %3409 = vrsqrt.f32 %v1964_v38  ;;  %v1956_v42 = vmul.f32 0.03125, %v1942_v40  ;;  %v1955_v43 = vmul.f32 0.03125, %v1939_v41 }
 0x3bb   : > { %v3402_v44 = vpop.eup %3401  ;;  %3411 = vrsqrt.f32 %v1963_v39  ;;  %v2735_v39 = vld [vmem:[%s4011_s8] ss:$0 sm:$0xff] }
 0x3bc   : > { %v3404_v48 = vpop.eup %3403  ;;  %v1980_v49 = vmul.f32 %v3402_v44, %v3702_v27  ;;  %v1966_v50 = vadd.f32 1e-05, %v1956_v42  ;;  %v1965_v51 = vadd.f32 1e-05, %v1955_v43  ;;  %v2191_v27 = vld [vmem:[%s4012_s9 + $0x10] sm:$0xff] }
 0x3bd   : > { %v1948_v52 = vpop.xlane.xlu1 %1947  ;;  %v1945_v53 = vpop.xlane.xlu0 %1944  ;;  %v1979_v54 = vmul.f32 %v3404_v48, %v3704_v28  ;;  %v2192_v28 = vld [vmem:[%s4012_s9 + $0x18] sm:$0xff] }
 0x3be   : > { %v1997_v58 = vmul.f32 %v3776_v47, %v1980_v49  ;;  %3413 = vrsqrt.f32 %v1966_v50  ;;  %v1958_v59 = vmul.f32 0.03125, %v1948_v52  ;;  %v1957_v60 = vmul.f32 0.03125, %v1945_v53 }
 0x3bf   : > { %3415 = vrsqrt.f32 %v1965_v51  ;;  %v1996_v61 = vmul.f32 %v3776_v47, %v1979_v54  ;;  %v3271_v8 = vpack.c.bf16 %v2192_v28, %v2191_v27 }
 0x3c0   : > { %v3406_v62 = vpop.eup %3405  ;;  %v1968_v63 = vadd.f32 1e-05, %v1958_v59  ;;  %v1967_v0 = vadd.f32 1e-05, %v1957_v60  ;;  %v3798_v6 = vadd.f32 %v3783_v57, %v1997_v58 }
 0x3c1   : > { %v3408_v3 = vpop.eup %3407  ;;  %v3794_v4 = vadd.f32 %v3783_v57, %v1996_v61  ;;  %v1982_v5 = vmul.f32 %v3406_v62, %v3711_v36  ;;  %v2193_v36 = vld [vmem:[%s4012_s9 + $0x20] sm:$0xff] }
 0x3c2   : > { %3417 = vrsqrt.f32 %v1968_v63  ;;  %v1981_v7 = vmul.f32 %v3408_v3, %v3713_v37  ;;  %v2194_v37 = vld [vmem:[%s4012_s9 + $0x28] sm:$0xff] }
 0x3c3   : > { %3419 = vrsqrt.f32 %v1967_v0  ;;  %3133 = vmatprep.mubr.msk.f32.mxu1 %vm1857_vm2, %v3794_v4  ;;  %v1999_v9 = vmul.f32 %v3776_v47, %v1982_v5  ;;  %v3275_v19 = vpack.c.bf16 %v2194_v37, %v2193_v36  ;;  %v2746_v36 = vld [vmem:[%s4013_s10] ss:$0 sm:$0xff] }
 0x3c4   : > { %v3410_v10 = vpop.eup %3409  ;;  %3134 = vmatmul.mubr.msk.f32.vlgmr.msra.gmra.mrb[30].mxu1 %vm1857_vm2, %v3798_v6  ;;  %v1998_v11 = vmul.f32 %v3776_v47, %v1981_v7 }
 0x3c5   : > { %v3412_v12 = vpop.eup %3411  ;;  %v3814_v13 = vadd.f32 %v3783_v57, %v1999_v9  ;;  %v1984_v14 = vmul.f32 %v3410_v10, %v3720_v45  ;;  %3270 = vmatpush3.bf16.msra.mxu1 %v3770_v17 }
 0x3c6   : > { %v3819_v15 = vadd.f32 %v3783_v57, %v1998_v11  ;;  %v1983_v16 = vmul.f32 %v3412_v12, %v3722_v46  ;;  %3272 = vmatprep.subr.bf16.mxu1 %v3271_v8 }
 0x3c7   : > { %v2001_v18 = vmul.f32 %v3776_v47, %v1984_v14 }
 0x3c8   : > { %v3414_v20 = vpop.eup %3413  ;;  %3136 = vmatprep.mubr.msk.f32.mxu1 %vm1857_vm2, %v3819_v15  ;;  %v2000_v21 = vmul.f32 %v3776_v47, %v1983_v16 }
 0x3c9   : > { %v3416_v22 = vpop.eup %3415  ;;  %3137 = vmatmul.mubr.msk.f32.gmra.mrb[32].mxu1 %vm1857_vm2, %v3814_v13  ;;  %v3829_v45 = vadd.f32 %v3783_v57, %v2001_v18  ;;  %v1986_v17 = vmul.f32 %v3414_v20, %v3730_v55 }
 0x3ca   : > { %v3833_v46 = vadd.f32 %v3783_v57, %v2000_v21  ;;  %v1985_v23 = vmul.f32 %v3416_v22, %v3732_v56  ;;  %3274 = vmatpush3.bf16.msra.mxu1 %v3271_v8 }
 0x3cb   : > { %v2003_v24 = vmul.f32 %v3776_v47, %v1986_v17  ;;  %3276 = vmatprep.subr.bf16.mxu1 %v3275_v19 }
 0x3cc   : > { %v3418_v25 = vpop.eup %3417  ;;  %3139 = vmatprep.mubr.msk.f32.mxu1 %vm1857_vm2, %v3833_v46  ;;  %v2002_v26 = vmul.f32 %v3776_v47, %v1985_v23 }
 0x3cd   : > { %v3420_v29 = vpop.eup %3419  ;;  %3140 = vmatmul.mubr.msk.f32.gmra.mrb[34].mxu1 %vm1857_vm2, %v3829_v45  ;;  %v3843_v55 = vadd.f32 %v3783_v57, %v2003_v24  ;;  %v1988_v30 = vmul.f32 %v3418_v25, %v3740_v1 }
 0x3ce   : > { %v3847_v56 = vadd.f32 %v3783_v57, %v2002_v26  ;;  %v1987_v31 = vmul.f32 %v3420_v29, %v3742_v2  ;;  %3278 = vmatpush3.bf16.msra.mxu1 %v3275_v19  ;;  %v2195_v2 = vld [vmem:[%s4012_s9 + $0x30] sm:$0xff] }
 0x3cf   : > { %v2005_v32 = vmul.f32 %v3776_v47, %v1988_v30  ;;  %v3279_v38 = vpack.c.bf16 %v2196_v35, %v2195_v2 }
 0x3d0   : > { %3142 = vmatprep.mubr.msk.f32.mxu1 %vm1857_vm2, %v3847_v56  ;;  %v2004_v33 = vmul.f32 %v3776_v47, %v1987_v31 }
 0x3d1   : > { %3143 = vmatmul.mubr.msk.f32.gmra.mrb[36].mxu1 %vm1857_vm2, %v3843_v55  ;;  %v3857_v34 = vadd.f32 %v3783_v57, %v2005_v32  ;;  %3280 = vmatprep.subr.bf16.mxu1 %v3279_v38 }
 0x3d2   : > { %v3860_v1 = vadd.f32 %v3783_v57, %v2004_v33  ;;  %3282 = vmatpush3.bf16.msra.mxu1 %v3279_v38 }
 0x3d4   : > { %3145 = vmatprep.mubr.msk.f32.mxu1 %vm1857_vm2, %v3860_v1 }
 0x3d5   : > { %3146 = vmatmul.mubr.msk.f32.gmra.mrb[38].mxu1 %vm1857_vm2, %v3857_v34 }
 0x497   : > { %v3135_v40 = vpop.f32.mrb[30].mxu1 }
 0x498   : > { %v2136_v41 = vadd.f32 %v3135_v40, %v2735_v39  ;;  %v2130_v42 = vpop.f32.mrb[31].mxu1 }
 0x499   : > { %v2131_v43 = vadd.f32 %v2735_v39, %v2130_v42 }
 0x49a   : > { %v2180_v47 = vmax.f32 %v2136_v41, 0.0 }
 0x49b   : > { %v2179_v44 = vmax.f32 %v2131_v43, 0.0 }
 0x49c   : > { %v3138_v48 = vpop.f32.mrb[32].mxu1 }
 0x49d   : > { %v2146_v49 = vadd.f32 %v3138_v48, %v2735_v39  ;;  %v2140_v50 = vpop.f32.mrb[33].mxu1  ;;  %3164 = vmatprep.mubr.msk.f32.mxu1 %vm2204_vm3, %v2179_v44 }
 0x49e   : > { %v2141_v51 = vadd.f32 %v2735_v39, %v2140_v50  ;;  %3165 = vmatmul.mubr.msk.f32.vlgmr.msra.gmra.mrb[40].mxu1 %vm2204_vm3, %v2180_v47 }
 0x49f   : > { %v2182_v54 = vmax.f32 %v2146_v49, 0.0 }
 0x4a0   : > { %v2181_v52 = vmax.f32 %v2141_v51, 0.0  ;;  %v3141_v53 = vpop.f32.mrb[34].mxu1 }
 0x4a1   : > { %v2156_v57 = vadd.f32 %v3141_v53, %v2735_v39  ;;  %v2150_v58 = vpop.f32.mrb[35].mxu1 }
 0x4a2   : > { %v2151_v59 = vadd.f32 %v2735_v39, %v2150_v58  ;;  %3167 = vmatprep.mubr.msk.f32.mxu1 %vm2204_vm3, %v2181_v52 }
 0x4a3   : > { %3168 = vmatmul.mubr.msk.f32.gmra.mrb[42].mxu1 %vm2204_vm3, %v2182_v54  ;;  %v2184_v27 = vmax.f32 %v2156_v57, 0.0 }
 0x4a4   : > { %v2183_v60 = vmax.f32 %v2151_v59, 0.0  ;;  %v3144_v61 = vpop.f32.mrb[36].mxu1 }
 0x4a5   : > { %v2166_v28 = vadd.f32 %v3144_v61, %v2735_v39  ;;  %v2160_v62 = vpop.f32.mrb[37].mxu1 }
 0x4a6   : > { %v2161_v63 = vadd.f32 %v2735_v39, %v2160_v62  ;;  %3170 = vmatprep.mubr.msk.f32.mxu1 %vm2204_vm3, %v2183_v60 }
 0x4a7   : > { %3171 = vmatmul.mubr.msk.f32.gmra.mrb[44].mxu1 %vm2204_vm3, %v2184_v27  ;;  %v2186_v5 = vmax.f32 %v2166_v28, 0.0 }
 0x4a8   : > { %v2185_v0 = vmax.f32 %v2161_v63, 0.0  ;;  %v3147_v3 = vpop.f32.mrb[38].mxu1 }
 0x4a9   : > { %v2176_v7 = vadd.f32 %v3147_v3, %v2735_v39  ;;  %v2170_v8 = vpop.f32.mrb[39].mxu1 }
 0x4aa   : > { %v2171_v9 = vadd.f32 %v2735_v39, %v2170_v8  ;;  %3173 = vmatprep.mubr.msk.f32.mxu1 %vm2204_vm3, %v2185_v0 }
 0x4ab   : > { %3174 = vmatmul.mubr.msk.f32.gmra.mrb[46].mxu1 %vm2204_vm3, %v2186_v5  ;;  %v2188_v11 = vmax.f32 %v2176_v7, 0.0 }
 0x4ac   : > { %v2187_v10 = vmax.f32 %v2171_v9, 0.0 }
 0x4ae   : > { %3176 = vmatprep.mubr.msk.f32.mxu1 %vm2204_vm3, %v2187_v10 }
 0x4af   : > { %3177 = vmatmul.mubr.msk.f32.gmra.mrb[48].mxu1 %vm2204_vm3, %v2188_v11 }
 0x571   : > { %v3166_v37 = vpop.f32.mrb[40].mxu1 }
 0x572   : > { %v2307_v12 = vadd.f32 %v3166_v37, %v2746_v36  ;;  %v2301_v14 = vpop.f32.mrb[41].mxu1 }
 0x573   : > { %v2302_v16 = vadd.f32 %v2746_v36, %v2301_v14 }
 0x574   : > { %v2351_v18 = vadd.f32 %v2307_v12, %v3798_v6 }
 0x575   : > { %v2350_v19 = vadd.f32 %v2302_v16, %v3794_v4 }
 0x576   : > { %v3169_v20 = vpop.f32.mrb[42].mxu1  ;;  %v2363_v21 = vsel %vm1857_vm2, %v2351_v18, 0.0 }
 0x577   : > { %v2317_v22 = vadd.f32 %v3169_v20, %v2746_v36  ;;  %v2311_v17 = vpop.f32.mrb[43].mxu1  ;;  %2364 = vadd.xlane.f32.xlu1 %v2363_v21  ;;  %v2360_v23 = vsel %vm1857_vm2, %v2350_v19, 0.0 }
 0x578   : > { %v2312_v24 = vadd.f32 %v2746_v36, %v2311_v17  ;;  %2361 = vadd.xlane.f32.xlu0 %v2360_v23 }
 0x579   : > { %v2353_v25 = vadd.f32 %v2317_v22, %v3814_v13 }
 0x57a   : > { %v3172_v26 = vpop.f32.mrb[44].mxu1  ;;  %v2352_v29 = vadd.f32 %v2312_v24, %v3819_v15 }
 0x57b   : > { %v2327_v30 = vadd.f32 %v3172_v26, %v2746_v36  ;;  %v2321_v31 = vpop.f32.mrb[45].mxu1  ;;  %v2369_v6 = vsel %vm1857_vm2, %v2353_v25, 0.0 }
 0x57c   : > { %v2322_v4 = vadd.f32 %v2746_v36, %v2321_v31  ;;  %2370 = vadd.xlane.f32.xlu1 %v2369_v6  ;;  %v2366_v32 = vsel %vm1857_vm2, %v2352_v29, 0.0 }
 0x57d   : > { %2367 = vadd.xlane.f32.xlu0 %v2366_v32  ;;  %v2355_v33 = vadd.f32 %v2327_v30, %v3829_v45 }
 0x57e   : > { %v3175_v2 = vpop.f32.mrb[46].mxu1  ;;  %v2354_v35 = vadd.f32 %v2322_v4, %v3833_v46 }
 0x57f   : > { %v2337_v38 = vadd.f32 %v3175_v2, %v2746_v36  ;;  %v2331_v39 = vpop.f32.mrb[47].mxu1  ;;  %v2375_v13 = vsel %vm1857_vm2, %v2355_v33, 0.0 }
 0x580   : > { %v2332_v40 = vadd.f32 %v2746_v36, %v2331_v39  ;;  %2376 = vadd.xlane.f32.xlu1 %v2375_v13  ;;  %v2372_v15 = vsel %vm1857_vm2, %v2354_v35, 0.0 }
 0x581   : > { %2373 = vadd.xlane.f32.xlu0 %v2372_v15  ;;  %v2357_v41 = vadd.f32 %v2337_v38, %v3843_v55 }
 0x582   : > { %v3178_v42 = vpop.f32.mrb[48].mxu1  ;;  %v2356_v43 = vadd.f32 %v2332_v40, %v3847_v56 }
 0x583   : > { %v2347_v44 = vadd.f32 %v3178_v42, %v2746_v36  ;;  %v2341_v47 = vpop.f32.mrb[49].mxu1  ;;  %v2381_v45 = vsel %vm1857_vm2, %v2357_v41, 0.0 }
 0x584   : > { %v2342_v48 = vadd.f32 %v2746_v36, %v2341_v47  ;;  %2382 = vadd.xlane.f32.xlu1 %v2381_v45  ;;  %v2378_v46 = vsel %vm1857_vm2, %v2356_v43, 0.0 }
 0x585   : > { %2379 = vadd.xlane.f32.xlu0 %v2378_v46  ;;  %v2359_v49 = vadd.f32 %v2347_v44, %v3857_v34 }
 0x586   : > { %v2358_v50 = vadd.f32 %v2342_v48, %v3860_v1 }
 0x587   : > { %v2387_v51 = vsel %vm1857_vm2, %v2359_v49, 0.0 }
 0x588   : > { %2388 = vadd.xlane.f32.xlu1 %v2387_v51  ;;  %v2384_v55 = vsel %vm1857_vm2, %v2358_v50, 0.0 }
 0x589   : > { %2385 = vadd.xlane.f32.xlu0 %v2384_v55 }
 0x604   : > { %v2365_v56 = vpop.xlane.xlu1 %2364 }
 0x605   : > { %v2391_v52 = vmul.f32 0.03125, %v2365_v56  ;;  %v2362_v53 = vpop.xlane.xlu0 %2361 }
 0x606   : > { %v2390_v54 = vmul.f32 0.03125, %v2362_v53 }
 0x607   : > { %v3908_v57 = vsub.f32 %v2351_v18, %v2391_v52 }
 0x608   : > { %v3910_v58 = vsub.f32 %v2350_v19, %v2390_v54 }
 0x609   : > { %v2371_v59 = vpop.xlane.xlu1 %2370  ;;  %v2411_v34 = vmul.f32 %v3908_v57, %v3908_v57 }
 0x60a   : > { %v2393_v60 = vmul.f32 0.03125, %v2371_v59  ;;  %v2368_v1 = vpop.xlane.xlu0 %2367  ;;  %v2410_v61 = vmul.f32 %v3910_v58, %v3910_v58 }
 0x60b   : > { %v2392_v27 = vmul.f32 0.03125, %v2368_v1  ;;  %v2423_v28 = vsel %vm1857_vm2, %v2411_v34, 0.0 }
 0x60c   : > { %v3917_v62 = vsub.f32 %v2353_v25, %v2393_v60  ;;  %2424 = vadd.xlane.f32.xlu1 %v2423_v28  ;;  %v2420_v63 = vsel %vm1857_vm2, %v2410_v61, 0.0  ;;  %v2757_v61 = vld [vmem:[%s4014_s11] ss:$0 sm:$0xff] }
 0x60d   : > { %v3920_v0 = vsub.f32 %v2352_v29, %v2392_v27  ;;  %v2377_v3 = vpop.xlane.xlu1 %2376  ;;  %2421 = vadd.xlane.f32.xlu0 %v2420_v63 }
 0x60e   : > { %v2395_v5 = vmul.f32 0.03125, %v2377_v3  ;;  %v2374_v7 = vpop.xlane.xlu0 %2373  ;;  %v2413_v8 = vmul.f32 %v3917_v62, %v3917_v62 }
 0x60f   : > { %v2394_v9 = vmul.f32 0.03125, %v2374_v7  ;;  %v2412_v10 = vmul.f32 %v3920_v0, %v3920_v0 }
 0x610   : > { %v3926_v11 = vsub.f32 %v2355_v33, %v2395_v5  ;;  %v2429_v36 = vsel %vm1857_vm2, %v2413_v8, 0.0  ;;  %v2758_v5 = vld [vmem:[%s4015_s12] ss:$0 sm:$0xff] }
 0x611   : > { %v3929_v37 = vsub.f32 %v2354_v35, %v2394_v9  ;;  %v2383_v12 = vpop.xlane.xlu1 %2382  ;;  %2430 = vadd.xlane.f32.xlu1 %v2429_v36  ;;  %v2426_v14 = vsel %vm1857_vm2, %v2412_v10, 0.0 }
 0x612   : > { %v2397_v16 = vmul.f32 0.03125, %v2383_v12  ;;  %v2380_v18 = vpop.xlane.xlu0 %2379  ;;  %2427 = vadd.xlane.f32.xlu0 %v2426_v14  ;;  %v2415_v19 = vmul.f32 %v3926_v11, %v3926_v11 }
 0x613   : > { %v2396_v20 = vmul.f32 0.03125, %v2380_v18  ;;  %v2414_v21 = vmul.f32 %v3929_v37, %v3929_v37 }
 0x614   : > { %v3936_v22 = vsub.f32 %v2357_v41, %v2397_v16  ;;  %v2435_v17 = vsel %vm1857_vm2, %v2415_v19, 0.0 }
 0x615   : > { %v3939_v23 = vsub.f32 %v2356_v43, %v2396_v20  ;;  %2436 = vadd.xlane.f32.xlu1 %v2435_v17  ;;  %v2389_v24 = vpop.xlane.xlu1 %2388  ;;  %v2432_v25 = vsel %vm1857_vm2, %v2414_v21, 0.0 }
 0x616   : > { %v2399_v26 = vmul.f32 0.03125, %v2389_v24  ;;  %2433 = vadd.xlane.f32.xlu0 %v2432_v25  ;;  %v2386_v29 = vpop.xlane.xlu0 %2385  ;;  %v2417_v30 = vmul.f32 %v3936_v22, %v3936_v22 }
 0x617   : > { %v2398_v31 = vmul.f32 0.03125, %v2386_v29  ;;  %v2416_v6 = vmul.f32 %v3939_v23, %v3939_v23 }
 0x618   : > { %v3946_v4 = vsub.f32 %v2359_v49, %v2399_v26  ;;  %v2441_v32 = vsel %vm1857_vm2, %v2417_v30, 0.0 }
 0x619   : > { %v3949_v33 = vsub.f32 %v2358_v50, %v2398_v31  ;;  %2442 = vadd.xlane.f32.xlu1 %v2441_v32  ;;  %v2438_v2 = vsel %vm1857_vm2, %v2416_v6, 0.0 }
 0x61a   : > { %2439 = vadd.xlane.f32.xlu0 %v2438_v2  ;;  %v2419_v35 = vmul.f32 %v3946_v4, %v3946_v4 }
 0x61b   : > { %v2418_v38 = vmul.f32 %v3949_v33, %v3949_v33 }
 0x61c   : > { %v2447_v39 = vsel %vm1857_vm2, %v2419_v35, 0.0 }
 0x61d   : > { %2448 = vadd.xlane.f32.xlu1 %v2447_v39  ;;  %v2444_v13 = vsel %vm1857_vm2, %v2418_v38, 0.0 }
 0x61e   : > { %2445 = vadd.xlane.f32.xlu0 %v2444_v13 }
 0x699   : > { %v2425_v40 = vpop.xlane.xlu1 %2424 }
 0x69a   : > { %v2451_v15 = vmul.f32 0.03125, %v2425_v40  ;;  %v2422_v41 = vpop.xlane.xlu0 %2421 }
 0x69b   : > { %v2450_v42 = vmul.f32 0.03125, %v2422_v41 }
 0x69c   : > { %v2461_v43 = vadd.f32 1e-05, %v2451_v15 }
 0x69d   : > { %v2460_v44 = vadd.f32 1e-05, %v2450_v42 }
 0x69e   : > { %3421 = vrsqrt.f32 %v2461_v43  ;;  %v2431_v47 = vpop.xlane.xlu1 %2430 }
 0x69f   : > { %3423 = vrsqrt.f32 %v2460_v44  ;;  %v2453_v45 = vmul.f32 0.03125, %v2431_v47  ;;  %v2428_v48 = vpop.xlane.xlu0 %2427 }
 0x6a0   : > { %v2452_v46 = vmul.f32 0.03125, %v2428_v48 }
 0x6a1   : > { %v2463_v49 = vadd.f32 1e-05, %v2453_v45 }
 0x6a2   : > { %v2462_v50 = vadd.f32 1e-05, %v2452_v46  ;;  %v2437_v51 = vpop.xlane.xlu1 %2436 }
 0x6a3   : > { %3425 = vrsqrt.f32 %v2463_v49  ;;  %v2455_v55 = vmul.f32 0.03125, %v2437_v51  ;;  %v2434_v56 = vpop.xlane.xlu0 %2433 }
 0x6a4   : > { %3427 = vrsqrt.f32 %v2462_v50  ;;  %v2454_v52 = vmul.f32 0.03125, %v2434_v56 }
 0x6a5   : > { %v2465_v53 = vadd.f32 1e-05, %v2455_v55 }
 0x6a6   : > { %v2464_v54 = vadd.f32 1e-05, %v2454_v52  ;;  %v2443_v59 = vpop.xlane.xlu1 %2442 }
 0x6a7   : > { %3429 = vrsqrt.f32 %v2465_v53  ;;  %v2457_v34 = vmul.f32 0.03125, %v2443_v59  ;;  %v2440_v60 = vpop.xlane.xlu0 %2439 }
 0x6a8   : > { %v3422_v1 = vpop.eup %3421  ;;  %3431 = vrsqrt.f32 %v2464_v54  ;;  %v2456_v27 = vmul.f32 0.03125, %v2440_v60 }
 0x6a9   : > { %v3424_v28 = vpop.eup %3423  ;;  %v2481_v63 = vmul.f32 %v3422_v1, %v3908_v57  ;;  %v2467_v3 = vadd.f32 1e-05, %v2457_v34 }
 0x6aa   : > { %v2480_v7 = vmul.f32 %v3424_v28, %v3910_v58  ;;  %v2466_v8 = vadd.f32 1e-05, %v2456_v27  ;;  %v2449_v9 = vpop.xlane.xlu1 %2448 }
 0x6ab   : > { %v2498_v10 = vmul.f32 %v2757_v61, %v2481_v63  ;;  %3433 = vrsqrt.f32 %v2467_v3  ;;  %v2459_v36 = vmul.f32 0.03125, %v2449_v9  ;;  %v2446_v12 = vpop.xlane.xlu0 %2445 }
 0x6ac   : > { %v2497_v57 = vmul.f32 %v2757_v61, %v2480_v7  ;;  %3435 = vrsqrt.f32 %v2466_v8  ;;  %v2458_v14 = vmul.f32 0.03125, %v2446_v12 }
 0x6ad   : > { %v3426_v16 = vpop.eup %3425  ;;  %v2515_v18 = vadd.f32 %v2758_v5, %v2498_v10  ;;  %v2469_v19 = vadd.f32 1e-05, %v2459_v36 }
 0x6ae   : > { %v3428_v58 = vpop.eup %3427  ;;  %v2514_v20 = vadd.f32 %v2758_v5, %v2497_v57  ;;  %v2483_v21 = vmul.f32 %v3426_v16, %v3917_v62  ;;  %v2468_v17 = vadd.f32 1e-05, %v2458_v14 }
 0x6af   : > { %2525 = vst.msk [vmem:[%s3970_s29 + $0x8] sm:$0xff] %vm1857_vm2, %v2515_v18  ;;  %v2482_v24 = vmul.f32 %v3428_v58, %v3920_v0  ;;  %3437 = vrsqrt.f32 %v2469_v19 }
 0x6b0   : > { %2524 = vst.msk [vmem:[%s3970_s29] sm:$0xff] %vm1857_vm2, %v2514_v20  ;;  %v2500_v25 = vmul.f32 %v2757_v61, %v2483_v21  ;;  %3439 = vrsqrt.f32 %v2468_v17 }
 0x6b1   : > { %v3430_v26 = vpop.eup %3429  ;;  %v2499_v29 = vmul.f32 %v2757_v61, %v2482_v24 }
 0x6b2   : > { %v3432_v30 = vpop.eup %3431  ;;  %v2517_v31 = vadd.f32 %v2758_v5, %v2500_v25  ;;  %v2485_v6 = vmul.f32 %v3430_v26, %v3926_v11 }
 0x6b3   : > { %v2516_v62 = vadd.f32 %v2758_v5, %v2499_v29  ;;  %v2484_v32 = vmul.f32 %v3432_v30, %v3929_v37 }
 0x6b4   : > { %2527 = vst.msk [vmem:[%s3970_s29 + $0x18] sm:$0xff] %vm1857_vm2, %v2517_v31  ;;  %v2502_v2 = vmul.f32 %v2757_v61, %v2485_v6 }
 0x6b5   : > { %v3434_v0 = vpop.eup %3433  ;;  %2526 = vst.msk [vmem:[%s3970_s29 + $0x10] sm:$0xff] %vm1857_vm2, %v2516_v62  ;;  %v2501_v35 = vmul.f32 %v2757_v61, %v2484_v32 }
 0x6b6   : > { %v3436_v38 = vpop.eup %3435  ;;  %v2519_v39 = vadd.f32 %v2758_v5, %v2502_v2  ;;  %v2487_v13 = vmul.f32 %v3434_v0, %v3936_v22 }
 0x6b7   : > { %v2518_v40 = vadd.f32 %v2758_v5, %v2501_v35  ;;  %v2486_v11 = vmul.f32 %v3436_v38, %v3939_v23 }
 0x6b8   : > { %2529 = vst.msk [vmem:[%s3970_s29 + $0x28] sm:$0xff] %vm1857_vm2, %v2519_v39  ;;  %v2504_v37 = vmul.f32 %v2757_v61, %v2487_v13 }
 0x6b9   : > { %v3438_v15 = vpop.eup %3437  ;;  %2528 = vst.msk [vmem:[%s3970_s29 + $0x20] sm:$0xff] %vm1857_vm2, %v2518_v40  ;;  %v2503_v41 = vmul.f32 %v2757_v61, %v2486_v11 }
 0x6ba   : > { %v3440_v42 = vpop.eup %3439  ;;  %v2521_v43 = vadd.f32 %v2758_v5, %v2504_v37  ;;  %v2489_v44 = vmul.f32 %v3438_v15, %v3946_v4 }
 0x6bb   : > { %v2520_v47 = vadd.f32 %v2758_v5, %v2503_v41  ;;  %v2488_v45 = vmul.f32 %v3440_v42, %v3949_v33 }
 0x6bc   : > { %2531 = vst.msk [vmem:[%s3970_s29 + $0x38] sm:$0xff] %vm1857_vm2, %v2521_v43  ;;  %v2506_v22 = vmul.f32 %v2757_v61, %v2489_v44 }
 0x6bd   : > { %2530 = vst.msk [vmem:[%s3970_s29 + $0x30] sm:$0xff] %vm1857_vm2, %v2520_v47  ;;  %v2505_v23 = vmul.f32 %v2757_v61, %v2488_v45 }
 0x6be   : > { %v2523_v48 = vadd.f32 %v2758_v5, %v2506_v22 }
 0x6bf   : > { %v2522_v46 = vadd.f32 %v2758_v5, %v2505_v23 }
 0x6c0   : > { %2533 = vst.msk [vmem:[%s3970_s29 + $0x48] sm:$0xff] %vm1857_vm2, %v2523_v48 }
 0x6c1   : > { %2532 = vst.msk [vmem:[%s3970_s29 + $0x40] sm:$0xff] %vm1857_vm2, %v2522_v46 }
 0x6c2 PF: > { %s23_s25 = sadd.s32 1, %s3447_s25  }
 0x6c3   : > { %p20_p4 = scmp.ge.s32.totalorder %s23_s25, 4  }
 0x6c5   :  { %22 = sbr.rel (!%p20_p4) target bundleno = 1 (0x1), region = 111 }

</bundles_post_ra>
